<compile_context>
chip_gen: v7x
topology: tpu7x:2x2x1
jax: 0.10.0
libtpu: 0.0.40
codegen_flags: <defaults>
</compile_context>

<pallas_src>
import functools

import jax
import jax.numpy as jnp
from jax.experimental import pallas as pl
from jax.experimental.pallas import tpu as pltpu


_DBUF_BUDGET = 24 * 1024 * 1024     # target bytes for double-buffered in+out blocks


def _round_up(x, m):
    return ((x + m - 1) // m) * m


# --------------------------------------------------------------------------- #
# Kernels
# --------------------------------------------------------------------------- #
def _lora_linear_kernel(x_ref, a_ref, b_ref, o_ref):
    """o = (x @ A^T) @ (scaling*B)^T for one (tile_M, c) row tile (fused)."""
    h = jnp.dot(x_ref[...], a_ref[...], preferred_element_type=jnp.float32)
    o_ref[...] = jnp.dot(h.astype(b_ref.dtype), b_ref[...],
                         preferred_element_type=jnp.float32).astype(o_ref.dtype)


def _expert_conv2d_kernel(x_ref, a_ref, b_ref, w_ref, bias_ref, mask_ref,
                          o_ref, xpad_ref, *, patch_w, rank, off, batch_block):
    """Fused conv2d-LoRA expert for a block of `batch_block` images.

    x_ref    : (B_blk, N, c)  input tokens (cls token first when N is odd)
    a_ref    : (c, r)         lora_A^T
    b_ref    : (r, c)         (scaling * lora_B)^T
    w_ref    : (9r, r)        3x3 conv weights, rows ordered (kh, kw, in_ch)
    bias_ref : (1, r)         conv bias
    mask_ref : (N, 9r)        tap-validity mask (cls row: centre tap only)
    o_ref    : (B_blk, N, c)  output tokens
    xpad_ref : (2*off + N, r) f32 scratch, reused per image.  Its pad rows are
               only read at masked tap positions and masking is a select, so
               the scratch never needs zero-filling.
    """
    r = rank
    N = x_ref.shape[1]
    W = patch_w

    a = a_ref[...]
    b_up = b_ref[...]
    w = w_ref[...].astype(jnp.float32)
    bias = bias_ref[...].astype(jnp.float32)
    tap_ok = mask_ref[...] > 0.0                        # (N, 9r) bool, hoisted

    for i in range(batch_block):                        # static unroll
        # lora_A down-projection on the MXU, f32 accumulation.
        x_down = jnp.dot(x_ref[i], a, preferred_element_type=jnp.float32)  # (N, r)
        # Sublane-aligned store (off is a multiple of 8).
        xpad_ref[off:off + N, :] = x_down

        # 3x3 "SAME" conv over the patch grid as a single im2col matmul.
        # Every tap (dh, dw) is a static row-shift of the token stream; the
        # mask kills image-border wrap and cls-row contributions, and the
        # centre tap alone reproduces the 1x1 cls-token conv.
        pieces = []
        for dh in (-1, 0, 1):
            for dw in (-1, 0, 1):
                s = off + dh * W + dw                   # static python int
                pieces.append(xpad_ref[s:s + N, :])
        im2col = jnp.where(tap_ok, jnp.concatenate(pieces, axis=1), 0.0)
        conv = jnp.dot(im2col, w, preferred_element_type=jnp.float32) + bias

        # QuickGELU in f32 + lora_B up-projection (scaling folded into b_ref).
        act = conv * jax.nn.sigmoid(1.702 * conv)
        out = jnp.dot(act.astype(b_up.dtype), b_up,
                      preferred_element_type=jnp.float32)
        o_ref[i] = out.astype(o_ref.dtype)              # aligned full-tile store


# --------------------------------------------------------------------------- #
# Tile-size / mask helpers
# --------------------------------------------------------------------------- #
def _choose_row_tile(m_rows, c, itemsize):
    """Row tile for the linear path from the double-buffered VMEM budget."""
    cap = max((_DBUF_BUDGET // (4 * c * itemsize)) // 8 * 8, 8)
    tm = min(1024, cap)
    if tm >= m_rows:
        # A single-step grid idles one of v7x's two TensorCores; split if worth it.
        tm = m_rows if m_rows <= 16 else _round_up(pl.cdiv(m_rows, 2), 8)
    return int(tm)


def _choose_batch_block(b, n_tok, c, itemsize):
    """Images per grid step for the conv2d path."""
    per_img = 4 * n_tok * c * itemsize                  # double-buffered in + out
    bb = max(min(_DBUF_BUDGET // per_img, 16 if itemsize <= 2 else 8, b), 1)
    if bb >= b and b > 1:
        bb = pl.cdiv(b, 2)                              # >= 2 grid steps (v7x: 2 TCs)
    return int(max(bb, 1))


def _vmem_limit(block_bytes_dbuf):
    """Scoped VMEM limit: footprint + headroom, capped below v7x's 64 MiB."""
    return int(min(max(block_bytes_dbuf + (8 << 20), 16 << 20), 48 << 20))


def _tap_mask(n_tok, patch_h, patch_w, rank, has_cls):
    """(N, 9r) f32 validity mask for the nine 3x3 taps; cls row = centre only."""
    tok = jnp.arange(n_tok, dtype=jnp.int32)
    if has_cls:
        pidx, is_patch = tok - 1, tok >= 1
    else:
        pidx, is_patch = tok, jnp.ones((n_tok,), jnp.bool_)
    h, w = pidx // patch_w, pidx % patch_w
    cols = []
    for dh in (-1, 0, 1):
        for dw in (-1, 0, 1):
            if dh == 0 and dw == 0:
                m = jnp.ones((n_tok,), jnp.bool_)
            else:
                m = (is_patch & (h + dh >= 0) & (h + dh < patch_h)
                     & (w + dw >= 0) & (w + dw < patch_w))
            cols.append(jnp.broadcast_to(m[:, None], (n_tok, rank)))
    return jnp.concatenate(cols, axis=1).astype(jnp.float32)


# --------------------------------------------------------------------------- #
# Wrapper
# --------------------------------------------------------------------------- #
def expert_forward(inputs, patch_h, patch_w, *, lora_A_w, lora_B_w,
                   conv_w=None, conv_b=None, lora_rank=8, scaling=1.0,
                   lora_type="conv2d", compute_dtype=None):
    """inputs: (b, N, c).  PyTorch weight conventions:
       lora_A_w: (r, c) = nn.Linear(c, r).weight, lora_B_w: (c, r),
       conv_w: (r, r, 3, 3) OIHW, conv_b: (r,).
       compute_dtype: optional MXU I/O dtype (e.g. jnp.bfloat16).  Both paths
       are HBM-bandwidth-bound so bf16 I/O ~halves wall time; accumulation is
       always f32 and the output keeps inputs.dtype."""
    b, N, c = inputs.shape
    r = lora_rank
    out_dt = inputs.dtype
    cdt = jnp.dtype(compute_dtype) if compute_dtype is not None else jnp.dtype(out_dt)
    itemsize = cdt.itemsize

    x = inputs.astype(cdt)
    a_t = lora_A_w.T.astype(cdt)                                     # (c, r)
    b_t = (lora_B_w.astype(jnp.float32) * scaling).T.astype(cdt)     # (r, c)

    if lora_type == "linear":
        M = b * N
        x2d = x.reshape(M, c)
        tm = _choose_row_tile(M, c, itemsize)
        cost = pl.CostEstimate(
            flops=4 * M * c * r, transcendentals=0,
            bytes_accessed=2 * M * c * itemsize + 2 * c * r * itemsize)
        out = pl.pallas_call(
            _lora_linear_kernel,
            out_shape=jax.ShapeDtypeStruct((M, c), out_dt),
            grid=(pl.cdiv(M, tm),),
            in_specs=[pl.BlockSpec((tm, c), lambda i: (i, 0)),
                      pl.BlockSpec((c, r), lambda i: (0, 0)),
                      pl.BlockSpec((r, c), lambda i: (0, 0))],
            out_specs=pl.BlockSpec((tm, c), lambda i: (i, 0)),
            compiler_params=pltpu.CompilerParams(
                dimension_semantics=("parallel",),
                vmem_limit_bytes=_vmem_limit(4 * tm * c * itemsize)),
            cost_estimate=cost,
        )(x2d, a_t, b_t)
        # NOTE: if M % tm != 0 the last block reads rows past M; rows are
        # independent and OOB output rows are masked on writeback.
        return out.reshape(b, N, c)

    # ------------------------------ conv2d path ----------------------------- #
    has_cls = (N % 2 == 1)
    assert N - (1 if has_cls else 0) == patch_h * patch_w, \
        "token count must match the patch grid"

    # 3x3 conv weights as one im2col matrix: rows ordered (kh, kw, in_ch).
    w_im2col = jnp.transpose(conv_w, (2, 3, 1, 0)).reshape(9 * r, r)
    w_im2col = w_im2col.astype(jnp.float32)
    bias = conv_b.reshape(1, r).astype(jnp.float32)
    mask = _tap_mask(N, patch_h, patch_w, r, has_cls)                 # (N, 9r)

    B_blk = _choose_batch_block(b, N, c, itemsize)
    off = _round_up(patch_w + 1, 8)            # sublane-aligned pad offset
    cost = pl.CostEstimate(
        flops=4 * b * N * c * r + 2 * b * N * 9 * r * r,
        transcendentals=b * N * r,
        bytes_accessed=2 * b * N * c * itemsize)

    kernel = functools.partial(_expert_conv2d_kernel, patch_w=patch_w,
                               rank=r, off=off, batch_block=B_blk)
    return pl.pallas_call(
        kernel,
        out_shape=jax.ShapeDtypeStruct((b, N, c), out_dt),
        grid=(pl.cdiv(b, B_blk),),
        in_specs=[
            pl.BlockSpec((B_blk, N, c), lambda i: (i, 0, 0)),
            pl.BlockSpec((c, r), lambda i: (0, 0)),
            pl.BlockSpec((r, c), lambda i: (0, 0)),
            pl.BlockSpec((9 * r, r), lambda i: (0, 0)),
            pl.BlockSpec((1, r), lambda i: (0, 0)),
            pl.BlockSpec((N, 9 * r), lambda i: (0, 0)),
        ],
        out_specs=pl.BlockSpec((B_blk, N, c), lambda i: (i, 0, 0)),
        scratch_shapes=[pltpu.VMEM((2 * off + N, r), jnp.float32)],
        compiler_params=pltpu.CompilerParams(
            dimension_semantics=("parallel",),
            vmem_limit_bytes=_vmem_limit(4 * B_blk * N * c * itemsize)),
        cost_estimate=cost,
    )(x, a_t, b_t, w_im2col, bias, mask)


# --------------------------------------------------------------------------- #
# Pure-JAX reference (independent compute path, for verification)
# --------------------------------------------------------------------------- #
def _quickgelu(x):
    return x * jax.nn.sigmoid(1.702 * x)


def reference_forward(inputs, patch_h, patch_w, *, lora_A_w, lora_B_w,
                      conv_w=None, conv_b=None, lora_rank=8, scaling=1.0,
                      lora_type="conv2d"):
    b, N, c = inputs.shape
    r = lora_rank
    if lora_type == "linear":
        return (inputs @ lora_A_w.T) @ lora_B_w.T * scaling

    x_down = inputs @ lora_A_w.T
    w_hwio = jnp.transpose(conv_w, (2, 3, 1, 0))

    def conv(img):
        return jax.lax.conv_general_dilated(
            img, w_hwio, (1, 1), "SAME",
            dimension_numbers=("NHWC", "HWIO", "NHWC")) + conv_b

    if N % 2 == 1:
        cls = conv(x_down[:, :1, :].reshape(b, 1, 1, r)).reshape(b, 1, r)
        patch = x_down[:, 1:, :]
    else:
        cls, patch = None, x_down
    pc = conv(patch.reshape(b, patch_h, patch_w, r)).reshape(b, -1, r)
    xd = jnp.concatenate([cls, pc], axis=1) if cls is not None else pc
    return _quickgelu(xd) @ lora_B_w.T * scaling


# --------------------------------------------------------------------------- #
if __name__ == "__main__":
    # Full-precision matmuls in the XLA reference so the f32 comparison is tight.
    jax.config.update("jax_default_matmul_precision", "highest")

    key = jax.random.PRNGKey(0)
    kA, kB, kW, kb, kx, kx2 = jax.random.split(key, 6)

    c, r, scaling = 32, 8, 0.5
    lora_A_w = 0.1 * jax.random.normal(kA, (r, c), jnp.float32)        # Linear(c->r)
    lora_B_w = 0.1 * jax.random.normal(kB, (c, r), jnp.float32)        # Linear(r->c)
    conv_w = 0.1 * jax.random.normal(kW, (r, r, 3, 3), jnp.float32)    # Conv2d OIHW
    conv_b = 0.1 * jax.random.normal(kb, (r,), jnp.float32)

    common = dict(lora_A_w=lora_A_w, lora_B_w=lora_B_w, conv_w=conv_w,
                  conv_b=conv_b, lora_rank=r, scaling=scaling)

    # 1) conv2d path, odd N (cls token), f32.
    b, ph, pw = 4, 8, 8
    N = ph * pw + 1
    x = jax.random.normal(kx, (b, N, c), jnp.float32)
    out = jax.block_until_ready(
        expert_forward(x, ph, pw, lora_type="conv2d", **common))
    ref = reference_forward(x, ph, pw, lora_type="conv2d", **common)
    assert out.shape == (b, N, c)
    assert jnp.allclose(out, ref, rtol=1e-3, atol=1e-4), "conv2d (cls) mismatch"

    # 2) conv2d path, even N (no cls token), f32.
    b2, ph2, pw2 = 2, 4, 4
    N2 = ph2 * pw2
    x2 = jax.random.normal(kx2, (b2, N2, c), jnp.float32)
    out2 = jax.block_until_ready(
        expert_forward(x2, ph2, pw2, lora_type="conv2d", **common))
    ref2 = reference_forward(x2, ph2, pw2, lora_type="conv2d", **common)
    assert jnp.allclose(out2, ref2, rtol=1e-3, atol=1e-4), "conv2d (even) mismatch"

    # 3) linear path, f32.
    out_lin = jax.block_until_ready(
        expert_forward(x, ph, pw, lora_type="linear", **common))
    ref_lin = reference_forward(x, ph, pw, lora_type="linear", **common)
    assert jnp.allclose(out_lin, ref_lin, rtol=1e-3, atol=1e-4), "linear mismatch"

    # 4) conv2d path with bf16 MXU I/O (f32 accumulation) — loose tolerance.
    out_bf = jax.block_until_ready(
        expert_forward(x, ph, pw, lora_type="conv2d",
                       compute_dtype=jnp.bfloat16, **common))
    assert jnp.allclose(out_bf.astype(jnp.float32), ref, rtol=1e-1, atol=1e-2), \
        "bf16 conv2d path mismatch"

    print("KERNEL_OK")
</pallas_src>

<mosaic_0001>
module attributes {stable_mosaic.version = 11 : i64} {
  func.func @_expert_conv2d_kernel(%arg0: i32, %arg1: memref<2x65x32xf32, #tpu.memory_space<vmem>>, %arg2: memref<32x8xf32, #tpu.memory_space<vmem>>, %arg3: memref<8x32xf32, #tpu.memory_space<vmem>>, %arg4: memref<72x8xf32, #tpu.memory_space<vmem>>, %arg5: memref<1x8xf32, #tpu.memory_space<vmem>>, %arg6: memref<65x72xf32, #tpu.memory_space<vmem>>, %arg7: memref<2x65x32xf32, #tpu.memory_space<vmem>>, %arg8: memref<97x8xf32, #tpu.memory_space<vmem>>) attributes {dimension_semantics = [#tpu.dimension_semantics<parallel>], iteration_bounds = array<i64: 2>, scalar_prefetch = 0 : i64, scratch_operands = 1 : i64, tpu.core_type = #tpu.core_type<tc>, window_params = [{transform_indices = @transform_0, window_bounds = array<i64: 2, 65, 32>}, {pipeline_mode = #tpu.pipeline_mode<synchronous>, transform_indices = @transform_1, window_bounds = array<i64: 32, 8>}, {pipeline_mode = #tpu.pipeline_mode<synchronous>, transform_indices = @transform_2, window_bounds = array<i64: 8, 32>}, {pipeline_mode = #tpu.pipeline_mode<synchronous>, transform_indices = @transform_3, window_bounds = array<i64: 72, 8>}, {pipeline_mode = #tpu.pipeline_mode<synchronous>, transform_indices = @transform_4, window_bounds = array<i64: 1, 8>}, {pipeline_mode = #tpu.pipeline_mode<synchronous>, transform_indices = @transform_5, window_bounds = array<i64: 65, 72>}, {transform_indices = @transform_6, window_bounds = array<i64: 2, 65, 32>}]} {
    %c0 = arith.constant 0 : index
    %c0_0 = arith.constant 0 : index
    %0 = vector.load %arg2[%c0, %c0_0] : memref<32x8xf32, #tpu.memory_space<vmem>>, vector<32x8xf32>
    %c0_1 = arith.constant 0 : index
    %c0_2 = arith.constant 0 : index
    %1 = vector.load %arg3[%c0_1, %c0_2] : memref<8x32xf32, #tpu.memory_space<vmem>>, vector<8x32xf32>
    %c0_3 = arith.constant 0 : index
    %c0_4 = arith.constant 0 : index
    %2 = vector.load %arg4[%c0_3, %c0_4] : memref<72x8xf32, #tpu.memory_space<vmem>>, vector<72x8xf32>
    %c0_5 = arith.constant 0 : index
    %c0_6 = arith.constant 0 : index
    %3 = vector.load %arg5[%c0_5, %c0_6] : memref<1x8xf32, #tpu.memory_space<vmem>>, vector<1x8xf32>
    %c0_7 = arith.constant 0 : index
    %c0_8 = arith.constant 0 : index
    %4 = vector.load %arg6[%c0_7, %c0_8] : memref<65x72xf32, #tpu.memory_space<vmem>>, vector<65x72xf32>
    %cst = arith.constant 0.000000e+00 : f32
    %5 = vector.broadcast %cst : f32 to vector<65x72xf32>
    %6 = arith.cmpf ogt, %4, %5 : vector<65x72xf32>
    %c0_9 = arith.constant 0 : index
    %c0_10 = arith.constant 0 : index
    %c0_11 = arith.constant 0 : index
    %7 = vector.load %arg1[%c0_9, %c0_10, %c0_11] : memref<2x65x32xf32, #tpu.memory_space<vmem>>, vector<1x65x32xf32>
    %8 = vector.shape_cast %7 : vector<1x65x32xf32> to vector<65x32xf32>
    %cst_12 = arith.constant dense<0.000000e+00> : vector<65x8xf32>
    %9 = tpu.matmul %8, %0, %cst_12 {dimension_numbers = #tpu.dot_dimension_numbers<[1], [0], [0], [1], [0, 0, 1, 1], [], []>, precision = #tpu.contract_precision<fp32>} : vector<65x32xf32>, vector<32x8xf32>, vector<65x8xf32> -> vector<65x8xf32>
    %c16 = arith.constant 16 : index
    %c0_13 = arith.constant 0 : index
    %10 = vector.load %arg8[%c16, %c0_13] : memref<97x8xf32, #tpu.memory_space<vmem>>, vector<65x8xf32>
    tpu.vector_store %arg8[%c16, %c0_13], %9 {strides = array<i32>} : memref<97x8xf32, #tpu.memory_space<vmem>>, vector<65x8xf32>,
    %c7 = arith.constant 7 : index
    %c0_14 = arith.constant 0 : index
    %11 = vector.load %arg8[%c7, %c0_14] : memref<97x8xf32, #tpu.memory_space<vmem>>, vector<65x8xf32>
    %c8 = arith.constant 8 : index
    %c0_15 = arith.constant 0 : index
    %12 = vector.load %arg8[%c8, %c0_15] : memref<97x8xf32, #tpu.memory_space<vmem>>, vector<65x8xf32>
    %c9 = arith.constant 9 : index
    %c0_16 = arith.constant 0 : index
    %13 = vector.load %arg8[%c9, %c0_16] : memref<97x8xf32, #tpu.memory_space<vmem>>, vector<65x8xf32>
    %c15 = arith.constant 15 : index
    %c0_17 = arith.constant 0 : index
    %14 = vector.load %arg8[%c15, %c0_17] : memref<97x8xf32, #tpu.memory_space<vmem>>, vector<65x8xf32>
    %c16_18 = arith.constant 16 : index
    %c0_19 = arith.constant 0 : index
    %15 = vector.load %arg8[%c16_18, %c0_19] : memref<97x8xf32, #tpu.memory_space<vmem>>, vector<65x8xf32>
    %c17 = arith.constant 17 : index
    %c0_20 = arith.constant 0 : index
    %16 = vector.load %arg8[%c17, %c0_20] : memref<97x8xf32, #tpu.memory_space<vmem>>, vector<65x8xf32>
    %c23 = arith.constant 23 : index
    %c0_21 = arith.constant 0 : index
    %17 = vector.load %arg8[%c23, %c0_21] : memref<97x8xf32, #tpu.memory_space<vmem>>, vector<65x8xf32>
    %c24 = arith.constant 24 : index
    %c0_22 = arith.constant 0 : index
    %18 = vector.load %arg8[%c24, %c0_22] : memref<97x8xf32, #tpu.memory_space<vmem>>, vector<65x8xf32>
    %c25 = arith.constant 25 : index
    %c0_23 = arith.constant 0 : index
    %19 = vector.load %arg8[%c25, %c0_23] : memref<97x8xf32, #tpu.memory_space<vmem>>, vector<65x8xf32>
    %20 = tpu.concatenate %11, %12, %13, %14, %15, %16, %17, %18, %19 in 1 : vector<65x8xf32>, vector<65x8xf32>, vector<65x8xf32>, vector<65x8xf32>, vector<65x8xf32>, vector<65x8xf32>, vector<65x8xf32>, vector<65x8xf32>, vector<65x8xf32> -> vector<65x72xf32>
    %cst_24 = arith.constant 0.000000e+00 : f32
    %21 = vector.broadcast %cst_24 : f32 to vector<65x72xf32>
    %22 = arith.select %6, %20, %21 : vector<65x72xi1>, vector<65x72xf32>
    %cst_25 = arith.constant dense<0.000000e+00> : vector<65x8xf32>
    %23 = tpu.matmul %22, %2, %cst_25 {dimension_numbers = #tpu.dot_dimension_numbers<[1], [0], [0], [1], [0, 0, 1, 1], [], []>, precision = #tpu.contract_precision<fp32>} : vector<65x72xf32>, vector<72x8xf32>, vector<65x8xf32> -> vector<65x8xf32>
    %24 = vector.broadcast %3 : vector<1x8xf32> to vector<65x8xf32>
    %25 = arith.addf %23, %24 : vector<65x8xf32>
    %cst_26 = arith.constant 1.702000e+00 : f32
    %26 = vector.broadcast %cst_26 : f32 to vector<65x8xf32>
    %27 = arith.mulf %26, %25 : vector<65x8xf32>
    %28 = arith.negf %27 : vector<65x8xf32>
    %29 = math.exp %28 : vector<65x8xf32>
    %cst_27 = arith.constant 1.000000e+00 : f32
    %30 = vector.broadcast %cst_27 : f32 to vector<65x8xf32>
    %31 = arith.addf %30, %29 : vector<65x8xf32>
    %32 = arith.divf %30, %31 : vector<65x8xf32>
    %33 = arith.mulf %25, %32 : vector<65x8xf32>
    %cst_28 = arith.constant dense<0.000000e+00> : vector<65x32xf32>
    %34 = tpu.matmul %33, %1, %cst_28 {dimension_numbers = #tpu.dot_dimension_numbers<[1], [0], [0], [1], [0, 0, 1, 1], [], []>, precision = #tpu.contract_precision<fp32>} : vector<65x8xf32>, vector<8x32xf32>, vector<65x32xf32> -> vector<65x32xf32>
    %c0_29 = arith.constant 0 : index
    %c0_30 = arith.constant 0 : index
    %c0_31 = arith.constant 0 : index
    %35 = vector.load %arg7[%c0_29, %c0_30, %c0_31] : memref<2x65x32xf32, #tpu.memory_space<vmem>>, vector<1x65x32xf32>
    %36 = vector.shape_cast %35 : vector<1x65x32xf32> to vector<65x32xf32>
    %37 = vector.shape_cast %34 : vector<65x32xf32> to vector<1x65x32xf32>
    tpu.vector_store %arg7[%c0_29, %c0_30, %c0_31], %37 {strides = array<i32>} : memref<2x65x32xf32, #tpu.memory_space<vmem>>, vector<1x65x32xf32>,
    %c1 = arith.constant 1 : index
    %c0_32 = arith.constant 0 : index
    %c0_33 = arith.constant 0 : index
    %38 = vector.load %arg1[%c1, %c0_32, %c0_33] : memref<2x65x32xf32, #tpu.memory_space<vmem>>, vector<1x65x32xf32>
    %39 = vector.shape_cast %38 : vector<1x65x32xf32> to vector<65x32xf32>
    %cst_34 = arith.constant dense<0.000000e+00> : vector<65x8xf32>
    %40 = tpu.matmul %39, %0, %cst_34 {dimension_numbers = #tpu.dot_dimension_numbers<[1], [0], [0], [1], [0, 0, 1, 1], [], []>, precision = #tpu.contract_precision<fp32>} : vector<65x32xf32>, vector<32x8xf32>, vector<65x8xf32> -> vector<65x8xf32>
    %c16_35 = arith.constant 16 : index
    %c0_36 = arith.constant 0 : index
    %41 = vector.load %arg8[%c16_35, %c0_36] : memref<97x8xf32, #tpu.memory_space<vmem>>, vector<65x8xf32>
    tpu.vector_store %arg8[%c16_35, %c0_36], %40 {strides = array<i32>} : memref<97x8xf32, #tpu.memory_space<vmem>>, vector<65x8xf32>,
    %c7_37 = arith.constant 7 : index
    %c0_38 = arith.constant 0 : index
    %42 = vector.load %arg8[%c7_37, %c0_38] : memref<97x8xf32, #tpu.memory_space<vmem>>, vector<65x8xf32>
    %c8_39 = arith.constant 8 : index
    %c0_40 = arith.constant 0 : index
    %43 = vector.load %arg8[%c8_39, %c0_40] : memref<97x8xf32, #tpu.memory_space<vmem>>, vector<65x8xf32>
    %c9_41 = arith.constant 9 : index
    %c0_42 = arith.constant 0 : index
    %44 = vector.load %arg8[%c9_41, %c0_42] : memref<97x8xf32, #tpu.memory_space<vmem>>, vector<65x8xf32>
    %c15_43 = arith.constant 15 : index
    %c0_44 = arith.constant 0 : index
    %45 = vector.load %arg8[%c15_43, %c0_44] : memref<97x8xf32, #tpu.memory_space<vmem>>, vector<65x8xf32>
    %c16_45 = arith.constant 16 : index
    %c0_46 = arith.constant 0 : index
    %46 = vector.load %arg8[%c16_45, %c0_46] : memref<97x8xf32, #tpu.memory_space<vmem>>, vector<65x8xf32>
    %c17_47 = arith.constant 17 : index
    %c0_48 = arith.constant 0 : index
    %47 = vector.load %arg8[%c17_47, %c0_48] : memref<97x8xf32, #tpu.memory_space<vmem>>, vector<65x8xf32>
    %c23_49 = arith.constant 23 : index
    %c0_50 = arith.constant 0 : index
    %48 = vector.load %arg8[%c23_49, %c0_50] : memref<97x8xf32, #tpu.memory_space<vmem>>, vector<65x8xf32>
    %c24_51 = arith.constant 24 : index
    %c0_52 = arith.constant 0 : index
    %49 = vector.load %arg8[%c24_51, %c0_52] : memref<97x8xf32, #tpu.memory_space<vmem>>, vector<65x8xf32>
    %c25_53 = arith.constant 25 : index
    %c0_54 = arith.constant 0 : index
    %50 = vector.load %arg8[%c25_53, %c0_54] : memref<97x8xf32, #tpu.memory_space<vmem>>, vector<65x8xf32>
    %51 = tpu.concatenate %42, %43, %44, %45, %46, %47, %48, %49, %50 in 1 : vector<65x8xf32>, vector<65x8xf32>, vector<65x8xf32>, vector<65x8xf32>, vector<65x8xf32>, vector<65x8xf32>, vector<65x8xf32>, vector<65x8xf32>, vector<65x8xf32> -> vector<65x72xf32>
    %cst_55 = arith.constant 0.000000e+00 : f32
    %52 = vector.broadcast %cst_55 : f32 to vector<65x72xf32>
    %53 = arith.select %6, %51, %52 : vector<65x72xi1>, vector<65x72xf32>
    %cst_56 = arith.constant dense<0.000000e+00> : vector<65x8xf32>
    %54 = tpu.matmul %53, %2, %cst_56 {dimension_numbers = #tpu.dot_dimension_numbers<[1], [0], [0], [1], [0, 0, 1, 1], [], []>, precision = #tpu.contract_precision<fp32>} : vector<65x72xf32>, vector<72x8xf32>, vector<65x8xf32> -> vector<65x8xf32>
    %55 = vector.broadcast %3 : vector<1x8xf32> to vector<65x8xf32>
    %56 = arith.addf %54, %55 : vector<65x8xf32>
    %cst_57 = arith.constant 1.702000e+00 : f32
    %57 = vector.broadcast %cst_57 : f32 to vector<65x8xf32>
    %58 = arith.mulf %57, %56 : vector<65x8xf32>
    %59 = arith.negf %58 : vector<65x8xf32>
    %60 = math.exp %59 : vector<65x8xf32>
    %cst_58 = arith.constant 1.000000e+00 : f32
    %61 = vector.broadcast %cst_58 : f32 to vector<65x8xf32>
    %62 = arith.addf %61, %60 : vector<65x8xf32>
    %63 = arith.divf %61, %62 : vector<65x8xf32>
    %64 = arith.mulf %56, %63 : vector<65x8xf32>
    %cst_59 = arith.constant dense<0.000000e+00> : vector<65x32xf32>
    %65 = tpu.matmul %64, %1, %cst_59 {dimension_numbers = #tpu.dot_dimension_numbers<[1], [0], [0], [1], [0, 0, 1, 1], [], []>, precision = #tpu.contract_precision<fp32>} : vector<65x8xf32>, vector<8x32xf32>, vector<65x32xf32> -> vector<65x32xf32>
    %c1_60 = arith.constant 1 : index
    %c0_61 = arith.constant 0 : index
    %c0_62 = arith.constant 0 : index
    %66 = vector.load %arg7[%c1_60, %c0_61, %c0_62] : memref<2x65x32xf32, #tpu.memory_space<vmem>>, vector<1x65x32xf32>
    %67 = vector.shape_cast %66 : vector<1x65x32xf32> to vector<65x32xf32>
    %68 = vector.shape_cast %65 : vector<65x32xf32> to vector<1x65x32xf32>
    tpu.vector_store %arg7[%c1_60, %c0_61, %c0_62], %68 {strides = array<i32>} : memref<2x65x32xf32, #tpu.memory_space<vmem>>, vector<1x65x32xf32>,
    return
  }
  func.func @transform_0(%arg0: i32) -> (i32, i32, i32) {
    %c0_i32 = arith.constant 0 : i32
    %c0_i32_0 = arith.constant 0 : i32
    %c0_i32_1 = arith.constant 0 : i32
    return %arg0, %c0_i32, %c0_i32_0 : i32, i32, i32
  }
  func.func @transform_1(%arg0: i32) -> (i32, i32) {
    %c0_i32 = arith.constant 0 : i32
    %c0_i32_0 = arith.constant 0 : i32
    %c0_i32_1 = arith.constant 0 : i32
    return %c0_i32, %c0_i32_0 : i32, i32
  }
  func.func @transform_2(%arg0: i32) -> (i32, i32) {
    %c0_i32 = arith.constant 0 : i32
    %c0_i32_0 = arith.constant 0 : i32
    %c0_i32_1 = arith.constant 0 : i32
    return %c0_i32, %c0_i32_0 : i32, i32
  }
  func.func @transform_3(%arg0: i32) -> (i32, i32) {
    %c0_i32 = arith.constant 0 : i32
    %c0_i32_0 = arith.constant 0 : i32
    %c0_i32_1 = arith.constant 0 : i32
    return %c0_i32, %c0_i32_0 : i32, i32
  }
  func.func @transform_4(%arg0: i32) -> (i32, i32) {
    %c0_i32 = arith.constant 0 : i32
    %c0_i32_0 = arith.constant 0 : i32
    %c0_i32_1 = arith.constant 0 : i32
    return %c0_i32, %c0_i32_0 : i32, i32
  }
  func.func @transform_5(%arg0: i32) -> (i32, i32) {
    %c0_i32 = arith.constant 0 : i32
    %c0_i32_0 = arith.constant 0 : i32
    %c0_i32_1 = arith.constant 0 : i32
    return %c0_i32, %c0_i32_0 : i32, i32
  }
  func.func @transform_6(%arg0: i32) -> (i32, i32, i32) {
    %c0_i32 = arith.constant 0 : i32
    %c0_i32_0 = arith.constant 0 : i32
    %c0_i32_1 = arith.constant 0 : i32
    return %arg0, %c0_i32, %c0_i32_0 : i32, i32, i32
  }
}

</mosaic_0001>

<bundles_post_ra>
// kernel: tpu_custom_call.1
= control target key start
LH: loop header
LB: loop body
LE: loop exit
PB: predicated region body
PF: predicated region fallthrough
CT: control target
= control target key end

     0   :  { %s9280_s21 = smov 0   ;;  %s11960_s0 = inlined_call_operand.vmem [shape: f32[4,65,32], index: 0, kind: input, shape index: {}]   ;;  %s11961_s1 = inlined_call_operand.vmem [shape: f32[32,8], index: 1, kind: input, shape index: {}]   ;;  %s11962_s2 = inlined_call_operand.vmem [shape: f32[8,32], index: 2, kind: input, shape index: {}]   ;;  %s11963_s3 = inlined_call_operand.vmem [shape: f32[72,8], index: 3, kind: input, shape index: {}]   ;;  %s11964_s4 = inlined_call_operand.vmem [shape: f32[1,8], index: 4, kind: input, shape index: {}]   ;;  %s11965_s5 = inlined_call_operand.vmem [shape: f32[65,72], index: 5, kind: input, shape index: {}]   ;;  %s11966_s6 = inlined_call_operand.vmem [shape: f32[4,65,32], index: 6, kind: output, shape index: {}]  }
   0x1 LB: > { %s6502_s22 = sadd.s32 4294967295, %s9232_s21   ;;  %p6506_p0 = scmp.ge.s32.totalorder %s9232_s21, 1  ;;  %s9232_s21 = sphi %s9280_s21, %s16_s21  }
   0x2   : > { %p214_p1 = scmp.lt.s32.totalorder %s9232_s21, 3 }
   0x4   : > { %p215_p2 = pnand %p6506_p0, %p214_p1 }
   0x6   : > { %218 = sbr.rel (%p215_p2) target bundleno = 2362 (0x93a), region = 44 }
   0xd   : > { %v260_v0 = vld [vmem:[%s11961_s1] sm:$0xff]  ;;  %v261_v1 = vld [vmem:[%s11961_s1 + $0x8] sm:$0xff]  ;;  %v262_v2 = vld [vmem:[%s11961_s1 + $0x10] sm:$0xff]  ;;  %v11971_v3 = vmov 0.0|0.0   ;;  %vm9235_vm0 = vmmov 0   ;;  %v11976_v8 = vmov 0.0  }
   0xe   : > { %8350 = vmatprep.subr.bf16.mxu0 %v11971_v3  ;;  %v331_v4 = vand.u32 4294901760, %v260_v0  ;;  %v334_v5 = vand.u32 4294901760, %v261_v1  ;;  %v263_v6 = vld [vmem:[%s11961_s1 + $0x18] sm:$0xff]  ;;  %v337_v7 = vand.u32 4294901760, %v262_v2  ;;  %7050 = vmatprep.mubr.msk.f32.mxu0 %vm9235_vm0, %v11976_v8  ;;  %s6507_s7 = sshll.u32 %s6502_s22, 1  ;;  %vm302_vm1 = vcmask 261120  }
   0xf   : > { %v340_v9 = vand.u32 4294901760, %v263_v6  ;;  %p247_p3 = scmp.lt.s32.totalorder %s6507_s7, 3  ;;  %8566 = vmatprep.subr.bf16.mxu1 %v11971_v3  ;;  %7273 = vmatprep.mubr.msk.f32.mxu1 %vm9235_vm0, %v11976_v8  ;;  %s9237_s12 = smov 40   ;;  %vm1159_vm2 = vcmask 64512   ;;  %vm1168_vm3 = vcmask 57344   ;;  %vm1471_vm4 = vcmask 130048  }
  0x10   : > { %v9306_v10 = vpack.c.bf16 %v334_v5, %v331_v4  ;;  %v9308_v11 = vsub.f32 %v260_v0, %v331_v4  ;;  %v9310_v12 = vsub.f32 %v261_v1, %v334_v5  ;;  %v9314_v13 = vsub.f32 %v262_v2, %v337_v7  ;;  %s9238_s13 = smov 64   ;;  %s9239_s14 = smov 56  }
  0x11   : > { %s12046_s7 = smov (!%p247_p3, %s6507_s7), 3  ;;  %v9317_v14 = vpack.c.bf16 %v340_v9, %v337_v7  ;;  %v9321_v17 = vsub.f32 %v263_v6, %v340_v9  ;;  %s9240_s15 = smov 48   ;;  %vm1481_vm5 = vcmask 195584   ;;  %vm1500_vm6 = vcmask 326656  }
  0x12   : > { %8352 = vmatpush3.bf16.msra.mxu0 %v9306_v10  ;;  %v492_v15 = vand.u32 4294901760, %v9308_v11  ;;  %v499_v16 = vand.u32 4294901760, %v9310_v12  ;;  %s9133_s8 = smul.u32 72, %s12046_s7  ;;  %v506_v23 = vand.u32 4294901760, %v9314_v13  ;;  %s9241_s16 = smov 8   ;;  %vm1510_vm7 = vcmask 392192  }
  0x13   : > { %8353 = vmatprep.subr.bf16.mxu0 %v11971_v3  ;;  %v513_v24 = vand.u32 4294901760, %v9321_v17  ;;  %s9242_s17 = smov 16   ;;  %s9243_s18 = smov 24   ;;  %vm1520_vm8 = vcmask 457728   ;;  %vm1530_vm9 = vcmask 523264   ;;  %vm1555_vm11 = vcmask 588800  }
  0x14   : > { %v9325_v18 = vpack.c.bf16 %v499_v16, %v492_v15  ;;  %s9332_s11 = scalar_lea.vmem %s11960_s0, %s9133_s8  ;;  %v493_v20 = vsub.f32 %v9308_v11, %v492_v15  ;;  %v500_v26 = vsub.f32 %v9310_v12, %v499_v16  ;;  %v507_v43 = vsub.f32 %v9314_v13, %v506_v23  ;;  %s9244_s24 = smov 32  }
  0x15   : > { %v293_v19 = vld [vmem:[%s9332_s11] sm:$0xff]  ;;  %v294_v21 = vld [vmem:[%s9332_s11 + $0x8] sm:$0xff]  ;;  %v295_v22 = vld [vmem:[%s9332_s11 + $0x10] sm:$0xff]  ;;  %v514_v44 = vsub.f32 %v9321_v17, %v513_v24  ;;  %v9398_v0 = vpack.c.bf16 %v513_v24, %v506_v23 }
  0x16   : > { %8355 = vmatpush3.bf16.msra.mxu0 %v9317_v14  ;;  %v304_v25 = vsel %vm302_vm1, %v293_v19, 0  ;;  %v307_v27 = vsel %vm302_vm1, %v294_v21, 0  ;;  %v310_v28 = vsel %vm302_vm1, %v295_v22, 0  ;;  %v296_v29 = vld [vmem:[%s9332_s11 + $0x18] sm:$0xff]  ;;  %v297_v30 = vld [vmem:[%s9332_s11 + $0x20] sm:$0xff]  ;;  %v298_v40 = vld [vmem:[%s9332_s11 + $0x28] sm:$0xff] }
  0x17   : > { %8356 = vmatprep.subr.bf16.mxu0 %v11971_v3  ;;  %v9348_v31 = vand.u32 4294901760, %v304_v25  ;;  %v9350_v32 = vand.u32 4294901760, %v307_v27  ;;  %v9352_v33 = vand.u32 4294901760, %v310_v28  ;;  %v313_v34 = vsel %vm302_vm1, %v296_v29, 0  ;;  %v299_v57 = vld [vmem:[%s9332_s11 + $0x30] sm:$0xff]  ;;  %v300_v63 = vld [vmem:[%s9332_s11 + $0x38] sm:$0xff] }
  0x18   : > { %v316_v35 = vsel %vm302_vm1, %v297_v30, 0  ;;  %v9365_v39 = vand.u32 4294901760, %v313_v34  ;;  %v494_v41 = vand.u32 4294901760, %v493_v20  ;;  %v501_v42 = vand.u32 4294901760, %v500_v26  ;;  %12000 = vst [vmem:[#allocation3_spill] sm:$0xff] %v9398_v0 }
  0x19   : > { %v9357_v36 = vsub.f32 %v304_v25, %v9348_v31  ;;  %v9360_v37 = vsub.f32 %v307_v27, %v9350_v32  ;;  %v9363_v38 = vsub.f32 %v310_v28, %v9352_v33  ;;  %v9372_v47 = vand.u32 4294901760, %v316_v35  ;;  %v301_v16 = vld [vmem:[%s9332_s11 + $0x40] sm:$0x1] }
  0x1a   : > { %v319_v48 = vsel %vm302_vm1, %v298_v40, 0  ;;  %v9383_v52 = vsub.f32 %v313_v34, %v9365_v39  ;;  %v9385_v53 = vpack.c.bf16 %v501_v42, %v494_v41  ;;  %v508_v54 = vand.u32 4294901760, %v507_v43 }
  0x1b   : > { %v401_v45 = vand.u32 4294901760, %v9357_v36  ;;  %v411_v46 = vand.u32 4294901760, %v9360_v37  ;;  %v421_v51 = vand.u32 4294901760, %v9363_v38  ;;  %v515_v55 = vand.u32 4294901760, %v514_v44 }
  0x1c   : > { %v9389_v58 = vsub.f32 %v316_v35, %v9372_v47  ;;  %v9391_v59 = vand.u32 4294901760, %v319_v48  ;;  %v431_v62 = vand.u32 4294901760, %v9383_v52  ;;  %v322_v2 = vsel %vm302_vm1, %v299_v57, 0 }
  0x1d   : > { %v402_v49 = vsub.f32 %v9357_v36, %v401_v45  ;;  %v412_v50 = vsub.f32 %v9360_v37, %v411_v46  ;;  %v422_v61 = vsub.f32 %v9363_v38, %v421_v51  ;;  %v9403_v1 = vpack.c.bf16 %v515_v55, %v508_v54  ;;  %v9665_v55 = vld [vmem:[%s11963_s3 + $0x8] sm:$0xff] }
  0x1e   : > { %v9408_v4 = vsub.f32 %v319_v48, %v9391_v59  ;;  %v325_v5 = vsel %vm302_vm1, %v300_v63, 0  ;;  %v432_v7 = vsub.f32 %v9383_v52, %v431_v62  ;;  %v441_v9 = vand.u32 4294901760, %v9389_v58  ;;  %v9690_v63 = vld [vmem:[%s11963_s3 + $0x18] sm:$0xff] }
  0x1f   : > { %v403_v56 = vand.u32 4294901760, %v402_v49  ;;  %v413_v60 = vand.u32 4294901760, %v412_v50  ;;  %v423_v6 = vand.u32 4294901760, %v422_v61  ;;  %v9415_v15 = vand.u32 4294901760, %v322_v2 }
  0x20   : > { %v9422_v19 = vand.u32 4294901760, %v325_v5  ;;  %v433_v20 = vand.u32 4294901760, %v432_v7  ;;  %v442_v21 = vsub.f32 %v9389_v58, %v441_v9  ;;  %v451_v22 = vand.u32 4294901760, %v9408_v4 }
  0x21   : > { %7051 = vmatmul.mubr.f32.vlgmr.msra.gmra.mrb[0].mxu0 %v403_v56  ;;  %v9429_v23 = vsub.f32 %v322_v2, %v9415_v15  ;;  %v328_v24 = vsel %vm302_vm1, %v301_v16, 0  ;;  %v9471_v50 = vpack.c.bf16 %v9310_v12, %v9308_v11  ;;  %v9479_v54 = vpack.c.bf16 %v9321_v17, %v9314_v13  ;;  %v1202_v11 = vld [vmem:[#allocation2 + $0x51] sm:$0x1]  ;;  %v1206_v13 = vld [vmem:[#allocation2 + $0x58] sm:$0x1]  ;;  %v9720_v16 = vld [vmem:[%s11963_s3 + $0x28] sm:$0xff] }
  0x22   : > { %8358 = vmatpush3.bf16.msra.mxu0 %v9385_v53  ;;  %7053 = vmatprep.mubr.msk.f32.mxu0 %vm9235_vm0, %v11976_v8  ;;  %v9435_v25 = vsub.f32 %v325_v5, %v9422_v19  ;;  %v443_v26 = vand.u32 4294901760, %v442_v21  ;;  %v452_v27 = vsub.f32 %v9408_v4, %v451_v22  ;;  %v9441_v29 = vand.u32 4294901760, %v328_v24  ;;  %v1207_v12 = vld [vmem:[#allocation2 + $0x51] sm:$0xff] }
  0x23   : > { %8359 = vmatprep.subr.bf16.mxu0 %v11971_v3  ;;  %v461_v28 = vand.u32 4294901760, %v9429_v23  ;;  %1364 = vrot.lane.b32.xlu0 %v1202_v11, %s9237_s12  ;;  %v1204_v17 = vld [vmem:[#allocation2 + $0x57] sm:$0x1]  ;;  %v1587_v57 = vand.u32 4294901760, %v9665_v55 }
  0x24   : > { %v453_v30 = vand.u32 4294901760, %v452_v27  ;;  %v471_v35 = vand.u32 4294901760, %v9435_v25  ;;  %v9450_v40 = vsub.f32 %v328_v24, %v9441_v29  ;;  %1449 = vrot.lane.b32.xlu1 %v1207_v12, %s9238_s13 }
  0x25   : > { %7054 = vmatmul.mubr.f32.gmra.mrb[2].mxu0 %v413_v60  ;;  %v462_v34 = vsub.f32 %v9429_v23, %v461_v28 }
  0x26   : > { %7056 = vmatprep.mubr.msk.f32.mxu0 %vm9235_vm0, %v11976_v8  ;;  %8361 = vmatpush3.bf16.msra.mxu0 %v9403_v1  ;;  %v472_v42 = vsub.f32 %v9435_v25, %v471_v35  ;;  %v481_v43 = vand.u32 4294901760, %v9450_v40 }
  0x27   : > { %8362 = vmatprep.subr.bf16.mxu0 %v11971_v3  ;;  %v463_v41 = vand.u32 4294901760, %v462_v34  ;;  %1422 = vrot.lane.b32.xlu0 %v1206_v13, %s9239_s14 }
  0x28   : > { %v473_v44 = vand.u32 4294901760, %v472_v42  ;;  %v482_v48 = vsub.f32 %v9450_v40, %v481_v43  ;;  %1393 = vrot.lane.b32.xlu1 %v1204_v17, %s9240_s15 }
  0x29   : > { %7057 = vmatmul.mubr.f32.gmra.mrb[4].mxu0 %v423_v6 }
  0x2a   : > { %7059 = vmatprep.mubr.msk.f32.mxu0 %vm9235_vm0, %v11976_v8  ;;  %v483_v49 = vand.u32 4294901760, %v482_v48 }
  0x2d   : > { %7060 = vmatmul.mubr.f32.gmra.mrb[6].mxu0 %v433_v20  ;;  %v1599_v20 = vand.u32 4294901760, %v9720_v16 }
  0x2e   : > { %7062 = vmatprep.mubr.msk.f32.mxu0 %vm9235_vm0, %v11976_v8 }
  0x31   : > { %7063 = vmatmul.mubr.f32.gmra.mrb[8].mxu0 %v443_v26  ;;  %v9748_v26 = vld [vmem:[%s11963_s3 + $0x38] sm:$0xff] }
  0x32   : > { %7065 = vmatprep.mubr.msk.f32.mxu0 %vm9235_vm0, %v11976_v8 }
  0x35   : > { %7066 = vmatmul.mubr.f32.gmra.mrb[10].mxu0 %v453_v30 }
  0x36   : > { %7068 = vmatprep.mubr.msk.f32.mxu0 %vm9235_vm0, %v11976_v8 }
  0x39   : > { %7069 = vmatmul.mubr.f32.gmra.mrb[12].mxu0 %v463_v41 }
  0x3a   : > { %7071 = vmatprep.mubr.msk.f32.mxu0 %vm9235_vm0, %v11976_v8 }
  0x3d   : > { %7072 = vmatmul.mubr.f32.gmra.mrb[14].mxu0 %v473_v44 }
  0x3e   : > { %7074 = vmatprep.mubr.msk.f32.mxu0 %vm9235_vm0, %v11976_v8 }
  0x41   : > { %7075 = vmatmul.mubr.f32.gmra.mrb[16].mxu0 %v483_v49 }
  0x42   : > { %7085 = vmatprep.mubr.msk.f32.mxu0 %vm9235_vm0, %v11976_v8 }
  0x45   : > { %7086 = vmatmul.mubr.f32.vlgmr.msra.gmra.mrb[0].mxu0 %v9348_v31 }
  0x46   : > { %8364 = vmatpush3.bf16.msra.mxu0 %v9471_v50  ;;  %7088 = vmatprep.mubr.msk.f32.mxu0 %vm9235_vm0, %v11976_v8 }
  0x47   : > { %8365 = vmatprep.subr.bf16.mxu0 %v11971_v3 }
  0x49   : > { %7089 = vmatmul.mubr.f32.gmra.mrb[2].mxu0 %v9350_v32 }
  0x4a   : > { %7091 = vmatprep.mubr.msk.f32.mxu0 %vm9235_vm0, %v11976_v8  ;;  %8367 = vmatpush3.bf16.msra.mxu0 %v9479_v54 }
  0x4b   : > { %8368 = vmatprep.subr.bf16.mxu0 %v11971_v3 }
  0x4d   : > { %7092 = vmatmul.mubr.f32.gmra.mrb[4].mxu0 %v9352_v33 }
  0x4e   : > { %7094 = vmatprep.mubr.msk.f32.mxu0 %vm9235_vm0, %v11976_v8 }
  0x51   : > { %7095 = vmatmul.mubr.f32.gmra.mrb[6].mxu0 %v9365_v39 }
  0x52   : > { %7097 = vmatprep.mubr.msk.f32.mxu0 %vm9235_vm0, %v11976_v8 }
  0x55   : > { %7098 = vmatmul.mubr.f32.gmra.mrb[8].mxu0 %v9372_v47 }
  0x56   : > { %7100 = vmatprep.mubr.msk.f32.mxu0 %vm9235_vm0, %v11976_v8 }
  0x59   : > { %7101 = vmatmul.mubr.f32.gmra.mrb[10].mxu0 %v9391_v59 }
  0x5a   : > { %7103 = vmatprep.mubr.msk.f32.mxu0 %vm9235_vm0, %v11976_v8 }
  0x5d   : > { %7104 = vmatmul.mubr.f32.gmra.mrb[12].mxu0 %v9415_v15 }
  0x5e   : > { %7106 = vmatprep.mubr.msk.f32.mxu0 %vm9235_vm0, %v11976_v8 }
  0x61   : > { %7107 = vmatmul.mubr.f32.gmra.mrb[14].mxu0 %v9422_v19 }
  0x62   : > { %7109 = vmatprep.mubr.msk.f32.mxu0 %vm9235_vm0, %v11976_v8 }
  0x65   : > { %7110 = vmatmul.mubr.f32.gmra.mrb[16].mxu0 %v9441_v29 }
  0x66   : > { %7120 = vmatprep.mubr.msk.f32.mxu0 %vm9235_vm0, %v11976_v8 }
  0x69   : > { %7121 = vmatmul.mubr.f32.vlgmr.msra.gmra.mrb[0].mxu0 %v9357_v36 }
  0x6a   : > { %8370 = vmatpush3.bf16.msra.mxu0 %v9306_v10  ;;  %7123 = vmatprep.mubr.msk.f32.mxu0 %vm9235_vm0, %v11976_v8 }
  0x6b   : > { %8371 = vmatprep.subr.bf16.mxu0 %v11971_v3 }
  0x6d   : > { %7124 = vmatmul.mubr.f32.gmra.mrb[2].mxu0 %v9360_v37 }
  0x6e   : > { %7126 = vmatprep.mubr.msk.f32.mxu0 %vm9235_vm0, %v11976_v8  ;;  %8373 = vmatpush3.bf16.msra.mxu0 %v9317_v14 }
  0x6f   : > { %8374 = vmatprep.subr.bf16.mxu0 %v11971_v3 }
  0x71   : > { %7127 = vmatmul.mubr.f32.gmra.mrb[4].mxu0 %v9363_v38 }
  0x72   : > { %7129 = vmatprep.mubr.msk.f32.mxu0 %vm9235_vm0, %v11976_v8 }
  0x75   : > { %7130 = vmatmul.mubr.f32.gmra.mrb[6].mxu0 %v9383_v52  ;;  %v9660_v52 = vld [vmem:[%s11963_s3] sm:$0xff] }
  0x76   : > { %7132 = vmatprep.mubr.msk.f32.mxu0 %vm9235_vm0, %v11976_v8  ;;  %v1584_v56 = vand.u32 4294901760, %v9660_v52 }
  0x78   : > { %v9675_v60 = vpack.c.bf16 %v1587_v57, %v1584_v56 }
  0x79   : > { %7133 = vmatmul.mubr.f32.gmra.mrb[8].mxu0 %v9389_v58 }
  0x7a   : > { %7135 = vmatprep.mubr.msk.f32.mxu0 %vm9235_vm0, %v11976_v8  ;;  %8571 = vmatpush3.bf16.msra.mxu1 %v9675_v60 }
  0x7b   : > { %8567 = vmatprep.subr.bf16.mxu1 %v11971_v3 }
  0x7d   : > { %7136 = vmatmul.mubr.f32.gmra.mrb[10].mxu0 %v9408_v4  ;;  %v1593_v4 = vand.u32 4294901760, %v9690_v63 }
  0x7e   : > { %7138 = vmatprep.mubr.msk.f32.mxu0 %vm9235_vm0, %v11976_v8 }
  0x81   : > { %7139 = vmatmul.mubr.f32.gmra.mrb[12].mxu0 %v9429_v23 }
  0x82   : > { %7141 = vmatprep.mubr.msk.f32.mxu0 %vm9235_vm0, %v11976_v8 }
  0x85   : > { %7142 = vmatmul.mubr.f32.gmra.mrb[14].mxu0 %v9435_v25  ;;  %v9743_v25 = vld [vmem:[%s11963_s3 + $0x30] sm:$0xff] }
  0x86   : > { %7144 = vmatprep.mubr.msk.f32.mxu0 %vm9235_vm0, %v11976_v8  ;;  %v1602_v27 = vand.u32 4294901760, %v9743_v25 }
  0x89   : > { %7145 = vmatmul.mubr.f32.gmra.mrb[16].mxu0 %v9450_v40  ;;  %v9768_v40 = vld [vmem:[%s11963_s3 + $0x40] sm:$0xff] }
  0x8a   : > { %7155 = vmatprep.mubr.msk.f32.mxu0 %vm9235_vm0, %v11976_v8  ;;  %v9772_v41 = vand.u32 4294901760, %v9768_v40 }
  0x8d   : > { %7156 = vmatmul.mubr.f32.vlgmr.msra.gmra.mrb[0].mxu0 %v401_v45 }
  0x8e   : > { %8376 = vmatpush3.bf16.msra.mxu0 %v9325_v18  ;;  %7158 = vmatprep.mubr.msk.f32.mxu0 %vm9235_vm0, %v11976_v8 }
  0x8f   : > { %8377 = vmatprep.subr.bf16.mxu0 %v11971_v3 }
  0x91   : > { %7159 = vmatmul.mubr.f32.gmra.mrb[2].mxu0 %v411_v46 }
  0x92   : > { %7161 = vmatprep.mubr.msk.f32.mxu0 %vm9235_vm0, %v11976_v8  ;;  %8379 = vmatpush3.bf16.msra.mxu0 %v9398_v0 }
  0x93   : > { %8380 = vmatprep.subr.bf16.mxu0 %v11971_v3 }
  0x95   : > { %7162 = vmatmul.mubr.f32.gmra.mrb[4].mxu0 %v421_v51 }
  0x96   : > { %7164 = vmatprep.mubr.msk.f32.mxu0 %vm9235_vm0, %v11976_v8 }
  0x99   : > { %7165 = vmatmul.mubr.f32.gmra.mrb[6].mxu0 %v431_v62  ;;  %v9685_v62 = vld [vmem:[%s11963_s3 + $0x10] sm:$0xff] }
  0x9a   : > { %7167 = vmatprep.mubr.msk.f32.mxu0 %vm9235_vm0, %v11976_v8  ;;  %v1590_v2 = vand.u32 4294901760, %v9685_v62 }
  0x9c   : > { %v9704_v7 = vpack.c.bf16 %v1593_v4, %v1590_v2 }
  0x9d   : > { %7168 = vmatmul.mubr.f32.gmra.mrb[8].mxu0 %v441_v9 }
  0x9e   : > { %7170 = vmatprep.mubr.msk.f32.mxu0 %vm9235_vm0, %v11976_v8  ;;  %8572 = vmatpush3.bf16.msra.mxu1 %v9704_v7 }
  0x9f   : > { %8568 = vmatprep.subr.bf16.mxu1 %v11971_v3 }
  0xa1   : > { %7171 = vmatmul.mubr.f32.gmra.mrb[10].mxu0 %v451_v22 }
  0xa2   : > { %7173 = vmatprep.mubr.msk.f32.mxu0 %vm9235_vm0, %v11976_v8 }
  0xa5   : > { %7174 = vmatmul.mubr.f32.gmra.mrb[12].mxu0 %v461_v28  ;;  %v1605_v28 = vand.u32 4294901760, %v9748_v26 }
  0xa6   : > { %7176 = vmatprep.mubr.msk.f32.mxu0 %vm9235_vm0, %v11976_v8 }
  0xa7   : > { %v9759_v34 = vpack.c.bf16 %v1605_v28, %v1602_v27 }
  0xa9   : > { %7177 = vmatmul.mubr.f32.gmra.mrb[14].mxu0 %v471_v35 }
  0xaa   : > { %7179 = vmatprep.mubr.msk.f32.mxu0 %vm9235_vm0, %v11976_v8 }
  0xad   : > { %7180 = vmatmul.mubr.f32.gmra.mrb[16].mxu0 %v481_v43 }
  0xae   : > { %7190 = vmatprep.mubr.msk.f32.mxu0 %vm9235_vm0, %v11976_v8 }
  0xb1   : > { %7191 = vmatmul.mubr.f32.vlgmr.msra.gmra.mrb[0].mxu0 %v9348_v31 }
  0xb2   : > { %8382 = vmatpush3.bf16.msra.mxu0 %v9306_v10  ;;  %7193 = vmatprep.mubr.msk.f32.mxu0 %vm9235_vm0, %v11976_v8 }
  0xb3   : > { %8383 = vmatprep.subr.bf16.mxu0 %v11971_v3 }
  0xb5   : > { %7194 = vmatmul.mubr.f32.gmra.mrb[2].mxu0 %v9350_v32 }
  0xb6   : > { %7196 = vmatprep.mubr.msk.f32.mxu0 %vm9235_vm0, %v11976_v8  ;;  %8385 = vmatpush3.bf16.msra.mxu0 %v9317_v14 }
  0xb7   : > { %8386 = vmatprep.subr.bf16.mxu0 %v11971_v3 }
  0xb9   : > { %7197 = vmatmul.mubr.f32.gmra.mrb[4].mxu0 %v9352_v33 }
  0xba   : > { %7199 = vmatprep.mubr.msk.f32.mxu0 %vm9235_vm0, %v11976_v8 }
  0xbd   : > { %7200 = vmatmul.mubr.f32.gmra.mrb[6].mxu0 %v9365_v39 }
  0xbe   : > { %7202 = vmatprep.mubr.msk.f32.mxu0 %vm9235_vm0, %v11976_v8 }
  0xc1   : > { %7203 = vmatmul.mubr.f32.gmra.mrb[8].mxu0 %v9372_v47 }
  0xc2   : > { %7205 = vmatprep.mubr.msk.f32.mxu0 %vm9235_vm0, %v11976_v8 }
  0xc5   : > { %7206 = vmatmul.mubr.f32.gmra.mrb[10].mxu0 %v9391_v59 }
  0xc6   : > { %7208 = vmatprep.mubr.msk.f32.mxu0 %vm9235_vm0, %v11976_v8 }
  0xc9   : > { %7209 = vmatmul.mubr.f32.gmra.mrb[12].mxu0 %v9415_v15 }
  0xca   : > { %7211 = vmatprep.mubr.msk.f32.mxu0 %vm9235_vm0, %v11976_v8 }
  0xcd   : > { %7212 = vmatmul.mubr.f32.gmra.mrb[14].mxu0 %v9422_v19 }
  0xce   : > { %7214 = vmatprep.mubr.msk.f32.mxu0 %vm9235_vm0, %v11976_v8 }
  0xd1   : > { %7215 = vmatmul.mubr.f32.gmra.mrb[16].mxu0 %v9441_v29 }
  0xd2   : > { %7225 = vmatprep.mubr.msk.f32.mxu0 %vm9235_vm0, %v11976_v8 }
  0xd5   : > { %7226 = vmatmul.mubr.f32.vlgmr.msra.gmra.mrb[0].mxu0 %v9348_v31 }
  0xd6   : > { %7228 = vmatprep.mubr.msk.f32.mxu0 %vm9235_vm0, %v11976_v8  ;;  %8388 = vmatpush3.bf16.msra.mxu0 %v9675_v60 }
  0xd7   : > { %8389 = vmatprep.subr.bf16.mxu0 %v11971_v3 }
  0xd9   : > { %7229 = vmatmul.mubr.f32.gmra.mrb[2].mxu0 %v9350_v32 }
  0xda   : > { %7231 = vmatprep.mubr.msk.f32.mxu0 %vm9235_vm0, %v11976_v8  ;;  %8391 = vmatpush3.bf16.msra.mxu0 %v9704_v7 }
  0xdb   : > { %8392 = vmatprep.subr.bf16.mxu0 %v11971_v3 }
  0xdd   : > { %7232 = vmatmul.mubr.f32.gmra.mrb[4].mxu0 %v9352_v33 }
  0xde   : > { %7234 = vmatprep.mubr.msk.f32.mxu0 %vm9235_vm0, %v11976_v8 }
  0xe1   : > { %7235 = vmatmul.mubr.f32.gmra.mrb[6].mxu0 %v9365_v39 }
  0xe2   : > { %7237 = vmatprep.mubr.msk.f32.mxu0 %vm9235_vm0, %v11976_v8 }
  0xe5   : > { %7238 = vmatmul.mubr.f32.gmra.mrb[8].mxu0 %v9372_v47 }
  0xe6   : > { %7240 = vmatprep.mubr.msk.f32.mxu0 %vm9235_vm0, %v11976_v8 }
  0xe9   : > { %7241 = vmatmul.mubr.f32.gmra.mrb[10].mxu0 %v9391_v59 }
  0xea   : > { %7243 = vmatprep.mubr.msk.f32.mxu0 %vm9235_vm0, %v11976_v8 }
  0xed   : > { %7244 = vmatmul.mubr.f32.gmra.mrb[12].mxu0 %v9415_v15  ;;  %v9714_v15 = vld [vmem:[%s11963_s3 + $0x20] sm:$0xff] }
  0xee   : > { %7246 = vmatprep.mubr.msk.f32.mxu0 %vm9235_vm0, %v11976_v8 }
  0xf1   : > { %7247 = vmatmul.mubr.f32.gmra.mrb[14].mxu0 %v9422_v19  ;;  %v1596_v19 = vand.u32 4294901760, %v9714_v15 }
  0xf2   : > { %7249 = vmatprep.mubr.msk.f32.mxu0 %vm9235_vm0, %v11976_v8 }
  0xf3   : > { %v9738_v24 = vpack.c.bf16 %v1599_v20, %v1596_v19 }
  0xf5   : > { %7250 = vmatmul.mubr.f32.gmra.mrb[16].mxu0 %v9441_v29  ;;  %8573 = vmatpush3.bf16.msra.mxu1 %v9738_v24 }
  0xf6   : > { %7270 = vmatprep.mubr.msk.f32.mxu0 %vm9235_vm0, %v11976_v8  ;;  %8394 = vmatpush3.bf16.msra.mxu0 %v9738_v24 }
  0xf7   : > { %8569 = vmatprep.subr.bf16.mxu1 %v11971_v3  ;;  %8395 = vmatprep.subr.bf16.mxu0 %v11971_v3 }
  0xf9   : > { %8574 = vmatpush3.bf16.msra.mxu1 %v9759_v34 }
  0xfa   : > { %8397 = vmatpush3.bf16.msra.mxu0 %v9759_v34  ;;  %8570 = vmatprep.subr.mxu1 %v11976_v8 }
  0xfb   : > { %7268 = vmatprep.subr.mxu0 %v11976_v8 }
  0xfd   : > { %8575 = vmatpush3.msra.mxu1 %v9772_v41 }
  0xfe   : > { %7269 = vmatpush3.msra.mxu0 %v9772_v41  ;;  %8398 = vmatprep.subr.bf16.mxu1 %v11971_v3 }
  0xff   : > { %7522 = vmatprep.subr.mxu0 %v11976_v8 }
 0x1a8   : > { %v1107_v31 = vpop.f32.mrb[0].mxu0 }
 0x1a9   : > { %1160 = vst.msk [vmem:[#allocation2 + $0x10] sm:$0xff] %vm1159_vm2, %v1107_v31  ;;  %v7227_v32 = vpop.f32.mrb[1].mxu0 }
 0x1ac   : > { %v1113_v33 = vpop.f32.mrb[2].mxu0 }
 0x1ad   : > { %1161 = vst.msk [vmem:[#allocation2 + $0x18] sm:$0xff] %vm1159_vm2, %v1113_v33  ;;  %v7230_v36 = vpop.f32.mrb[3].mxu0 }
 0x1b0   : > { %v1119_v37 = vpop.f32.mrb[4].mxu0  ;;  %v9643_v38 = vld [vmem:[#allocation2 + $0x10] sm:$0xff] }
 0x1b1   : > { %1162 = vst.msk [vmem:[#allocation2 + $0x20] sm:$0xff] %vm1159_vm2, %v1119_v37  ;;  %1220 = vrot.lane.b32.xlu0 %v9643_v38, %s9241_s16  ;;  %v7233_v39 = vpop.f32.mrb[5].mxu0 }
 0x1b4   : > { %v1125_v45 = vpop.f32.mrb[6].mxu0  ;;  %v9648_v46 = vld [vmem:[#allocation2 + $0x11] sm:$0xff] }
 0x1b5   : > { %v9650_v47 = vld [vmem:[#allocation2 + $0x17] sm:$0xff]  ;;  %1163 = vst.msk [vmem:[#allocation2 + $0x28] sm:$0xff] %vm1159_vm2, %v1125_v45  ;;  %1256 = vrot.lane.b32.xlu0 %v9648_v46, %s9242_s17  ;;  %v7236_v51 = vpop.f32.mrb[7].mxu0 }
 0x1b6   : > { %1292 = vrot.lane.b32.xlu1 %v9650_v47, %s9243_s18  ;;  %v9669_v59 = vld [vmem:[#allocation2 + $0x18] sm:$0xff] }
 0x1b8   : > { %v1131_v58 = vpop.f32.mrb[8].mxu0  ;;  %v9698_v6 = vld [vmem:[#allocation2 + $0x19] sm:$0xff] }
 0x1b9   : > { %1164 = vst.msk [vmem:[#allocation2 + $0x30] sm:$0xff] %vm1159_vm2, %v1131_v58  ;;  %1222 = vrot.lane.b32.xlu0 %v9669_v59, %s9241_s16  ;;  %v7239_v61 = vpop.f32.mrb[9].mxu0  ;;  %v9727_v22 = vld [vmem:[#allocation2 + $0x1f] sm:$0xff]  ;;  %v9838_v58 = vpop.permute.xlu0 %1364 }
 0x1ba   : > { %1321 = vrot.lane.b32.xlu1 %v9669_v59, %s9244_s24  ;;  %v1182_v30 = vld [vmem:[#allocation2 + $0x20] sm:$0xff] }
 0x1bc   : > { %v1137_v5 = vpop.f32.mrb[10].mxu0  ;;  %v1191_v43 = vld [vmem:[#allocation2 + $0x21] sm:$0xff] }
 0x1bd   : > { %1165 = vst.msk [vmem:[#allocation2 + $0x38] sm:$0xff] %vm1159_vm2, %v1137_v5  ;;  %1258 = vrot.lane.b32.xlu0 %v9698_v6, %s9242_s17  ;;  %v7242_v9 = vpop.f32.mrb[11].mxu0  ;;  %v9786_v48 = vld [vmem:[#allocation2 + $0x27] sm:$0xff] }
 0x1be   : > { %1350 = vrot.lane.b32.xlu1 %v9698_v6, %s9237_s12  ;;  %v1183_v49 = vld [vmem:[#allocation2 + $0x28] sm:$0xff]  ;;  %v9842_v9 = vpop.permute.xlu1 %1449 }
 0x1c0   : > { %v1143_v21 = vpop.f32.mrb[12].mxu0  ;;  %v1192_v11 = vld [vmem:[#allocation2 + $0x29] sm:$0xff] }
 0x1c1   : > { %1166 = vst.msk [vmem:[#allocation2 + $0x40] sm:$0xff] %vm1159_vm2, %v1143_v21  ;;  %1294 = vrot.lane.b32.xlu0 %v9727_v22, %s9243_s18  ;;  %v7245_v23 = vpop.f32.mrb[13].mxu0  ;;  %v9798_v12 = vld [vmem:[#allocation2 + $0x2f] sm:$0xff] }
 0x1c2   : > { %1379 = vrot.lane.b32.xlu1 %v9727_v22, %s9240_s15  ;;  %v1184_v13 = vld [vmem:[#allocation2 + $0x30] sm:$0xff]  ;;  %v9846_v23 = vpop.permute.xlu0 %1422 }
 0x1c4   : > { %v1149_v29 = vpop.f32.mrb[14].mxu0  ;;  %v1193_v17 = vld [vmem:[#allocation2 + $0x31] sm:$0xff] }
 0x1c5   : > { %1167 = vst.msk [vmem:[#allocation2 + $0x48] sm:$0xff] %vm1159_vm2, %v1149_v29  ;;  %1323 = vrot.lane.b32.xlu0 %v1182_v30, %s9244_s24  ;;  %v7248_v35 = vpop.f32.mrb[15].mxu0  ;;  %v9810_v31 = vld [vmem:[#allocation2 + $0x37] sm:$0xff] }
 0x1c6   : > { %1408 = vrot.lane.b32.xlu1 %v1182_v30, %s9239_s14  ;;  %v1185_v32 = vld [vmem:[#allocation2 + $0x38] sm:$0xff]  ;;  %v9850_v35 = vpop.permute.xlu1 %1393 }
 0x1c8   : > { %v1155_v42 = vpop.f32.mrb[16].mxu0  ;;  %v1194_v33 = vld [vmem:[#allocation2 + $0x39] sm:$0xff] }
 0x1c9   : > { %1169 = vst.msk [vmem:[#allocation2 + $0x50] sm:$0x1] %vm1168_vm3, %v1155_v42  ;;  %1224 = vrot.lane.b32.xlu0 %v1182_v30, %s9241_s16  ;;  %v7251_v44 = vpop.f32.mrb[17].mxu0  ;;  %v9822_v36 = vld [vmem:[#allocation2 + $0x3f] sm:$0xff] }
 0x1ca   : > { %1437 = vrot.lane.b32.xlu1 %v1191_v43, %s9238_s13  ;;  %v1186_v37 = vld [vmem:[#allocation2 + $0x40] sm:$0xff] }
 0x1cc   : > { %v1195_v39 = vld [vmem:[#allocation2 + $0x41] sm:$0xff]  ;;  %v1196_v21 = vld [vmem:[#allocation2 + $0x49] sm:$0x1]  ;;  %v1198_v29 = vld [vmem:[#allocation2 + $0x4f] sm:$0x1] }
 0x1cd   : > { %1260 = vrot.lane.b32.xlu0 %v1191_v43, %s9242_s17  ;;  %v1197_v45 = vld [vmem:[#allocation2 + $0x47] sm:$0xff] }
 0x1ce   : > { %1352 = vrot.lane.b32.xlu1 %v1191_v43, %s9237_s12  ;;  %v1199_v51 = vld [vmem:[#allocation2 + $0x48] sm:$0xff] }
 0x1cf   : > { %v1187_v61 = vld [vmem:[#allocation2 + $0x48] sm:$0x1] }
 0x1d0   : > { %v1201_v5 = vld [vmem:[#allocation2 + $0x49] sm:$0xff] }
 0x1d1   : > { %1296 = vrot.lane.b32.xlu0 %v9786_v48, %s9243_s18  ;;  %v1203_v30 = vld [vmem:[#allocation2 + $0x4f] sm:$0xff] }
 0x1d2   : > { %1381 = vrot.lane.b32.xlu1 %v9786_v48, %s9240_s15  ;;  %v1205_v43 = vld [vmem:[#allocation2 + $0x50] sm:$0xff] }
 0x1d3   : > { %v1200_v44 = vld [vmem:[#allocation2 + $0x50] sm:$0x1] }
 0x1d5   : > { %1325 = vrot.lane.b32.xlu0 %v1183_v49, %s9244_s24 }
 0x1d6   : > { %1410 = vrot.lane.b32.xlu1 %v1183_v49, %s9239_s14 }
 0x1d9   : > { %1226 = vrot.lane.b32.xlu0 %v1183_v49, %s9241_s16  ;;  %v1208_v49 = vld [vmem:[#allocation2 + $0x59] sm:$0x1] }
 0x1da   : > { %1439 = vrot.lane.b32.xlu1 %v1192_v11, %s9238_s13 }
 0x1dd   : > { %1262 = vrot.lane.b32.xlu0 %v1192_v11, %s9242_s17 }
 0x1de   : > { %1354 = vrot.lane.b32.xlu1 %v1192_v11, %s9237_s12  ;;  %v1179_v11 = vld [vmem:[#allocation2 + $0x8] sm:$0xff] }
 0x1e1   : > { %1298 = vrot.lane.b32.xlu0 %v9798_v12, %s9243_s18 }
 0x1e2   : > { %1383 = vrot.lane.b32.xlu1 %v9798_v12, %s9240_s15 }
 0x1e5   : > { %1327 = vrot.lane.b32.xlu0 %v1184_v13, %s9244_s24 }
 0x1e6   : > { %1412 = vrot.lane.b32.xlu1 %v1184_v13, %s9239_s14 }
 0x1e9   : > { %1228 = vrot.lane.b32.xlu0 %v1184_v13, %s9241_s16 }
 0x1ea   : > { %1441 = vrot.lane.b32.xlu1 %v1193_v17, %s9238_s13 }
 0x1ed   : > { %1264 = vrot.lane.b32.xlu0 %v1193_v17, %s9242_s17 }
 0x1ee   : > { %1356 = vrot.lane.b32.xlu1 %v1193_v17, %s9237_s12 }
 0x1f1   : > { %1300 = vrot.lane.b32.xlu0 %v9810_v31, %s9243_s18 }
 0x1f2   : > { %1385 = vrot.lane.b32.xlu1 %v9810_v31, %s9240_s15 }
 0x1f5   : > { %1329 = vrot.lane.b32.xlu0 %v1185_v32, %s9244_s24 }
 0x1f6   : > { %1414 = vrot.lane.b32.xlu1 %v1185_v32, %s9239_s14 }
 0x1f9   : > { %1230 = vrot.lane.b32.xlu0 %v1185_v32, %s9241_s16 }
 0x1fa   : > { %1443 = vrot.lane.b32.xlu1 %v1194_v33, %s9238_s13 }
 0x1fd   : > { %1266 = vrot.lane.b32.xlu0 %v1194_v33, %s9242_s17 }
 0x1fe   : > { %1358 = vrot.lane.b32.xlu1 %v1194_v33, %s9237_s12 }
 0x201   : > { %1302 = vrot.lane.b32.xlu0 %v9822_v36, %s9243_s18 }
 0x202   : > { %1387 = vrot.lane.b32.xlu1 %v9822_v36, %s9240_s15 }
 0x205   : > { %1331 = vrot.lane.b32.xlu0 %v1186_v37, %s9244_s24 }
 0x206   : > { %1416 = vrot.lane.b32.xlu1 %v1186_v37, %s9239_s14 }
 0x209   : > { %1232 = vrot.lane.b32.xlu0 %v1186_v37, %s9241_s16  ;;  %v1171_v37 = vld [vmem:[#allocation2 + $0xf] sm:$0xff] }
 0x20a   : > { %1445 = vrot.lane.b32.xlu1 %v1195_v39, %s9238_s13 }
 0x20d   : > { %1268 = vrot.lane.b32.xlu0 %v1195_v39, %s9242_s17 }
 0x20e   : > { %1360 = vrot.lane.b32.xlu1 %v1195_v39, %s9237_s12  ;;  %v1188_v39 = vld [vmem:[#allocation2 + $0x9] sm:$0xff] }
 0x211   : > { %1304 = vrot.lane.b32.xlu0 %v1197_v45, %s9243_s18 }
 0x212   : > { %1389 = vrot.lane.b32.xlu1 %v1197_v45, %s9240_s15 }
 0x215   : > { %1333 = vrot.lane.b32.xlu0 %v1199_v51, %s9244_s24 }
 0x216   : > { %1418 = vrot.lane.b32.xlu1 %v1199_v51, %s9239_s14 }
 0x219   : > { %1234 = vrot.lane.b32.xlu0 %v1187_v61, %s9241_s16 }
 0x21a   : > { %1447 = vrot.lane.b32.xlu1 %v1201_v5, %s9238_s13 }
 0x21d   : > { %1270 = vrot.lane.b32.xlu0 %v1196_v21, %s9242_s17 }
 0x21e   : > { %1362 = vrot.lane.b32.xlu1 %v1201_v5, %s9237_s12 }
 0x221   : > { %1306 = vrot.lane.b32.xlu0 %v1198_v29, %s9243_s18 }
 0x222   : > { %1391 = vrot.lane.b32.xlu1 %v1203_v30, %s9240_s15 }
 0x223   : > { %v1221_v42 = vpop.permute.xlu0 %1220 }
 0x224   : > { %v1463_v61 = vsel %vm1159_vm2, %v1171_v37, %v1221_v42 }
 0x225   : > { %1335 = vrot.lane.b32.xlu0 %v1200_v44, %s9244_s24 }
 0x226   : > { %1420 = vrot.lane.b32.xlu1 %v1205_v43, %s9239_s14 }
 0x227   : > { %v1257_v13 = vpop.permute.xlu0 %1256 }
 0x228   : > { %v1293_v17 = vpop.permute.xlu1 %1292  ;;  %v1473_v29 = vsel %vm1471_vm4, %v1463_v61, %v1257_v13 }
 0x229   : > { %1218 = vrot.lane.b32.xlu0 %v1179_v11, %s9241_s16  ;;  %v1483_v30 = vsel %vm1481_vm5, %v1473_v29, %v1293_v17 }
 0x22a   : > { %1451 = vrot.lane.b32.xlu1 %v1208_v49, %s9238_s13 }
 0x22b   : > { %v9856_v32 = vpop.permute.xlu0 %1222 }
 0x22c   : > { %v1322_v33 = vpop.permute.xlu1 %1321 }
 0x22d   : > { %1290 = vrot.lane.b32.xlu0 %v1171_v37, %s9243_s18  ;;  %v9925_v37 = vsub.f32 %v9714_v15, %v1596_v19 }
 0x22e   : > { %1254 = vrot.lane.b32.xlu1 %v1188_v39, %s9242_s17  ;;  %v9930_v39 = vsub.f32 %v9720_v16, %v1599_v20 }
 0x22f   : > { %v9860_v45 = vpop.permute.xlu0 %1258 }
 0x230   : > { %v1351_v51 = vpop.permute.xlu1 %1350  ;;  %v9943_v15 = vpack.c.bf16 %v9930_v39, %v9925_v37 }
 0x231   : > { %1348 = vrot.lane.b32.xlu0 %v9648_v46, %s9237_s12  ;;  %v9882_v46 = vsub.f32 %v9665_v55, %v1587_v57  ;;  %v9898_v55 = vsub.f32 %v9690_v63, %v1593_v4  ;;  %v1492_v57 = vsel %vm302_vm1, %v1483_v30, %v1322_v33 }
 0x232   : > { %1319 = vrot.lane.b32.xlu1 %v9643_v38, %s9244_s24  ;;  %v9877_v38 = vsub.f32 %v9660_v52, %v1584_v56  ;;  %v9893_v52 = vsub.f32 %v9685_v62, %v1590_v2  ;;  %v1502_v44 = vsel %vm1500_vm6, %v1492_v57, %v1351_v51  ;;  %v11974_v57 = vand.u32 4294901760, %v9925_v37 }
 0x233   : > { %v9867_v5 = vpop.permute.xlu0 %1294  ;;  %v11969_v4 = vand.u32 4294901760, %v9882_v46  ;;  %v11967_v33 = vand.u32 4294901760, %v9898_v55 }
 0x234   : > { %v1380_v21 = vpop.permute.xlu1 %1379  ;;  %v9902_v56 = vpack.c.bf16 %v9882_v46, %v9877_v38  ;;  %v9910_v62 = vpack.c.bf16 %v9898_v55, %v9893_v52  ;;  %v11970_v2 = vand.u32 4294901760, %v9877_v38 }
 0x235   : > { %1406 = vrot.lane.b32.xlu0 %v9669_v59, %s9239_s14  ;;  %v9888_v59 = vld [vmem:[%s11965_s5 + $0x8] sm:$0xff]  ;;  %v1512_v63 = vsel %vm1510_vm7, %v1502_v44, %v1380_v21  ;;  %v1758_v29 = vsub.f32 %v9882_v46, %v11969_v4  ;;  %v11973_v44 = vand.u32 4294901760, %v9930_v39 }
 0x236   : > { %1377 = vrot.lane.b32.xlu1 %v9650_v47, %s9240_s15  ;;  %12001 = vst [vmem:[#allocation4_spill] sm:$0xff] %v9888_v59  ;;  %vm285_vm10 = vcmp.gt.f32.partialorder %v9888_v59, 0.0  ;;  %v1751_v21 = vsub.f32 %v9877_v38, %v11970_v2 }
 0x237   : > { %v1324_v42 = vpop.permute.xlu0 %1323 }
 0x238   : > { %v1409_v43 = vpop.permute.xlu1 %1408 }
 0x239   : > { %v1522_v49 = vsel %vm1520_vm8, %v1512_v63, %v1409_v43  ;;  %v1772_v43 = vsub.f32 %v9898_v55, %v11967_v33 }
 0x23a   : > { %1435 = vrot.lane.b32.xlu1 %v9698_v6, %s9238_s13  ;;  %v11968_v6 = vand.u32 4294901760, %v9893_v52 }
 0x23b   : > { %v9917_v11 = vpop.permute.xlu0 %1224  ;;  %v1773_v3 = vand.u32 4294901760, %v1772_v43 }
 0x23c   : > { %v1438_v13 = vpop.permute.xlu1 %1437  ;;  %v1765_v30 = vsub.f32 %v9893_v52, %v11968_v6 }
 0x23d   : > { %v1532_v17 = vsel %vm1530_vm9, %v1522_v49, %v1438_v13  ;;  %v9963_v49 = vsub.f32 %v9743_v25, %v1602_v27  ;;  %v1752_v13 = vand.u32 4294901760, %v1751_v21  ;;  %v1786_v25 = vsub.f32 %v9930_v39, %v11973_v44 }
 0x23e   : > { %v1541_v51 = vsel %vm285_vm10, %v1532_v17, 0.0  ;;  %v1759_v17 = vand.u32 4294901760, %v1758_v29  ;;  %v1766_v2 = vand.u32 4294901760, %v1765_v30  ;;  %v1464_v27 = vsel %vm1159_vm2, %v9650_v47, %v9856_v32 }
 0x23f   : > { %v1560_v61 = vsel %vm1555_vm11, %v1541_v51, 0  ;;  %v9947_v16 = vpop.permute.xlu0 %1260  ;;  %v9968_v51 = vsub.f32 %v9748_v26, %v1605_v28  ;;  %v1474_v29 = vsel %vm1471_vm4, %v1464_v27, %v9860_v45  ;;  %v12005_v27 = vand.u32 4294901760, %v9963_v49 }
 0x240   : > { %v9945_v19 = vand.u32 4294901760, %v1560_v61  ;;  %v1353_v20 = vpop.permute.xlu1 %1352  ;;  %v9990_v30 = vpack.c.bf16 %v1759_v17, %v1752_v13  ;;  %v1484_v47 = vsel %vm1481_vm5, %v1474_v29, %v9867_v5  ;;  %v10001_v28 = vpack.c.bf16 %v1773_v3, %v1766_v2 }
 0x241   : > { %v9986_v21 = vpack.c.bf16 %v9968_v51, %v9963_v49  ;;  %v11978_v43 = vand.u32 4294901760, %v9968_v51  ;;  %v1493_v8 = vsel %vm302_vm1, %v1484_v47, %v1324_v42  ;;  %v1787_v17 = vand.u32 4294901760, %v1786_v25 }
 0x242   : > { %v9958_v63 = vsub.f32 %v1560_v61, %v9945_v19  ;;  %v1779_v61 = vsub.f32 %v9925_v37, %v11974_v57  ;;  %12002 = vst [vmem:[#allocation5_spill] sm:$0xff] %v9990_v30  ;;  %12004 = vst [vmem:[#allocation7_spill] sm:$0xff] %v10001_v28  ;;  %v1503_v45 = vsel %vm1500_vm6, %v1493_v8, %v1353_v20  ;;  %v12006_v29 = vmov 0.0  }
 0x243   : > { %v1297_v33 = vpop.permute.xlu0 %1296  ;;  %v1793_v5 = vsub.f32 %v9963_v49, %v12005_v27  ;;  %v1800_v3 = vsub.f32 %v9968_v51, %v11978_v43  ;;  %v10017_v8 = vsub.f32 %v9768_v40, %v9772_v41 }
 0x244   : > { %v1382_v6 = vpop.permute.xlu1 %1381  ;;  %v11975_v4 = vand.u32 4294901760, %v9958_v63  ;;  %v1780_v13 = vand.u32 4294901760, %v1779_v61 }
 0x245   : > { %v1801_v40 = vand.u32 4294901760, %v1800_v3  ;;  %v10029_v27 = vand.u32 4294901760, %v10017_v8 }
 0x246   : > { %v1670_v26 = vsub.f32 %v9958_v63, %v11975_v4  ;;  %v9998_v4 = vld [vmem:[%s11965_s5 + $0x10] sm:$0xff]  ;;  %v10024_v25 = vpack.c.bf16 %v1787_v17, %v1780_v13 }
 0x247   : > { %v1326_v32 = vpop.permute.xlu0 %1325  ;;  %12003 = vst [vmem:[#allocation6_spill] sm:$0xff] %v9998_v4  ;;  %vm286_vm12 = vcmp.gt.f32.partialorder %v9998_v4, 0.0  ;;  %v1807_v17 = vsub.f32 %v10017_v8, %v10029_v27 }
 0x248   : > { %v1411_v44 = vpop.permute.xlu1 %1410  ;;  %v1671_v57 = vand.u32 4294901760, %v1670_v26  ;;  %v1513_v26 = vsel %vm1510_vm7, %v1503_v45, %v1382_v6  ;;  %v12007_v6 = vmov 0.0|0.0   ;;  %12008 = vst [vmem:[#allocation8_spill] sm:$0xff] %v10024_v25  ;;  %v1794_v45 = vand.u32 4294901760, %v1793_v5 }
 0x249   : > { %v1523_v42 = vsel %vm1520_vm8, %v1513_v26, %v1411_v44 }
 0x24a   : > { %7274 = vmatmul.mubr.f32.vlgmr.msra.gmra.mrb[0].mxu1 %v1671_v57  ;;  %v10038_v13 = vpack.c.bf16 %v1801_v40, %v1794_v45  ;;  %v10053_v45 = vand.u32 4294901760, %v1807_v17 }
 0x24b   : > { %7276 = vmatprep.mubr.msk.f32.mxu1 %vm9235_vm0, %v12006_v29  ;;  %8400 = vmatpush3.bf16.msra.mxu1 %v9990_v30  ;;  %v1227_v2 = vpop.permute.xlu0 %1226 }
 0x24c   : > { %v1440_v20 = vpop.permute.xlu1 %1439  ;;  %8401 = vmatprep.subr.bf16.mxu1 %v12007_v6  ;;  %12009 = vst [vmem:[#allocation9_spill] sm:$0xff] %v10038_v13  ;;  %12010 = vst [vmem:[#allocation10_spill] sm:$0xff] %v10053_v45 }
 0x24d   : > { %v1533_v57 = vsel %vm1530_vm9, %v1523_v42, %v1440_v20 }
 0x24e   : > { %v1542_v61 = vsel %vm286_vm12, %v1533_v57, 0.0  ;;  %v1465_v57 = vsel %vm1159_vm2, %v9727_v22, %v9917_v11  ;;  %v10059_v22 = vld [vmem:[%s11965_s5 + $0x18] sm:$0xff] }
 0x24f   : > { %v1563_v47 = vsel %vm1555_vm11, %v1542_v61, 0  ;;  %8403 = vmatpush3.bf16.msra.mxu1 %v10001_v28  ;;  %v1263_v26 = vpop.permute.xlu0 %1262  ;;  %12011 = vst [vmem:[#allocation11_spill] sm:$0xff] %v10059_v22  ;;  %vm287_vm13 = vcmp.gt.f32.partialorder %v10059_v22, 0.0 }
 0x250   : > { %v10031_v44 = vand.u32 4294901760, %v1563_v47  ;;  %v1355_v43 = vpop.permute.xlu1 %1354  ;;  %8404 = vmatprep.subr.bf16.mxu1 %v12007_v6 }
 0x252   : > { %v10035_v42 = vsub.f32 %v1563_v47, %v10031_v44  ;;  %v1475_v47 = vsel %vm1471_vm4, %v1465_v57, %v9947_v16 }
 0x253   : > { %8406 = vmatpush3.bf16.msra.mxu1 %v10024_v25  ;;  %v1299_v5 = vpop.permute.xlu0 %1298  ;;  %v1485_v40 = vsel %vm1481_vm5, %v1475_v47, %v1297_v33 }
 0x254   : > { %v1384_v3 = vpop.permute.xlu1 %1383  ;;  %v11982_v20 = vand.u32 4294901760, %v10035_v42  ;;  %8407 = vmatprep.subr.bf16.mxu1 %v12007_v6  ;;  %v1494_v11 = vsel %vm302_vm1, %v1485_v40, %v1326_v32 }
 0x255   : > { %v1504_v16 = vsel %vm1500_vm6, %v1494_v11, %v1355_v43 }
 0x256   : > { %v1680_v61 = vsub.f32 %v10035_v42, %v11982_v20  ;;  %v1514_v17 = vsel %vm1510_vm7, %v1504_v16, %v1384_v3  ;;  %v1466_v20 = vsel %vm1159_vm2, %v9786_v48, %v1227_v2 }
 0x257   : > { %8409 = vmatpush3.bf16.msra.mxu1 %v10038_v13  ;;  %v1328_v4 = vpop.permute.xlu0 %1327 }
 0x258   : > { %v1413_v25 = vpop.permute.xlu1 %1412  ;;  %v1681_v28 = vand.u32 4294901760, %v1680_v61  ;;  %7313 = vmatprep.subr.mxu1 %v12006_v29 }
 0x259   : > { %v1524_v33 = vsel %vm1520_vm8, %v1514_v17, %v1413_v25 }
 0x25a   : > { %7277 = vmatmul.mubr.f32.gmra.mrb[2].mxu1 %v1681_v28 }
 0x25b   : > { %7279 = vmatprep.mubr.msk.f32.mxu1 %vm9235_vm0, %v12006_v29  ;;  %7314 = vmatpush3.msra.mxu1 %v10053_v45  ;;  %v1229_v57 = vpop.permute.xlu0 %1228 }
 0x25c   : > { %v1442_v61 = vpop.permute.xlu1 %1441  ;;  %8410 = vmatprep.subr.bf16.mxu1 %v12007_v6 }
 0x25d   : > { %v1534_v32 = vsel %vm1530_vm9, %v1524_v33, %v1442_v61  ;;  %v1476_v61 = vsel %vm1471_vm4, %v1466_v20, %v1263_v26 }
 0x25e   : > { %v1543_v28 = vsel %vm287_vm13, %v1534_v32, 0.0  ;;  %v1486_v32 = vsel %vm1481_vm5, %v1476_v61, %v1299_v5 }
 0x25f   : > { %v1566_v43 = vsel %vm1555_vm11, %v1543_v28, 0  ;;  %v1265_v47 = vpop.permute.xlu0 %1264  ;;  %v1495_v13 = vsel %vm302_vm1, %v1486_v32, %v1328_v4 }
 0x260   : > { %v10075_v3 = vand.u32 4294901760, %v1566_v43  ;;  %v1357_v40 = vpop.permute.xlu1 %1356 }
 0x261   : > { %v1505_v48 = vsel %vm1500_vm6, %v1495_v13, %v1357_v40 }
 0x262   : > { %v10078_v11 = vsub.f32 %v1566_v43, %v10075_v3  ;;  %v10091_v43 = vld [vmem:[%s11965_s5 + $0x20] sm:$0xff] }
 0x263   : > { %v1301_v16 = vpop.permute.xlu0 %1300  ;;  %12012 = vst [vmem:[#allocation12_spill] sm:$0xff] %v10091_v43  ;;  %vm11997_vm14 = vcmp.gt.f32.partialorder %v10091_v43, 0.0 }
 0x264   : > { %v1386_v25 = vpop.permute.xlu1 %1385  ;;  %v11986_v17 = vand.u32 4294901760, %v10078_v11 }
 0x265   : > { %v1515_v2 = vsel %vm1510_vm7, %v1505_v48, %v1386_v25 }
 0x266   : > { %v1690_v33 = vsub.f32 %v10078_v11, %v11986_v17 }
 0x267   : > { %v1330_v28 = vpop.permute.xlu0 %1329 }
 0x268   : > { %v1415_v22 = vpop.permute.xlu1 %1414  ;;  %v1691_v45 = vand.u32 4294901760, %v1690_v33 }
 0x269   : > { %v1525_v26 = vsel %vm1520_vm8, %v1515_v2, %v1415_v22  ;;  %v1467_v2 = vsel %vm1159_vm2, %v9798_v12, %v1229_v57 }
 0x26a   : > { %7280 = vmatmul.mubr.f32.gmra.mrb[4].mxu1 %v1691_v45 }
 0x26b   : > { %7282 = vmatprep.mubr.msk.f32.mxu1 %vm9235_vm0, %v12006_v29  ;;  %v1231_v5 = vpop.permute.xlu0 %1230 }
 0x26c   : > { %v1444_v20 = vpop.permute.xlu1 %1443 }
 0x26d   : > { %v1535_v33 = vsel %vm1530_vm9, %v1525_v26, %v1444_v20  ;;  %v1477_v20 = vsel %vm1471_vm4, %v1467_v2, %v1265_v47 }
 0x26e   : > { %v1544_v61 = vsel %vm11997_vm14, %v1535_v33, 0.0  ;;  %v1487_v33 = vsel %vm1481_vm5, %v1477_v20, %v1301_v16 }
 0x26f   : > { %v1569_v4 = vsel %vm1555_vm11, %v1544_v61, 0  ;;  %v1267_v45 = vpop.permute.xlu0 %1266  ;;  %v1496_v59 = vsel %vm302_vm1, %v1487_v33, %v1330_v28 }
 0x270   : > { %v10104_v13 = vand.u32 4294901760, %v1569_v4  ;;  %v1359_v40 = vpop.permute.xlu1 %1358 }
 0x271   : > { %v1506_v12 = vsel %vm1500_vm6, %v1496_v59, %v1359_v40 }
 0x272   : > { %v10107_v25 = vsub.f32 %v1569_v4, %v10104_v13  ;;  %v10120_v4 = vld [vmem:[%s11965_s5 + $0x28] sm:$0xff] }
 0x273   : > { %v1303_v32 = vpop.permute.xlu0 %1302  ;;  %12013 = vst [vmem:[#allocation13_spill] sm:$0xff] %v10120_v4  ;;  %vm11992_vm15 = vcmp.gt.f32.partialorder %v10120_v4, 0.0 }
 0x274   : > { %v1388_v48 = vpop.permute.xlu1 %1387  ;;  %v11989_v22 = vand.u32 4294901760, %v10107_v25 }
 0x275   : > { %v1516_v57 = vsel %vm1510_vm7, %v1506_v12, %v1388_v48 }
 0x276   : > { %v1700_v26 = vsub.f32 %v10107_v25, %v11989_v22 }
 0x277   : > { %v1332_v61 = vpop.permute.xlu0 %1331 }
 0x278   : > { %v1417_v17 = vpop.permute.xlu1 %1416  ;;  %v1701_v43 = vand.u32 4294901760, %v1700_v26 }
 0x279   : > { %v1526_v47 = vsel %vm1520_vm8, %v1516_v57, %v1417_v17  ;;  %v1468_v57 = vsel %vm1159_vm2, %v9810_v31, %v1231_v5 }
 0x27a   : > { %7283 = vmatmul.mubr.f32.gmra.mrb[6].mxu1 %v1701_v43 }
 0x27b   : > { %7285 = vmatprep.mubr.msk.f32.mxu1 %vm9235_vm0, %v12006_v29  ;;  %v1233_v16 = vpop.permute.xlu0 %1232 }
 0x27c   : > { %v1446_v2 = vpop.permute.xlu1 %1445 }
 0x27d   : > { %v1536_v26 = vsel %vm1530_vm9, %v1526_v47, %v1446_v2  ;;  %v1478_v2 = vsel %vm1471_vm4, %v1468_v57, %v1267_v45 }
 0x27e   : > { %v1545_v20 = vsel %vm11992_vm15, %v1536_v26, 0.0  ;;  %v1488_v26 = vsel %vm1481_vm5, %v1478_v2, %v1303_v32 }
 0x27f   : > { %v1572_v28 = vsel %vm1555_vm11, %v1545_v20, 0  ;;  %v1269_v43 = vpop.permute.xlu0 %1268  ;;  %v1497_v30 = vsel %vm302_vm1, %v1488_v26, %v1332_v61  ;;  %v1469_v26 = vsel %vm1159_vm2, %v9822_v36, %v1233_v16 }
 0x280   : > { %v10133_v59 = vand.u32 4294901760, %v1572_v28  ;;  %v1361_v40 = vpop.permute.xlu1 %1360 }
 0x281   : > { %v1507_v31 = vsel %vm1500_vm6, %v1497_v30, %v1361_v40 }
 0x282   : > { %v10136_v48 = vsub.f32 %v1572_v28, %v10133_v59  ;;  %v10149_v28 = vld [vmem:[%s11965_s5 + $0x30] sm:$0xff] }
 0x283   : > { %v1305_v33 = vpop.permute.xlu0 %1304  ;;  %12014 = vst [vmem:[#allocation14_spill] sm:$0xff] %v10149_v28  ;;  %vm11994_vm15 = vcmp.gt.f32.partialorder %v10149_v28, 0.0 }
 0x284   : > { %v1390_v12 = vpop.permute.xlu1 %1389  ;;  %v11993_v17 = vand.u32 4294901760, %v10136_v48 }
 0x285   : > { %v1517_v5 = vsel %vm1510_vm7, %v1507_v31, %v1390_v12 }
 0x286   : > { %v1710_v47 = vsub.f32 %v10136_v48, %v11993_v17 }
 0x287   : > { %v1334_v20 = vpop.permute.xlu0 %1333 }
 0x288   : > { %v1419_v22 = vpop.permute.xlu1 %1418  ;;  %v1711_v4 = vand.u32 4294901760, %v1710_v47 }
 0x289   : > { %v1527_v45 = vsel %vm1520_vm8, %v1517_v5, %v1419_v22  ;;  %v1479_v22 = vsel %vm1471_vm4, %v1469_v26, %v1269_v43 }
 0x28a   : > { %7286 = vmatmul.mubr.f32.gmra.mrb[8].mxu1 %v1711_v4 }
 0x28b   : > { %7288 = vmatprep.mubr.msk.f32.mxu1 %vm9235_vm0, %v12006_v29  ;;  %v1235_v32 = vpop.permute.xlu0 %1234 }
 0x28c   : > { %v1448_v57 = vpop.permute.xlu1 %1447 }
 0x28d   : > { %v1537_v47 = vsel %vm1530_vm9, %v1527_v45, %v1448_v57  ;;  %v1489_v57 = vsel %vm1481_vm5, %v1479_v22, %v1305_v33 }
 0x28e   : > { %v1546_v2 = vsel %vm11994_vm15, %v1537_v47, 0.0  ;;  %v1178_v47 = vld [vmem:[#allocation2 + $0x47] sm:$0x1] }
 0x28f   : > { %v1575_v61 = vsel %vm1555_vm11, %v1546_v2, 0  ;;  %v1271_v4 = vpop.permute.xlu0 %1270  ;;  %v10175_v2 = vld [vmem:[%s11965_s5 + $0x38] sm:$0xff]  ;;  %v1470_v17 = vsel %vm1159_vm2, %v1178_v47, %v1235_v32 }
 0x290   : > { %v10162_v30 = vand.u32 4294901760, %v1575_v61  ;;  %v1363_v40 = vpop.permute.xlu1 %1362  ;;  %v1480_v16 = vsel %vm1471_vm4, %v1470_v17, %v1271_v4  ;;  %vm291_vm15 = vcmp.gt.f32.partialorder %v10175_v2, 0.0 }
 0x292   : > { %v10165_v12 = vsub.f32 %v1575_v61, %v10162_v30  ;;  %v1498_v61 = vsel %vm302_vm1, %v1489_v57, %v1334_v20  ;;  %v10190_v20 = vld [vmem:[%s11965_s5 + $0x40] sm:$0x1]  ;;  %v1170_v57 = vld [vmem:[#allocation2 + $0x7] sm:$0xff] }
 0x293   : > { %v1307_v31 = vpop.permute.xlu0 %1306  ;;  %v1508_v43 = vsel %vm1500_vm6, %v1498_v61, %v1363_v40  ;;  %vm11998_vm14 = vcmp.gt.f32.partialorder %v10190_v20, 0.0 }
 0x294   : > { %v1392_v5 = vpop.permute.xlu1 %1391  ;;  %v1719_v45 = vand.u32 4294901760, %v10165_v12  ;;  %v1490_v33 = vsel %vm1481_vm5, %v1480_v16, %v1307_v31 }
 0x295   : > { %v1518_v26 = vsel %vm1510_vm7, %v1508_v43, %v1392_v5 }
 0x296   : > { %v1720_v36 = vsub.f32 %v10165_v12, %v1719_v45 }
 0x297   : > { %v1336_v28 = vpop.permute.xlu0 %1335 }
 0x298   : > { %v1421_v22 = vpop.permute.xlu1 %1420  ;;  %v1721_v0 = vand.u32 4294901760, %v1720_v36  ;;  %v1499_v17 = vsel %vm302_vm1, %v1490_v33, %v1336_v28 }
 0x299   : > { %v1528_v32 = vsel %vm1520_vm8, %v1518_v26, %v1421_v22  ;;  %v1509_v40 = vsel %vm1500_vm6, %v1499_v17, %v9838_v58 }
 0x29a   : > { %v1538_v4 = vsel %vm1530_vm9, %v1528_v32, %v9842_v9  ;;  %7289 = vmatmul.mubr.f32.gmra.mrb[10].mxu1 %v1721_v0  ;;  %v1519_v5 = vsel %vm1510_vm7, %v1509_v40, %v9850_v35 }
 0x29b   : > { %v1547_v31 = vsel %vm291_vm15, %v1538_v4, 0.0  ;;  %7291 = vmatprep.mubr.msk.f32.mxu1 %vm9235_vm0, %v12006_v29  ;;  %v1529_v9 = vsel %vm1520_vm8, %v1519_v5, %v9846_v23  ;;  %v1219_v58 = vpop.permute.xlu0 %1218 }
 0x29c   : > { %v1578_v28 = vsel %vm1555_vm11, %v1547_v31, 0  ;;  %v1452_v47 = vpop.permute.xlu1 %1451  ;;  %v1462_v35 = vsel %vm1159_vm2, %v1170_v57, %v1219_v58 }
 0x29d   : > { %v10208_v0 = vand.u32 4294901760, %v1578_v28  ;;  %v1539_v61 = vsel %vm1530_vm9, %v1529_v9, %v1452_v47 }
 0x29e   : > { %v1548_v36 = vsel %vm11998_vm14, %v1539_v61, 0.0 }
 0x29f   : > { %v10215_v16 = vsub.f32 %v1578_v28, %v10208_v0  ;;  %v1581_v43 = vsel %vm1555_vm11, %v1548_v36, 0  ;;  %v1291_v22 = vpop.permute.xlu0 %1290 }
 0x2a0   : > { %v10218_v33 = vand.u32 4294901760, %v1581_v43  ;;  %v1255_v26 = vpop.permute.xlu1 %1254 }
 0x2a1   : > { %v1472_v23 = vsel %vm1471_vm4, %v1462_v35, %v1255_v26  ;;  %v1729_v32 = vand.u32 4294901760, %v10215_v16  ;;  %v10240_v35 = vld [vmem:[%s11965_s5] sm:$0xff] }
 0x2a2   : > { %v10223_v17 = vsub.f32 %v1581_v43, %v10218_v33  ;;  %v1482_v40 = vsel %vm1481_vm5, %v1472_v23, %v1291_v22  ;;  %vm284_vm14 = vcmp.gt.f32.partialorder %v10240_v35, 0.0 }
 0x2a3   : > { %v1730_v4 = vsub.f32 %v10215_v16, %v1729_v32  ;;  %v1349_v5 = vpop.permute.xlu0 %1348 }
 0x2a4   : > { %v1320_v31 = vpop.permute.xlu1 %1319  ;;  %v1739_v57 = vand.u32 4294901760, %v10223_v17 }
 0x2a5   : > { %v1491_v28 = vsel %vm302_vm1, %v1482_v40, %v1320_v31  ;;  %v1731_v47 = vand.u32 4294901760, %v1730_v4 }
 0x2a6   : > { %v1740_v9 = vsub.f32 %v10223_v17, %v1739_v57  ;;  %v1501_v58 = vsel %vm1500_vm6, %v1491_v28, %v1349_v5 }
 0x2a7   : > { %7292 = vmatmul.mubr.f32.gmra.mrb[12].mxu1 %v1731_v47  ;;  %v1407_v26 = vpop.permute.xlu0 %1406 }
 0x2a8   : > { %v1378_v61 = vpop.permute.xlu1 %1377  ;;  %7294 = vmatprep.mubr.msk.f32.mxu1 %vm9235_vm0, %v12006_v29  ;;  %v1741_v36 = vand.u32 4294901760, %v1740_v9 }
 0x2a9   : > { %v1511_v43 = vsel %vm1510_vm7, %v1501_v58, %v1378_v61  ;;  %v12015_v61 = vand.u32 4294901760, %v9877_v38  ;;  %v12019_v38 = vand.u32 4294901760, %v9958_v63 }
 0x2aa   : > { %v1521_v22 = vsel %vm1520_vm8, %v1511_v43, %v1407_v26  ;;  %v12017_v26 = vand.u32 4294901760, %v9893_v52  ;;  %v12022_v52 = vand.u32 4294901760, %v10035_v42 }
 0x2ab   : > { %7295 = vmatmul.mubr.f32.gmra.mrb[14].mxu1 %v1741_v36  ;;  %v12016_v36 = vand.u32 4294901760, %v9882_v46  ;;  %v12020_v46 = vand.u32 4294901760, %v9925_v37  ;;  %v12025_v37 = vand.u32 4294901760, %v10078_v11 }
 0x2ac   : > { %v1436_v23 = vpop.permute.xlu1 %1435  ;;  %7315 = vmatprep.mubr.msk.f32.mxu1 %vm9235_vm0, %v12006_v29 }
 0x2ad   : > { %v1531_v4 = vsel %vm1530_vm9, %v1521_v22, %v1436_v23  ;;  %v10338_v43 = vpack.c.bf16 %v12016_v36, %v12015_v61  ;;  %v12018_v22 = vand.u32 4294901760, %v9898_v55  ;;  %v12023_v55 = vand.u32 4294901760, %v9963_v49 }
 0x2ae   : > { %v1540_v40 = vsel %vm284_vm14, %v1531_v4, 0.0  ;;  %v12021_v4 = vand.u32 4294901760, %v9930_v39  ;;  %v12026_v39 = vand.u32 4294901760, %v10107_v25  ;;  %v12027_v49 = vand.u32 4294901760, %v10136_v48 }
 0x2af   : > { %v1557_v31 = vsel %vm1555_vm11, %v1540_v40, 0  ;;  %v10347_v23 = vpack.c.bf16 %v12018_v22, %v12017_v26 }
 0x2b0   : > { %v10251_v5 = vand.u32 4294901760, %v1557_v31  ;;  %v10359_v40 = vpack.c.bf16 %v12021_v4, %v12020_v46 }
 0x2b2   : > { %v10254_v28 = vsub.f32 %v1557_v31, %v10251_v5  ;;  %7316 = vmatmul.mubr.f32.vlgmr.msra.gmra.mrb[16].mxu1 %v10251_v5 }
 0x2b3   : > { %8412 = vmatpush3.bf16.msra.mxu1 %v9902_v56  ;;  %7318 = vmatprep.mubr.msk.f32.mxu1 %vm9235_vm0, %v12006_v29 }
 0x2b4   : > { %v1659_v47 = vand.u32 4294901760, %v10254_v28  ;;  %8413 = vmatprep.subr.bf16.mxu1 %v12007_v6 }
 0x2b6   : > { %v1660_v9 = vsub.f32 %v10254_v28, %v1659_v47  ;;  %7319 = vmatmul.mubr.f32.gmra.mrb[0].mxu1 %v9945_v19 }
 0x2b7   : > { %7321 = vmatprep.mubr.msk.f32.mxu1 %vm9235_vm0, %v12006_v29  ;;  %8415 = vmatpush3.bf16.msra.mxu1 %v9910_v62 }
 0x2b8   : > { %v1661_v58 = vand.u32 4294901760, %v1660_v9  ;;  %8416 = vmatprep.subr.bf16.mxu1 %v12007_v6  ;;  %v6526_v9 = vld [vmem:[%s9332_s11 + $0x70] sm:$0xff] }
 0x2b9   : > { %v3402_v22 = vsel %vm302_vm1, %v6526_v9, 0 }
 0x2ba   : > { %7271 = vmatmul.mubr.f32.vlgmr.msra.gmra.mrb[18].mxu0 %v1661_v58  ;;  %7322 = vmatmul.mubr.f32.gmra.mrb[2].mxu1 %v10031_v44 }
 0x2bb   : > { %7324 = vmatprep.mubr.msk.f32.mxu1 %vm9235_vm0, %v12006_v29  ;;  %8418 = vmatpush3.bf16.msra.mxu1 %v9943_v15 }
 0x2bc   : > { %8419 = vmatprep.subr.bf16.mxu1 %v12007_v6  ;;  %7524 = vmatprep.mubr.msk.f32.mxu0 %vm9235_vm0, %v12006_v29 }
 0x2be   : > { %7325 = vmatmul.mubr.f32.gmra.mrb[4].mxu1 %v10075_v3 }
 0x2bf   : > { %7327 = vmatprep.mubr.msk.f32.mxu1 %vm9235_vm0, %v12006_v29  ;;  %8421 = vmatpush3.bf16.msra.mxu1 %v9986_v21 }
 0x2c0   : > { %7358 = vmatprep.subr.mxu1 %v12006_v29 }
 0x2c2   : > { %7328 = vmatmul.mubr.f32.gmra.mrb[6].mxu1 %v10104_v13 }
 0x2c3   : > { %7330 = vmatprep.mubr.msk.f32.mxu1 %vm9235_vm0, %v12006_v29  ;;  %7359 = vmatpush3.msra.mxu1 %v10017_v8 }
 0x2c4   : > { %8422 = vmatprep.subr.bf16.mxu1 %v12007_v6 }
 0x2c6   : > { %7331 = vmatmul.mubr.f32.gmra.mrb[8].mxu1 %v10133_v59 }
 0x2c7   : > { %7333 = vmatprep.mubr.msk.f32.mxu1 %vm9235_vm0, %v12006_v29 }
 0x2ca   : > { %7334 = vmatmul.mubr.f32.gmra.mrb[10].mxu1 %v10162_v30 }
 0x2cb   : > { %7336 = vmatprep.mubr.msk.f32.mxu1 %vm9235_vm0, %v12006_v29 }
 0x2ce   : > { %7337 = vmatmul.mubr.f32.gmra.mrb[12].mxu1 %v10208_v0 }
 0x2cf   : > { %7339 = vmatprep.mubr.msk.f32.mxu1 %vm9235_vm0, %v12006_v29 }
 0x2d2   : > { %7340 = vmatmul.mubr.f32.gmra.mrb[14].mxu1 %v10218_v33 }
 0x2d3   : > { %7360 = vmatprep.mubr.msk.f32.mxu1 %vm9235_vm0, %v12006_v29 }
 0x2d6   : > { %7361 = vmatmul.mubr.f32.vlgmr.msra.gmra.mrb[16].mxu1 %v10254_v28 }
 0x2d7   : > { %8424 = vmatpush3.bf16.msra.mxu1 %v9675_v60  ;;  %7363 = vmatprep.mubr.msk.f32.mxu1 %vm9235_vm0, %v12006_v29 }
 0x2d8   : > { %8425 = vmatprep.subr.bf16.mxu1 %v12007_v6 }
 0x2da   : > { %7364 = vmatmul.mubr.f32.gmra.mrb[0].mxu1 %v9958_v63  ;;  %v12024_v63 = vand.u32 4294901760, %v9968_v51  ;;  %v6521_v51 = vld [vmem:[%s9332_s11 + $0x48] sm:$0xff] }
 0x2db   : > { %7366 = vmatprep.mubr.msk.f32.mxu1 %vm9235_vm0, %v12006_v29  ;;  %8427 = vmatpush3.bf16.msra.mxu1 %v9704_v7 }
 0x2dc   : > { %8428 = vmatprep.subr.bf16.mxu1 %v12007_v6  ;;  %v10371_v31 = vpack.c.bf16 %v12024_v63, %v12023_v55  ;;  %v10521_v55 = vand.u32 4294901760, %v3402_v22 }
 0x2de   : > { %7367 = vmatmul.mubr.f32.gmra.mrb[2].mxu1 %v10035_v42  ;;  %v3387_v42 = vsel %vm302_vm1, %v6521_v51, 0 }
 0x2df   : > { %7369 = vmatprep.mubr.msk.f32.mxu1 %vm9235_vm0, %v12006_v29  ;;  %8430 = vmatpush3.bf16.msra.mxu1 %v9738_v24 }
 0x2e0   : > { %8431 = vmatprep.subr.bf16.mxu1 %v12007_v6 }
 0x2e2   : > { %7370 = vmatmul.mubr.f32.gmra.mrb[4].mxu1 %v10078_v11  ;;  %v10458_v11 = vand.u32 4294901760, %v3387_v42 }
 0x2e3   : > { %7372 = vmatprep.mubr.msk.f32.mxu1 %vm9235_vm0, %v12006_v29  ;;  %8433 = vmatpush3.bf16.msra.mxu1 %v9759_v34 }
 0x2e4   : > { %7403 = vmatprep.subr.mxu1 %v12006_v29 }
 0x2e6   : > { %7373 = vmatmul.mubr.f32.gmra.mrb[6].mxu1 %v10107_v25  ;;  %v6523_v25 = vld [vmem:[%s9332_s11 + $0x58] sm:$0xff] }
 0x2e7   : > { %7375 = vmatprep.mubr.msk.f32.mxu1 %vm9235_vm0, %v12006_v29  ;;  %7404 = vmatpush3.msra.mxu1 %v9772_v41 }
 0x2e8   : > { %8434 = vmatprep.subr.bf16.mxu1 %v12007_v6 }
 0x2ea   : > { %7376 = vmatmul.mubr.f32.gmra.mrb[8].mxu1 %v10136_v48  ;;  %v10466_v48 = vsub.f32 %v3387_v42, %v10458_v11  ;;  %v10534_v42 = vsub.f32 %v3402_v22, %v10521_v55 }
 0x2eb   : > { %7378 = vmatprep.mubr.msk.f32.mxu1 %vm9235_vm0, %v12006_v29 }
 0x2ee   : > { %7379 = vmatmul.mubr.f32.gmra.mrb[10].mxu1 %v10165_v12  ;;  %v3393_v12 = vsel %vm302_vm1, %v6523_v25, 0 }
 0x2ef   : > { %7381 = vmatprep.mubr.msk.f32.mxu1 %vm9235_vm0, %v12006_v29 }
 0x2f2   : > { %7382 = vmatmul.mubr.f32.gmra.mrb[12].mxu1 %v10215_v16 }
 0x2f3   : > { %7384 = vmatprep.mubr.msk.f32.mxu1 %vm9235_vm0, %v12006_v29 }
 0x2f6   : > { %7385 = vmatmul.mubr.f32.gmra.mrb[14].mxu1 %v10223_v17  ;;  %v6525_v17 = vld [vmem:[%s9332_s11 + $0x68] sm:$0xff] }
 0x2f7   : > { %7405 = vmatprep.mubr.msk.f32.mxu1 %vm9235_vm0, %v12006_v29 }
 0x2fa   : > { %7406 = vmatmul.mubr.f32.vlgmr.msra.gmra.mrb[16].mxu1 %v1659_v47  ;;  %v3399_v47 = vsel %vm302_vm1, %v6525_v17, 0 }
 0x2fb   : > { %8436 = vmatpush3.bf16.msra.mxu1 %v10338_v43  ;;  %7408 = vmatprep.mubr.msk.f32.mxu1 %vm9235_vm0, %v12006_v29  ;;  %v10500_v58 = vand.u32 4294901760, %v3399_v47 }
 0x2fc   : > { %8437 = vmatprep.subr.bf16.mxu1 %v12007_v6 }
 0x2fd   : > { %v10515_v46 = vsub.f32 %v3399_v47, %v10500_v58 }
 0x2fe   : > { %7409 = vmatmul.mubr.f32.gmra.mrb[0].mxu1 %v12019_v38  ;;  %v6527_v38 = vld [vmem:[%s9332_s11 + $0x78] sm:$0xff] }
 0x2ff   : > { %7411 = vmatprep.mubr.msk.f32.mxu1 %vm9235_vm0, %v12006_v29  ;;  %8439 = vmatpush3.bf16.msra.mxu1 %v10347_v23  ;;  %v3405_v63 = vsel %vm302_vm1, %v6527_v38, 0 }
 0x300   : > { %8440 = vmatprep.subr.bf16.mxu1 %v12007_v6 }
 0x302   : > { %7412 = vmatmul.mubr.f32.gmra.mrb[2].mxu1 %v12022_v52 }
 0x303   : > { %7414 = vmatprep.mubr.msk.f32.mxu1 %vm9235_vm0, %v12006_v29  ;;  %8442 = vmatpush3.bf16.msra.mxu1 %v10359_v40 }
 0x304   : > { %8443 = vmatprep.subr.bf16.mxu1 %v12007_v6 }
 0x306   : > { %7415 = vmatmul.mubr.f32.gmra.mrb[4].mxu1 %v12025_v37  ;;  %v6528_v37 = vld [vmem:[%s9332_s11 + $0x80] sm:$0xff] }
 0x307   : > { %7417 = vmatprep.mubr.msk.f32.mxu1 %vm9235_vm0, %v12006_v29  ;;  %8445 = vmatpush3.bf16.msra.mxu1 %v10371_v31 }
 0x308   : > { %7448 = vmatprep.subr.mxu1 %v12006_v29 }
 0x30a   : > { %7418 = vmatmul.mubr.f32.gmra.mrb[6].mxu1 %v12026_v39  ;;  %v3524_v39 = vand.u32 4294901760, %v10515_v46 }
 0x30b   : > { %7420 = vmatprep.mubr.msk.f32.mxu1 %vm9235_vm0, %v12006_v29  ;;  %7449 = vmatpush3.msra.mxu1 %v10029_v27 }
 0x30c   : > { %8446 = vmatprep.subr.bf16.mxu1 %v12007_v6  ;;  %v3525_v25 = vsub.f32 %v10515_v46, %v3524_v39 }
 0x30e   : > { %7421 = vmatmul.mubr.f32.gmra.mrb[8].mxu1 %v12027_v49 }
 0x30f   : > { %7423 = vmatprep.mubr.msk.f32.mxu1 %vm9235_vm0, %v12006_v29 }
 0x312   : > { %7424 = vmatmul.mubr.f32.gmra.mrb[10].mxu1 %v1719_v45  ;;  %v3484_v45 = vand.u32 4294901760, %v10466_v48 }
 0x313   : > { %7426 = vmatprep.mubr.msk.f32.mxu1 %vm9235_vm0, %v12006_v29 }
 0x316   : > { %7427 = vmatmul.mubr.f32.gmra.mrb[12].mxu1 %v1729_v32  ;;  %v10480_v32 = vand.u32 4294901760, %v3393_v12 }
 0x317   : > { %7429 = vmatprep.mubr.msk.f32.mxu1 %vm9235_vm0, %v12006_v29 }
 0x31a   : > { %7430 = vmatmul.mubr.f32.gmra.mrb[14].mxu1 %v1739_v57  ;;  %v3485_v57 = vsub.f32 %v10466_v48, %v3484_v45 }
 0x31b   : > { %7450 = vmatprep.mubr.msk.f32.mxu1 %vm9235_vm0, %v12006_v29 }
 0x31c   : > { %v3486_v61 = vand.u32 4294901760, %v3485_v57  ;;  %v3526_v57 = vand.u32 4294901760, %v3525_v25 }
 0x31e   : > { %7451 = vmatmul.mubr.f32.vlgmr.msra.gmra.mrb[16].mxu1 %v10251_v5 }
 0x31f   : > { %8448 = vmatpush3.bf16.msra.mxu1 %v9675_v60  ;;  %7453 = vmatprep.mubr.msk.f32.mxu1 %vm9235_vm0, %v12006_v29 }
 0x320   : > { %8449 = vmatprep.subr.bf16.mxu1 %v12007_v6 }
 0x322   : > { %7454 = vmatmul.mubr.f32.gmra.mrb[0].mxu1 %v9945_v19 }
 0x323   : > { %7456 = vmatprep.mubr.msk.f32.mxu1 %vm9235_vm0, %v12006_v29  ;;  %8451 = vmatpush3.bf16.msra.mxu1 %v9704_v7 }
 0x324   : > { %8452 = vmatprep.subr.bf16.mxu1 %v12007_v6 }
 0x326   : > { %7457 = vmatmul.mubr.f32.gmra.mrb[2].mxu1 %v10031_v44 }
 0x327   : > { %7459 = vmatprep.mubr.msk.f32.mxu1 %vm9235_vm0, %v12006_v29  ;;  %8454 = vmatpush3.bf16.msra.mxu1 %v9738_v24 }
 0x328   : > { %8455 = vmatprep.subr.bf16.mxu1 %v12007_v6 }
 0x32a   : > { %7460 = vmatmul.mubr.f32.gmra.mrb[4].mxu1 %v10075_v3 }
 0x32b   : > { %7462 = vmatprep.mubr.msk.f32.mxu1 %vm9235_vm0, %v12006_v29  ;;  %8457 = vmatpush3.bf16.msra.mxu1 %v9759_v34 }
 0x32c   : > { %7493 = vmatprep.subr.mxu1 %v12006_v29 }
 0x32e   : > { %7463 = vmatmul.mubr.f32.gmra.mrb[6].mxu1 %v10104_v13 }
 0x32f   : > { %7465 = vmatprep.mubr.msk.f32.mxu1 %vm9235_vm0, %v12006_v29  ;;  %7494 = vmatpush3.msra.mxu1 %v9772_v41 }
 0x330   : > { %8458 = vmatprep.subr.bf16.mxu1 %v12007_v6 }
 0x332   : > { %7466 = vmatmul.mubr.f32.gmra.mrb[8].mxu1 %v10133_v59 }
 0x333   : > { %7468 = vmatprep.mubr.msk.f32.mxu1 %vm9235_vm0, %v12006_v29 }
 0x336   : > { %7469 = vmatmul.mubr.f32.gmra.mrb[10].mxu1 %v10162_v30 }
 0x337   : > { %7471 = vmatprep.mubr.msk.f32.mxu1 %vm9235_vm0, %v12006_v29 }
 0x33a   : > { %7472 = vmatmul.mubr.f32.gmra.mrb[12].mxu1 %v10208_v0 }
 0x33b   : > { %7474 = vmatprep.mubr.msk.f32.mxu1 %vm9235_vm0, %v12006_v29 }
 0x33e   : > { %7475 = vmatmul.mubr.f32.gmra.mrb[14].mxu1 %v10218_v33 }
 0x33f   : > { %7495 = vmatprep.mubr.msk.f32.mxu1 %vm9235_vm0, %v12006_v29 }
 0x342   : > { %7496 = vmatmul.mubr.f32.vlgmr.msra.gmra.mrb[16].mxu1 %v10251_v5  ;;  %v10492_v5 = vsub.f32 %v3393_v12, %v10480_v32 }
 0x343   : > { %8460 = vmatpush3.bf16.msra.mxu1 %v9306_v10  ;;  %7498 = vmatprep.mubr.msk.f32.mxu1 %vm9235_vm0, %v12006_v29 }
 0x344   : > { %8461 = vmatprep.subr.bf16.mxu1 %v12007_v6  ;;  %v3504_v36 = vand.u32 4294901760, %v10492_v5 }
 0x346   : > { %7499 = vmatmul.mubr.f32.gmra.mrb[0].mxu1 %v9945_v19  ;;  %v6522_v19 = vld [vmem:[%s9332_s11 + $0x50] sm:$0xff]  ;;  %v3505_v4 = vsub.f32 %v10492_v5, %v3504_v36 }
 0x347   : > { %7501 = vmatprep.mubr.msk.f32.mxu1 %vm9235_vm0, %v12006_v29  ;;  %8463 = vmatpush3.bf16.msra.mxu1 %v9317_v14 }
 0x348   : > { %8464 = vmatprep.subr.bf16.mxu1 %v12007_v6  ;;  %v3506_v49 = vand.u32 4294901760, %v3505_v4 }
 0x34a   : > { %7502 = vmatmul.mubr.f32.gmra.mrb[2].mxu1 %v10031_v44  ;;  %v3390_v44 = vsel %vm302_vm1, %v6522_v19, 0  ;;  %v3408_v19 = vsel %vm302_vm1, %v6528_v37, 0 }
 0x34b   : > { %7504 = vmatprep.mubr.msk.f32.mxu1 %vm9235_vm0, %v12006_v29  ;;  %v10551_v17 = vand.u32 4294901760, %v3408_v19 }
 0x34e   : > { %7505 = vmatmul.mubr.f32.gmra.mrb[4].mxu1 %v10075_v3  ;;  %v10469_v3 = vand.u32 4294901760, %v3390_v44 }
 0x34f   : > { %7507 = vmatprep.mubr.msk.f32.mxu1 %vm9235_vm0, %v12006_v29 }
 0x350   : > { %v10478_v16 = vsub.f32 %v3390_v44, %v10469_v3  ;;  %v6529_v44 = vld [vmem:[%s9332_s11 + $0x88] sm:$0x1] }
 0x352   : > { %7508 = vmatmul.mubr.f32.gmra.mrb[6].mxu1 %v10104_v13  ;;  %v6524_v13 = vld [vmem:[%s9332_s11 + $0x60] sm:$0xff] }
 0x353   : > { %7510 = vmatprep.mubr.msk.f32.mxu1 %vm9235_vm0, %v12006_v29 }
 0x356   : > { %7511 = vmatmul.mubr.f32.gmra.mrb[8].mxu1 %v10133_v59  ;;  %v3396_v59 = vsel %vm302_vm1, %v6524_v13, 0  ;;  %v3534_v13 = vand.u32 4294901760, %v10534_v42 }
 0x357   : > { %7513 = vmatprep.mubr.msk.f32.mxu1 %vm9235_vm0, %v12006_v29  ;;  %v10494_v28 = vand.u32 4294901760, %v3396_v59 }
 0x358   : > { %v3535_v47 = vsub.f32 %v10534_v42, %v3534_v13 }
 0x359   : > { %v10508_v26 = vsub.f32 %v3396_v59, %v10494_v28 }
 0x35a   : > { %7514 = vmatmul.mubr.f32.gmra.mrb[10].mxu1 %v10162_v30  ;;  %v3494_v30 = vand.u32 4294901760, %v10478_v16  ;;  %v3536_v22 = vand.u32 4294901760, %v3535_v47 }
 0x35b   : > { %7516 = vmatprep.mubr.msk.f32.mxu1 %vm9235_vm0, %v12006_v29  ;;  %v3514_v52 = vand.u32 4294901760, %v10508_v26 }
 0x35d   : > { %v3515_v51 = vsub.f32 %v10508_v26, %v3514_v52 }
 0x35e   : > { %7517 = vmatmul.mubr.f32.gmra.mrb[12].mxu1 %v10208_v0  ;;  %v3495_v0 = vsub.f32 %v10478_v16, %v3494_v30 }
 0x35f   : > { %7519 = vmatprep.mubr.msk.f32.mxu1 %vm9235_vm0, %v12006_v29  ;;  %v3516_v12 = vand.u32 4294901760, %v3515_v51 }
 0x362   : > { %7520 = vmatmul.mubr.f32.gmra.mrb[14].mxu1 %v10218_v33  ;;  %v3496_v33 = vand.u32 4294901760, %v3495_v0 }
 0x363   : > { %7704 = vmatprep.mubr.msk.f32.mxu1 %vm9235_vm0, %v12006_v29 }
 0x366   : > { %7705 = vmatmul.mubr.f32.vlgmr.msra.gmra.mrb[18].mxu1 %v3486_v61  ;;  %v10561_v61 = vsub.f32 %v3408_v19, %v10551_v17 }
 0x367   : > { %8466 = vmatpush3.bf16.msra.mxu1 %v9385_v53  ;;  %7707 = vmatprep.mubr.msk.f32.mxu1 %vm9235_vm0, %v12006_v29  ;;  %v10536_v53 = vand.u32 4294901760, %v3405_v63 }
 0x368   : > { %8467 = vmatprep.subr.bf16.mxu1 %v12007_v6 }
 0x369   : > { %v10549_v59 = vsub.f32 %v3405_v63, %v10536_v53 }
 0x36a   : > { %7708 = vmatmul.mubr.f32.gmra.mrb[20].mxu1 %v3496_v33  ;;  %v3554_v33 = vand.u32 4294901760, %v10561_v61 }
 0x36b   : > { %7710 = vmatprep.mubr.msk.f32.mxu1 %vm9235_vm0, %v12006_v29  ;;  %8469 = vmatpush3.bf16.msra.mxu1 %v9403_v1  ;;  %v3411_v1 = vsel %vm302_vm1, %v6529_v44, 0  ;;  %v3544_v9 = vand.u32 4294901760, %v10549_v59 }
 0x36c   : > { %8470 = vmatprep.subr.bf16.mxu1 %v12007_v6  ;;  %v10563_v0 = vand.u32 4294901760, %v3411_v1  ;;  %v3555_v37 = vsub.f32 %v10561_v61, %v3554_v33 }
 0x36d   : > { %v3545_v38 = vsub.f32 %v10549_v59, %v3544_v9 }
 0x36e   : > { %7711 = vmatmul.mubr.f32.gmra.mrb[22].mxu1 %v3506_v49  ;;  %v10572_v4 = vsub.f32 %v3411_v1, %v10563_v0  ;;  %v3556_v51 = vand.u32 4294901760, %v3555_v37  ;;  %v12028_v1 = vld [vmem:[#allocation3_spill] sm:$0xff] }
 0x36f   : > { %7713 = vmatprep.mubr.msk.f32.mxu1 %vm9235_vm0, %v12006_v29  ;;  %v3546_v63 = vand.u32 4294901760, %v3545_v38 }
 0x370   : > { %v3564_v49 = vand.u32 4294901760, %v10572_v4 }
 0x372   : > { %7714 = vmatmul.mubr.f32.gmra.mrb[24].mxu1 %v3516_v12  ;;  %v3565_v19 = vsub.f32 %v10572_v4, %v3564_v49 }
 0x373   : > { %7716 = vmatprep.mubr.msk.f32.mxu1 %vm9235_vm0, %v12006_v29 }
 0x374   : > { %v3566_v44 = vand.u32 4294901760, %v3565_v19 }
 0x376   : > { %7717 = vmatmul.mubr.f32.gmra.mrb[26].mxu1 %v3526_v57 }
 0x377   : > { %7719 = vmatprep.mubr.msk.f32.mxu1 %vm9235_vm0, %v12006_v29 }
 0x37a   : > { %7720 = vmatmul.mubr.f32.gmra.mrb[28].mxu1 %v3536_v22 }
 0x37b   : > { %7722 = vmatprep.mubr.msk.f32.mxu1 %vm9235_vm0, %v12006_v29 }
 0x37e   : > { %7723 = vmatmul.mubr.f32.gmra.mrb[30].mxu1 %v3546_v63 }
 0x37f   : > { %7725 = vmatprep.mubr.msk.f32.mxu1 %vm9235_vm0, %v12006_v29 }
 0x382   : > { %7726 = vmatmul.mubr.f32.gmra.mrb[32].mxu1 %v3556_v51 }
 0x383   : > { %7728 = vmatprep.mubr.msk.f32.mxu1 %vm9235_vm0, %v12006_v29 }
 0x386   : > { %7729 = vmatmul.mubr.f32.gmra.mrb[34].mxu1 %v3566_v44 }
 0x387   : > { %7739 = vmatprep.mubr.msk.f32.mxu1 %vm9235_vm0, %v12006_v29 }
 0x38a   : > { %7740 = vmatmul.mubr.f32.vlgmr.msra.gmra.mrb[18].mxu1 %v10458_v11 }
 0x38b   : > { %8472 = vmatpush3.bf16.msra.mxu1 %v9471_v50  ;;  %7742 = vmatprep.mubr.msk.f32.mxu1 %vm9235_vm0, %v12006_v29  ;;  %v10644_v50 = vld [vmem:[%s11962_s2] sm:$0xff] }
 0x38c   : > { %8473 = vmatprep.subr.bf16.mxu1 %v12007_v6 }
 0x38d   : > { %v10596_v25 = vpop.f32.mrb[18].mxu0 }
 0x38e   : > { %v7272_v12 = vpop.f32.mrb[19].mxu0  ;;  %7743 = vmatmul.mubr.f32.gmra.mrb[20].mxu1 %v10469_v3 }
 0x38f   : > { %7745 = vmatprep.mubr.msk.f32.mxu1 %vm9235_vm0, %v12006_v29  ;;  %8475 = vmatpush3.bf16.msra.mxu1 %v9479_v54  ;;  %v10649_v54 = vand.u32 4294901760, %v10644_v50 }
 0x390   : > { %8476 = vmatprep.subr.bf16.mxu1 %v12007_v6 }
 0x391   : > { %7523 = vmatpush3.msra.mxu0 %v10649_v54 }
 0x392   : > { %7746 = vmatmul.mubr.f32.gmra.mrb[22].mxu1 %v10480_v32  ;;  %7551 = vmatprep.subr.mxu0 %v12006_v29 }
 0x393   : > { %7748 = vmatprep.mubr.msk.f32.mxu1 %vm9235_vm0, %v12006_v29 }
 0x396   : > { %7749 = vmatmul.mubr.f32.gmra.mrb[24].mxu1 %v10494_v28 }
 0x397   : > { %7751 = vmatprep.mubr.msk.f32.mxu1 %vm9235_vm0, %v12006_v29 }
 0x39a   : > { %7752 = vmatmul.mubr.f32.gmra.mrb[26].mxu1 %v10500_v58 }
 0x39b   : > { %7754 = vmatprep.mubr.msk.f32.mxu1 %vm9235_vm0, %v12006_v29 }
 0x39e   : > { %7755 = vmatmul.mubr.f32.gmra.mrb[28].mxu1 %v10521_v55 }
 0x39f   : > { %7757 = vmatprep.mubr.msk.f32.mxu1 %vm9235_vm0, %v12006_v29 }
 0x3a2   : > { %7758 = vmatmul.mubr.f32.gmra.mrb[30].mxu1 %v10536_v53 }
 0x3a3   : > { %7760 = vmatprep.mubr.msk.f32.mxu1 %vm9235_vm0, %v12006_v29 }
 0x3a6   : > { %7761 = vmatmul.mubr.f32.gmra.mrb[32].mxu1 %v10551_v17 }
 0x3a7   : > { %7763 = vmatprep.mubr.msk.f32.mxu1 %vm9235_vm0, %v12006_v29 }
 0x3aa   : > { %7764 = vmatmul.mubr.f32.gmra.mrb[34].mxu1 %v10563_v0 }
 0x3ab   : > { %7774 = vmatprep.mubr.msk.f32.mxu1 %vm9235_vm0, %v12006_v29 }
 0x3ae   : > { %7775 = vmatmul.mubr.f32.vlgmr.msra.gmra.mrb[18].mxu1 %v10466_v48 }
 0x3af   : > { %8478 = vmatpush3.bf16.msra.mxu1 %v9306_v10  ;;  %7777 = vmatprep.mubr.msk.f32.mxu1 %vm9235_vm0, %v12006_v29 }
 0x3b0   : > { %8479 = vmatprep.subr.bf16.mxu1 %v12007_v6 }
 0x3b2   : > { %7778 = vmatmul.mubr.f32.gmra.mrb[20].mxu1 %v10478_v16 }
 0x3b3   : > { %7780 = vmatprep.mubr.msk.f32.mxu1 %vm9235_vm0, %v12006_v29  ;;  %8481 = vmatpush3.bf16.msra.mxu1 %v9317_v14 }
 0x3b4   : > { %8482 = vmatprep.subr.bf16.mxu1 %v12007_v6 }
 0x3b6   : > { %7781 = vmatmul.mubr.f32.gmra.mrb[22].mxu1 %v10492_v5 }
 0x3b7   : > { %7783 = vmatprep.mubr.msk.f32.mxu1 %vm9235_vm0, %v12006_v29 }
 0x3ba   : > { %7784 = vmatmul.mubr.f32.gmra.mrb[24].mxu1 %v10508_v26 }
 0x3bb   : > { %7786 = vmatprep.mubr.msk.f32.mxu1 %vm9235_vm0, %v12006_v29 }
 0x3be   : > { %7787 = vmatmul.mubr.f32.gmra.mrb[26].mxu1 %v10515_v46 }
 0x3bf   : > { %7789 = vmatprep.mubr.msk.f32.mxu1 %vm9235_vm0, %v12006_v29 }
 0x3c2   : > { %7790 = vmatmul.mubr.f32.gmra.mrb[28].mxu1 %v10534_v42 }
 0x3c3   : > { %7792 = vmatprep.mubr.msk.f32.mxu1 %vm9235_vm0, %v12006_v29 }
 0x3c6   : > { %7793 = vmatmul.mubr.f32.gmra.mrb[30].mxu1 %v10549_v59 }
 0x3c7   : > { %7795 = vmatprep.mubr.msk.f32.mxu1 %vm9235_vm0, %v12006_v29 }
 0x3ca   : > { %7796 = vmatmul.mubr.f32.gmra.mrb[32].mxu1 %v10561_v61 }
 0x3cb   : > { %7798 = vmatprep.mubr.msk.f32.mxu1 %vm9235_vm0, %v12006_v29 }
 0x3ce   : > { %7799 = vmatmul.mubr.f32.gmra.mrb[34].mxu1 %v10572_v4 }
 0x3cf   : > { %7809 = vmatprep.mubr.msk.f32.mxu1 %vm9235_vm0, %v12006_v29 }
 0x3d2   : > { %7810 = vmatmul.mubr.f32.vlgmr.msra.gmra.mrb[18].mxu1 %v3484_v45 }
 0x3d3   : > { %8484 = vmatpush3.bf16.msra.mxu1 %v9325_v18  ;;  %7812 = vmatprep.mubr.msk.f32.mxu1 %vm9235_vm0, %v12006_v29 }
 0x3d4   : > { %8485 = vmatprep.subr.bf16.mxu1 %v12007_v6 }
 0x3d6   : > { %7813 = vmatmul.mubr.f32.gmra.mrb[20].mxu1 %v3494_v30 }
 0x3d7   : > { %7815 = vmatprep.mubr.msk.f32.mxu1 %vm9235_vm0, %v12006_v29  ;;  %8487 = vmatpush3.bf16.msra.mxu1 %v12028_v1 }
 0x3d8   : > { %8488 = vmatprep.subr.bf16.mxu1 %v12007_v6 }
 0x3da   : > { %7816 = vmatmul.mubr.f32.gmra.mrb[22].mxu1 %v3504_v36 }
 0x3db   : > { %7818 = vmatprep.mubr.msk.f32.mxu1 %vm9235_vm0, %v12006_v29 }
 0x3de   : > { %7819 = vmatmul.mubr.f32.gmra.mrb[24].mxu1 %v3514_v52 }
 0x3df   : > { %7821 = vmatprep.mubr.msk.f32.mxu1 %vm9235_vm0, %v12006_v29 }
 0x3e2   : > { %7822 = vmatmul.mubr.f32.gmra.mrb[26].mxu1 %v3524_v39 }
 0x3e3   : > { %7824 = vmatprep.mubr.msk.f32.mxu1 %vm9235_vm0, %v12006_v29 }
 0x3e6   : > { %7825 = vmatmul.mubr.f32.gmra.mrb[28].mxu1 %v3534_v13 }
 0x3e7   : > { %7827 = vmatprep.mubr.msk.f32.mxu1 %vm9235_vm0, %v12006_v29 }
 0x3ea   : > { %7828 = vmatmul.mubr.f32.gmra.mrb[30].mxu1 %v3544_v9 }
 0x3eb   : > { %7830 = vmatprep.mubr.msk.f32.mxu1 %vm9235_vm0, %v12006_v29 }
 0x3ee   : > { %7831 = vmatmul.mubr.f32.gmra.mrb[32].mxu1 %v3554_v33 }
 0x3ef   : > { %7833 = vmatprep.mubr.msk.f32.mxu1 %vm9235_vm0, %v12006_v29 }
 0x3f2   : > { %7834 = vmatmul.mubr.f32.gmra.mrb[34].mxu1 %v3564_v49 }
 0x3f3   : > { %7844 = vmatprep.mubr.msk.f32.mxu1 %vm9235_vm0, %v12006_v29 }
 0x3f6   : > { %7845 = vmatmul.mubr.f32.vlgmr.msra.gmra.mrb[18].mxu1 %v10458_v11 }
 0x3f7   : > { %8490 = vmatpush3.bf16.msra.mxu1 %v9306_v10  ;;  %7847 = vmatprep.mubr.msk.f32.mxu1 %vm9235_vm0, %v12006_v29  ;;  %v10733_v10 = vld [vmem:[%s11964_s4] ss:$0 sm:$0xff] }
 0x3f8   : > { %8491 = vmatprep.subr.bf16.mxu1 %v12007_v6 }
 0x3fa   : > { %7848 = vmatmul.mubr.f32.gmra.mrb[20].mxu1 %v10469_v3 }
 0x3fb   : > { %7850 = vmatprep.mubr.msk.f32.mxu1 %vm9235_vm0, %v12006_v29  ;;  %8493 = vmatpush3.bf16.msra.mxu1 %v9317_v14  ;;  %v1664_v14 = vadd.f32 %v10733_v10, %v10596_v25 }
 0x3fc   : > { %8176 = vmatprep.subr.mxu1 %v12006_v29 }
 0x3fe   : > { %7851 = vmatmul.mubr.f32.gmra.mrb[22].mxu1 %v10480_v32 }
 0x3ff   : > { %7853 = vmatprep.mubr.msk.f32.mxu1 %vm9235_vm0, %v12006_v29 }
 0x402   : > { %7854 = vmatmul.mubr.f32.gmra.mrb[24].mxu1 %v10494_v28 }
 0x403   : > { %7856 = vmatprep.mubr.msk.f32.mxu1 %vm9235_vm0, %v12006_v29 }
 0x406   : > { %7857 = vmatmul.mubr.f32.gmra.mrb[26].mxu1 %v10500_v58 }
 0x407   : > { %7859 = vmatprep.mubr.msk.f32.mxu1 %vm9235_vm0, %v12006_v29 }
 0x40a   : > { %7860 = vmatmul.mubr.f32.gmra.mrb[28].mxu1 %v10521_v55 }
 0x40b   : > { %7862 = vmatprep.mubr.msk.f32.mxu1 %vm9235_vm0, %v12006_v29 }
 0x40e   : > { %7863 = vmatmul.mubr.f32.gmra.mrb[30].mxu1 %v10536_v53 }
 0x40f   : > { %7865 = vmatprep.mubr.msk.f32.mxu1 %vm9235_vm0, %v12006_v29 }
 0x412   : > { %7866 = vmatmul.mubr.f32.gmra.mrb[32].mxu1 %v10551_v17 }
 0x413   : > { %7868 = vmatprep.mubr.msk.f32.mxu1 %vm9235_vm0, %v12006_v29 }
 0x415   : > { %v2425_v18 = vpop.f32.mrb[16].mxu1 }
 0x416   : > { %v10740_v48 = vadd.f32 %v2425_v18, %v1664_v14  ;;  %v7497_v45 = vpop.f32.mrb[17].mxu1  ;;  %7869 = vmatmul.mubr.f32.gmra.mrb[34].mxu1 %v10563_v0 }
 0x417   : > { %7879 = vmatprep.mubr.msk.f32.mxu1 %vm9235_vm0, %v12006_v29 }
 0x418   : > { %v6512_v16 = vmul.f32 -1.702, %v10740_v48 }
 0x419   : > { %v2431_v30 = vpop.f32.mrb[0].mxu1 }
 0x41a   : > { %v2495_v5 = vmul.f32 1.442695, %v6512_v16  ;;  %v10747_v36 = vadd.f32 %v10733_v10, %v2431_v30  ;;  %v7500_v26 = vpop.f32.mrb[1].mxu1  ;;  %7880 = vmatmul.mubr.f32.vlgmr.msra.gmra.mrb[18].mxu1 %v10458_v11 }
 0x41b   : > { %7882 = vmatprep.mubr.msk.f32.mxu1 %vm9235_vm0, %v12006_v29  ;;  %8177 = vmatpush3.msra.mxu1 %v10649_v54 }
 0x41c   : > { %9153 = vpow2.f32 %v2495_v5  ;;  %v6513_v46 = vmul.f32 -1.702, %v10747_v36  ;;  %8205 = vmatprep.subr.mxu1 %v12006_v29 }
 0x41d   : > { %v2437_v52 = vpop.f32.mrb[2].mxu1 }
 0x41e   : > { %v2497_v39 = vmul.f32 1.442695, %v6513_v46  ;;  %v10756_v42 = vadd.f32 %v10733_v10, %v2437_v52  ;;  %v7503_v13 = vpop.f32.mrb[3].mxu1  ;;  %7883 = vmatmul.mubr.f32.gmra.mrb[20].mxu1 %v10469_v3 }
 0x41f   : > { %7885 = vmatprep.mubr.msk.f32.mxu1 %vm9235_vm0, %v12006_v29 }
 0x420   : > { %9155 = vpow2.f32 %v2497_v39  ;;  %v6514_v11 = vmul.f32 -1.702, %v10756_v42 }
 0x421   : > { %v2443_v59 = vpop.f32.mrb[4].mxu1 }
 0x422   : > { %v2499_v57 = vmul.f32 1.442695, %v6514_v11  ;;  %v10763_v47 = vadd.f32 %v10733_v10, %v2443_v59  ;;  %v7506_v9 = vpop.f32.mrb[5].mxu1  ;;  %7886 = vmatmul.mubr.f32.gmra.mrb[22].mxu1 %v10480_v32 }
 0x423   : > { %7888 = vmatprep.mubr.msk.f32.mxu1 %vm9235_vm0, %v12006_v29 }
 0x424   : > { %9157 = vpow2.f32 %v2499_v57  ;;  %v6515_v3 = vmul.f32 -1.702, %v10763_v47 }
 0x425   : > { %v2449_v61 = vpop.f32.mrb[6].mxu1 }
 0x426   : > { %v9154_v22 = vpop.eup %9153  ;;  %v2501_v38 = vmul.f32 1.442695, %v6515_v3  ;;  %v10770_v33 = vadd.f32 %v10733_v10, %v2449_v61  ;;  %v7509_v4 = vpop.f32.mrb[7].mxu1  ;;  %7889 = vmatmul.mubr.f32.gmra.mrb[24].mxu1 %v10494_v28 }
 0x427   : > { %v2513_v63 = vadd.f32 1.0, %v9154_v22  ;;  %7891 = vmatprep.mubr.msk.f32.mxu1 %vm9235_vm0, %v12006_v29 }
 0x428   : > { %9159 = vpow2.f32 %v2501_v38  ;;  %v6516_v32 = vmul.f32 -1.702, %v10770_v33 }
 0x429   : > { %9161 = vrcp.f32 %v2513_v63  ;;  %v2455_v37 = vpop.f32.mrb[8].mxu1 }
 0x42a   : > { %v9156_v49 = vpop.eup %9155  ;;  %v2503_v51 = vmul.f32 1.442695, %v6516_v32  ;;  %v10777_v19 = vadd.f32 %v10733_v10, %v2455_v37  ;;  %v7512_v44 = vpop.f32.mrb[9].mxu1  ;;  %7892 = vmatmul.mubr.f32.gmra.mrb[26].mxu1 %v10500_v58 }
 0x42b   : > { %v2514_v25 = vadd.f32 1.0, %v9156_v49  ;;  %7894 = vmatprep.mubr.msk.f32.mxu1 %vm9235_vm0, %v12006_v29 }
 0x42c   : > { %9163 = vpow2.f32 %v2503_v51  ;;  %v6517_v28 = vmul.f32 -1.702, %v10777_v19 }
 0x42d   : > { %9165 = vrcp.f32 %v2514_v25  ;;  %v2461_v12 = vpop.f32.mrb[10].mxu1 }
 0x42e   : > { %v9158_v1 = vpop.eup %9157  ;;  %v2505_v14 = vmul.f32 1.442695, %v6517_v28  ;;  %v10784_v18 = vadd.f32 %v10733_v10, %v2461_v12  ;;  %v7515_v45 = vpop.f32.mrb[11].mxu1  ;;  %7895 = vmatmul.mubr.f32.gmra.mrb[28].mxu1 %v10521_v55  ;;  %v10796_v55 = vsub.f32 %v10644_v50, %v10649_v54 }
 0x42f   : > { %v2515_v16 = vadd.f32 1.0, %v9158_v1  ;;  %7897 = vmatprep.mubr.msk.f32.mxu1 %vm9235_vm0, %v12006_v29 }
 0x430   : > { %9167 = vpow2.f32 %v2505_v14  ;;  %v6518_v58 = vmul.f32 -1.702, %v10784_v18  ;;  %v10808_v22 = vand.u32 4294901760, %v10796_v55 }
 0x431   : > { %9169 = vrcp.f32 %v2515_v16  ;;  %v2467_v30 = vpop.f32.mrb[12].mxu1 }
 0x432   : > { %v9160_v5 = vpop.eup %9159  ;;  %v2507_v26 = vmul.f32 1.442695, %v6518_v58  ;;  %v10791_v46 = vadd.f32 %v10733_v10, %v2467_v30  ;;  %v7518_v52 = vpop.f32.mrb[13].mxu1  ;;  %7898 = vmatmul.mubr.f32.gmra.mrb[30].mxu1 %v10536_v53  ;;  %v2736_v51 = vsub.f32 %v10796_v55, %v10808_v22 }
 0x433   : > { %v9162_v39 = vpop.eup %9161  ;;  %v2516_v13 = vadd.f32 1.0, %v9160_v5  ;;  %7900 = vmatprep.mubr.msk.f32.mxu1 %vm9235_vm0, %v12006_v29 }
 0x434   : > { %v2540_v11 = vmul.f32 %v9162_v39, %v10740_v48  ;;  %9171 = vpow2.f32 %v2507_v26  ;;  %v6519_v59 = vmul.f32 -1.702, %v10791_v46  ;;  %v10836_v16 = vand.u32 4294901760, %v2736_v51 }
 0x435   : > { %9173 = vrcp.f32 %v2516_v13  ;;  %v2473_v57 = vpop.f32.mrb[14].mxu1 }
 0x436   : > { %v9164_v9 = vpop.eup %9163  ;;  %v2550_v3 = vsel %vm1159_vm2, %v2540_v11, 0  ;;  %v2509_v53 = vmul.f32 1.442695, %v6519_v59  ;;  %v10804_v61 = vadd.f32 %v10733_v10, %v2473_v57  ;;  %v7521_v50 = vpop.f32.mrb[15].mxu1  ;;  %7901 = vmatmul.mubr.f32.gmra.mrb[32].mxu1 %v10551_v17 }
 0x437   : > { %v9166_v38 = vpop.eup %9165  ;;  %v10810_v48 = vand.u32 4294901760, %v2550_v3  ;;  %v2517_v4 = vadd.f32 1.0, %v9164_v9  ;;  %7903 = vmatprep.mubr.msk.f32.mxu1 %vm9235_vm0, %v12006_v29 }
 0x438   : > { %v2541_v63 = vmul.f32 %v9166_v38, %v10747_v36  ;;  %9175 = vpow2.f32 %v2509_v53  ;;  %v6520_v32 = vmul.f32 -1.702, %v10804_v61 }
 0x439   : > { %v10817_v10 = vsub.f32 %v2550_v3, %v10810_v48  ;;  %9177 = vrcp.f32 %v2517_v4 }
 0x43a   : > { %v9168_v17 = vpop.eup %9167  ;;  %v2553_v37 = vsel %vm1159_vm2, %v2541_v63, 0  ;;  %v2511_v49 = vmul.f32 1.442695, %v6520_v32  ;;  %7904 = vmatmul.mubr.f32.gmra.mrb[34].mxu1 %v10563_v0 }
 0x43b   : > { %v9170_v44 = vpop.eup %9169  ;;  %v10823_v25 = vand.u32 4294901760, %v2553_v37  ;;  %v2518_v36 = vadd.f32 1.0, %v9168_v17  ;;  %v2644_v28 = vand.u32 4294901760, %v10817_v10  ;;  %8178 = vmatprep.mubr.msk.f32.mxu1 %vm9235_vm0, %v12006_v29 }
 0x43c   : > { %v2542_v12 = vmul.f32 %v9170_v44, %v10756_v42  ;;  %9179 = vpow2.f32 %v2511_v49 }
 0x43d   : > { %v10830_v1 = vsub.f32 %v2553_v37, %v10823_v25  ;;  %9181 = vrcp.f32 %v2518_v36  ;;  %v2645_v0 = vsub.f32 %v10817_v10, %v2644_v28 }
 0x43e   : > { %v9172_v14 = vpop.eup %9171  ;;  %v2556_v45 = vsel %vm1159_vm2, %v2542_v12, 0 }
 0x43f   : > { %v9174_v58 = vpop.eup %9173  ;;  %v10838_v30 = vand.u32 4294901760, %v2556_v45  ;;  %v2519_v5 = vadd.f32 1.0, %v9172_v14  ;;  %v2646_v26 = vand.u32 4294901760, %v2645_v0  ;;  %v2654_v42 = vand.u32 4294901760, %v10830_v1 }
 0x440   : > { %v2543_v52 = vmul.f32 %v9174_v58, %v10763_v47 }
 0x441   : > { %v10843_v39 = vsub.f32 %v2556_v45, %v10838_v30  ;;  %9183 = vrcp.f32 %v2519_v5  ;;  %7525 = vmatmul.mubr.f32.vlgmr.msra.gmra.mrb[20].mxu0 %v2646_v26  ;;  %v2655_v13 = vsub.f32 %v10830_v1, %v2654_v42 }
 0x442   : > { %v9176_v11 = vpop.eup %9175  ;;  %v2559_v59 = vsel %vm1159_vm2, %v2543_v52, 0  ;;  %7527 = vmatprep.mubr.msk.f32.mxu0 %vm9235_vm0, %v12006_v29  ;;  %7552 = vmatpush3.msra.mxu0 %v10836_v16 }
 0x443   : > { %v9178_v57 = vpop.eup %9177  ;;  %v10852_v9 = vand.u32 4294901760, %v2559_v59  ;;  %v2520_v47 = vadd.f32 1.0, %v9176_v11  ;;  %v2656_v3 = vand.u32 4294901760, %v2655_v13  ;;  %v2664_v53 = vand.u32 4294901760, %v10843_v39  ;;  %7580 = vmatprep.subr.mxu0 %v12006_v29 }
 0x444   : > { %v2544_v50 = vmul.f32 %v9178_v57, %v10770_v33 }
 0x445   : > { %v10858_v38 = vsub.f32 %v2559_v59, %v10852_v9  ;;  %9185 = vrcp.f32 %v2520_v47  ;;  %7528 = vmatmul.mubr.f32.gmra.mrb[22].mxu0 %v2656_v3  ;;  %v2665_v4 = vsub.f32 %v10843_v39, %v2664_v53 }
 0x446   : > { %v9180_v63 = vpop.eup %9179  ;;  %v2562_v32 = vsel %vm1159_vm2, %v2544_v50, 0  ;;  %7530 = vmatprep.mubr.msk.f32.mxu0 %vm9235_vm0, %v12006_v29 }
 0x447   : > { %v9182_v17 = vpop.eup %9181  ;;  %v10866_v37 = vand.u32 4294901760, %v2562_v32  ;;  %v2521_v49 = vadd.f32 1.0, %v9180_v63  ;;  %v2666_v33 = vand.u32 4294901760, %v2665_v4  ;;  %v2674_v51 = vand.u32 4294901760, %v10858_v38 }
 0x448   : > { %v2545_v44 = vmul.f32 %v9182_v17, %v10777_v19 }
 0x449   : > { %v10871_v36 = vsub.f32 %v2562_v32, %v10866_v37  ;;  %9187 = vrcp.f32 %v2521_v49  ;;  %7531 = vmatmul.mubr.f32.gmra.mrb[24].mxu0 %v2666_v33  ;;  %v2675_v12 = vsub.f32 %v10858_v38, %v2674_v51 }
 0x44a   : > { %v2565_v0 = vsel %vm1159_vm2, %v2545_v44, 0  ;;  %7533 = vmatprep.mubr.msk.f32.mxu0 %vm9235_vm0, %v12006_v29 }
 0x44b   : > { %v9184_v14 = vpop.eup %9183  ;;  %v10879_v45 = vand.u32 4294901760, %v2565_v0  ;;  %v2676_v58 = vand.u32 4294901760, %v2675_v12  ;;  %v2684_v19 = vand.u32 4294901760, %v10871_v36 }
 0x44c   : > { %v2546_v5 = vmul.f32 %v9184_v14, %v10784_v18 }
 0x44d   : > { %v10884_v26 = vsub.f32 %v2565_v0, %v10879_v45  ;;  %7534 = vmatmul.mubr.f32.gmra.mrb[26].mxu0 %v2676_v58  ;;  %v2685_v52 = vsub.f32 %v10871_v36, %v2684_v19 }
 0x44e   : > { %v2568_v13 = vsel %vm1159_vm2, %v2546_v5, 0  ;;  %7536 = vmatprep.mubr.msk.f32.mxu0 %vm9235_vm0, %v12006_v29 }
 0x44f   : > { %v9186_v11 = vpop.eup %9185  ;;  %v10892_v59 = vand.u32 4294901760, %v2568_v13  ;;  %v2686_v57 = vand.u32 4294901760, %v2685_v52  ;;  %v2694_v47 = vand.u32 4294901760, %v10884_v26 }
 0x450   : > { %v2547_v18 = vmul.f32 %v9186_v11, %v10791_v46 }
 0x451   : > { %v10897_v3 = vsub.f32 %v2568_v13, %v10892_v59  ;;  %7537 = vmatmul.mubr.f32.gmra.mrb[28].mxu0 %v2686_v57  ;;  %v2695_v50 = vsub.f32 %v10884_v26, %v2694_v47 }
 0x452   : > { %v2571_v4 = vsel %vm1159_vm2, %v2547_v18, 0  ;;  %7539 = vmatprep.mubr.msk.f32.mxu0 %vm9235_vm0, %v12006_v29  ;;  %v4260_v18 = vld [vmem:[#allocation2 + $0x8] sm:$0xff] }
 0x453   : > { %v9188_v63 = vpop.eup %9187  ;;  %v10905_v32 = vand.u32 4294901760, %v2571_v4  ;;  %v2696_v17 = vand.u32 4294901760, %v2695_v50  ;;  %v2704_v49 = vand.u32 4294901760, %v10897_v3  ;;  %4299 = vrot.lane.b32.xlu0 %v4260_v18, %s9241_s16  ;;  %v4288_v50 = vld [vmem:[#allocation2 + $0x51] sm:$0xff] }
 0x454   : > { %v2548_v46 = vmul.f32 %v9188_v63, %v10804_v61  ;;  %4530 = vrot.lane.b32.xlu1 %v4288_v50, %s9238_s13 }
 0x455   : > { %v10910_v33 = vsub.f32 %v2571_v4, %v10905_v32  ;;  %7540 = vmatmul.mubr.f32.gmra.mrb[30].mxu0 %v2696_v17  ;;  %v2705_v44 = vsub.f32 %v10897_v3, %v2704_v49  ;;  %v4283_v4 = vld [vmem:[#allocation2 + $0x51] sm:$0x1] }
 0x456   : > { %v2574_v12 = vsel %vm1159_vm2, %v2548_v46, 0  ;;  %7542 = vmatprep.mubr.msk.f32.mxu0 %vm9235_vm0, %v12006_v29 }
 0x457   : > { %v10918_v0 = vand.u32 4294901760, %v2574_v12  ;;  %v2706_v14 = vand.u32 4294901760, %v2705_v44  ;;  %v2714_v58 = vand.u32 4294901760, %v10910_v33  ;;  %4445 = vrot.lane.b32.xlu0 %v4283_v4, %s9237_s12 }
 0x459   : > { %v10922_v61 = vsub.f32 %v2574_v12, %v10918_v0  ;;  %7543 = vmatmul.mubr.f32.gmra.mrb[32].mxu0 %v2706_v14  ;;  %v2715_v5 = vsub.f32 %v10910_v33, %v2714_v58 }
 0x45a   : > { %7545 = vmatprep.mubr.msk.f32.mxu0 %vm9235_vm0, %v12006_v29 }
 0x45b   : > { %v2716_v52 = vand.u32 4294901760, %v2715_v5  ;;  %v2724_v13 = vand.u32 4294901760, %v10922_v61 }
 0x45d   : > { %7546 = vmatmul.mubr.f32.gmra.mrb[34].mxu0 %v2716_v52  ;;  %v2725_v11 = vsub.f32 %v10922_v61, %v2724_v13 }
 0x45e   : > { %7548 = vmatprep.mubr.msk.f32.mxu0 %vm9235_vm0, %v12006_v29 }
 0x45f   : > { %v2726_v57 = vand.u32 4294901760, %v2725_v11 }
 0x461   : > { %7549 = vmatmul.mubr.f32.gmra.mrb[36].mxu0 %v2726_v57 }
 0x462   : > { %7553 = vmatprep.mubr.msk.f32.mxu0 %vm9235_vm0, %v12006_v29 }
 0x465   : > { %7554 = vmatmul.mubr.f32.vlgmr.msra.gmra.mrb[20].mxu0 %v10810_v48 }
 0x466   : > { %7556 = vmatprep.mubr.msk.f32.mxu0 %vm9235_vm0, %v12006_v29  ;;  %7581 = vmatpush3.msra.mxu0 %v10796_v55 }
 0x467   : > { %7609 = vmatprep.subr.mxu0 %v12006_v29 }
 0x469   : > { %7557 = vmatmul.mubr.f32.gmra.mrb[22].mxu0 %v10823_v25 }
 0x46a   : > { %7559 = vmatprep.mubr.msk.f32.mxu0 %vm9235_vm0, %v12006_v29 }
 0x46d   : > { %7560 = vmatmul.mubr.f32.gmra.mrb[24].mxu0 %v10838_v30 }
 0x46e   : > { %7562 = vmatprep.mubr.msk.f32.mxu0 %vm9235_vm0, %v12006_v29 }
 0x471   : > { %7563 = vmatmul.mubr.f32.gmra.mrb[26].mxu0 %v10852_v9 }
 0x472   : > { %7565 = vmatprep.mubr.msk.f32.mxu0 %vm9235_vm0, %v12006_v29 }
 0x475   : > { %7566 = vmatmul.mubr.f32.gmra.mrb[28].mxu0 %v10866_v37 }
 0x476   : > { %7568 = vmatprep.mubr.msk.f32.mxu0 %vm9235_vm0, %v12006_v29 }
 0x479   : > { %7569 = vmatmul.mubr.f32.gmra.mrb[30].mxu0 %v10879_v45 }
 0x47a   : > { %7571 = vmatprep.mubr.msk.f32.mxu0 %vm9235_vm0, %v12006_v29 }
 0x47d   : > { %7572 = vmatmul.mubr.f32.gmra.mrb[32].mxu0 %v10892_v59 }
 0x47e   : > { %7574 = vmatprep.mubr.msk.f32.mxu0 %vm9235_vm0, %v12006_v29 }
 0x481   : > { %7575 = vmatmul.mubr.f32.gmra.mrb[34].mxu0 %v10905_v32 }
 0x482   : > { %7577 = vmatprep.mubr.msk.f32.mxu0 %vm9235_vm0, %v12006_v29 }
 0x485   : > { %7578 = vmatmul.mubr.f32.gmra.mrb[36].mxu0 %v10918_v0 }
 0x486   : > { %7582 = vmatprep.mubr.msk.f32.mxu0 %vm9235_vm0, %v12006_v29 }
 0x489   : > { %7583 = vmatmul.mubr.f32.vlgmr.msra.gmra.mrb[20].mxu0 %v10817_v10 }
 0x48a   : > { %7585 = vmatprep.mubr.msk.f32.mxu0 %vm9235_vm0, %v12006_v29  ;;  %7610 = vmatpush3.msra.mxu0 %v10649_v54 }
 0x48b   : > { %7638 = vmatprep.subr.mxu0 %v12006_v29 }
 0x48d   : > { %7586 = vmatmul.mubr.f32.gmra.mrb[22].mxu0 %v10830_v1 }
 0x48e   : > { %7588 = vmatprep.mubr.msk.f32.mxu0 %vm9235_vm0, %v12006_v29 }
 0x491   : > { %7589 = vmatmul.mubr.f32.gmra.mrb[24].mxu0 %v10843_v39 }
 0x492   : > { %7591 = vmatprep.mubr.msk.f32.mxu0 %vm9235_vm0, %v12006_v29 }
 0x495   : > { %7592 = vmatmul.mubr.f32.gmra.mrb[26].mxu0 %v10858_v38 }
 0x496   : > { %7594 = vmatprep.mubr.msk.f32.mxu0 %vm9235_vm0, %v12006_v29 }
 0x499   : > { %7595 = vmatmul.mubr.f32.gmra.mrb[28].mxu0 %v10871_v36 }
 0x49a   : > { %7597 = vmatprep.mubr.msk.f32.mxu0 %vm9235_vm0, %v12006_v29 }
 0x49d   : > { %7598 = vmatmul.mubr.f32.gmra.mrb[30].mxu0 %v10884_v26 }
 0x49e   : > { %7600 = vmatprep.mubr.msk.f32.mxu0 %vm9235_vm0, %v12006_v29 }
 0x4a1   : > { %7601 = vmatmul.mubr.f32.gmra.mrb[32].mxu0 %v10897_v3 }
 0x4a2   : > { %7603 = vmatprep.mubr.msk.f32.mxu0 %vm9235_vm0, %v12006_v29 }
 0x4a5   : > { %7604 = vmatmul.mubr.f32.gmra.mrb[34].mxu0 %v10910_v33 }
 0x4a6   : > { %7606 = vmatprep.mubr.msk.f32.mxu0 %vm9235_vm0, %v12006_v29 }
 0x4a9   : > { %7607 = vmatmul.mubr.f32.gmra.mrb[36].mxu0 %v10922_v61 }
 0x4aa   : > { %7611 = vmatprep.mubr.msk.f32.mxu0 %vm9235_vm0, %v12006_v29 }
 0x4ad   : > { %7612 = vmatmul.mubr.f32.vlgmr.msra.gmra.mrb[20].mxu0 %v2644_v28 }
 0x4ae   : > { %7614 = vmatprep.mubr.msk.f32.mxu0 %vm9235_vm0, %v12006_v29  ;;  %7639 = vmatpush3.msra.mxu0 %v10808_v22 }
 0x4af   : > { %7667 = vmatprep.subr.mxu0 %v12006_v29 }
 0x4b1   : > { %7615 = vmatmul.mubr.f32.gmra.mrb[22].mxu0 %v2654_v42 }
 0x4b2   : > { %7617 = vmatprep.mubr.msk.f32.mxu0 %vm9235_vm0, %v12006_v29 }
 0x4b5   : > { %7618 = vmatmul.mubr.f32.gmra.mrb[24].mxu0 %v2664_v53 }
 0x4b6   : > { %7620 = vmatprep.mubr.msk.f32.mxu0 %vm9235_vm0, %v12006_v29 }
 0x4b9   : > { %7621 = vmatmul.mubr.f32.gmra.mrb[26].mxu0 %v2674_v51 }
 0x4ba   : > { %7623 = vmatprep.mubr.msk.f32.mxu0 %vm9235_vm0, %v12006_v29 }
 0x4bd   : > { %7624 = vmatmul.mubr.f32.gmra.mrb[28].mxu0 %v2684_v19 }
 0x4be   : > { %7626 = vmatprep.mubr.msk.f32.mxu0 %vm9235_vm0, %v12006_v29 }
 0x4c1   : > { %7627 = vmatmul.mubr.f32.gmra.mrb[30].mxu0 %v2694_v47 }
 0x4c2   : > { %7629 = vmatprep.mubr.msk.f32.mxu0 %vm9235_vm0, %v12006_v29 }
 0x4c5   : > { %7630 = vmatmul.mubr.f32.gmra.mrb[32].mxu0 %v2704_v49 }
 0x4c6   : > { %7632 = vmatprep.mubr.msk.f32.mxu0 %vm9235_vm0, %v12006_v29 }
 0x4c9   : > { %7633 = vmatmul.mubr.f32.gmra.mrb[34].mxu0 %v2714_v58 }
 0x4ca   : > { %7635 = vmatprep.mubr.msk.f32.mxu0 %vm9235_vm0, %v12006_v29 }
 0x4cd   : > { %7636 = vmatmul.mubr.f32.gmra.mrb[36].mxu0 %v2724_v13 }
 0x4ce   : > { %7640 = vmatprep.mubr.msk.f32.mxu0 %vm9235_vm0, %v12006_v29 }
 0x4d1   : > { %7641 = vmatmul.mubr.f32.vlgmr.msra.gmra.mrb[20].mxu0 %v10810_v48 }
 0x4d2   : > { %7643 = vmatprep.mubr.msk.f32.mxu0 %vm9235_vm0, %v12006_v29  ;;  %7668 = vmatpush3.msra.mxu0 %v10649_v54 }
 0x4d3   : > { %8494 = vmatprep.subr.bf16.mxu0 %v12007_v6 }
 0x4d5   : > { %7644 = vmatmul.mubr.f32.gmra.mrb[22].mxu0 %v10823_v25 }
 0x4d6   : > { %7646 = vmatprep.mubr.msk.f32.mxu0 %vm9235_vm0, %v12006_v29 }
 0x4d9   : > { %7647 = vmatmul.mubr.f32.gmra.mrb[24].mxu0 %v10838_v30 }
 0x4da   : > { %7649 = vmatprep.mubr.msk.f32.mxu0 %vm9235_vm0, %v12006_v29 }
 0x4dd   : > { %7650 = vmatmul.mubr.f32.gmra.mrb[26].mxu0 %v10852_v9 }
 0x4de   : > { %7652 = vmatprep.mubr.msk.f32.mxu0 %vm9235_vm0, %v12006_v29 }
 0x4e1   : > { %7653 = vmatmul.mubr.f32.gmra.mrb[28].mxu0 %v10866_v37 }
 0x4e2   : > { %7655 = vmatprep.mubr.msk.f32.mxu0 %vm9235_vm0, %v12006_v29 }
 0x4e5   : > { %7656 = vmatmul.mubr.f32.gmra.mrb[30].mxu0 %v10879_v45 }
 0x4e6   : > { %7658 = vmatprep.mubr.msk.f32.mxu0 %vm9235_vm0, %v12006_v29 }
 0x4e9   : > { %7659 = vmatmul.mubr.f32.gmra.mrb[32].mxu0 %v10892_v59 }
 0x4ea   : > { %7661 = vmatprep.mubr.msk.f32.mxu0 %vm9235_vm0, %v12006_v29 }
 0x4ed   : > { %7662 = vmatmul.mubr.f32.gmra.mrb[34].mxu0 %v10905_v32  ;;  %v4190_v10 = vpop.f32.mrb[18].mxu1 }
 0x4ee   : > { %4242 = vst.msk [vmem:[#allocation2 + $0x10] sm:$0xff] %vm1159_vm2, %v4190_v10  ;;  %v7881_v28 = vpop.f32.mrb[19].mxu1  ;;  %7664 = vmatprep.mubr.msk.f32.mxu0 %vm9235_vm0, %v12006_v29  ;;  %v4300_v10 = vpop.permute.xlu0 %4299 }
 0x4f1   : > { %7665 = vmatmul.mubr.f32.gmra.mrb[36].mxu0 %v10918_v0  ;;  %v4196_v1 = vpop.f32.mrb[20].mxu1 }
 0x4f2   : > { %4243 = vst.msk [vmem:[#allocation2 + $0x18] sm:$0xff] %vm1159_vm2, %v4196_v1  ;;  %v7884_v42 = vpop.f32.mrb[21].mxu1  ;;  %7669 = vmatprep.mubr.msk.f32.mxu0 %vm9235_vm0, %v12006_v29  ;;  %v11194_v1 = vpop.permute.xlu1 %4530 }
 0x4f3   : > { %v11196_v42 = vpop.permute.xlu0 %4445 }
 0x4f5   : > { %7670 = vmatmul.mubr.f32.vlgmr.msra.gmra.mrb[20].mxu0 %v10810_v48  ;;  %v4202_v39 = vpop.f32.mrb[22].mxu1  ;;  %v4269_v53 = vld [vmem:[#allocation2 + $0x9] sm:$0xff] }
 0x4f6   : > { %v11068_v38 = vld [vmem:[#allocation2 + $0xf] sm:$0xff]  ;;  %4244 = vst.msk [vmem:[#allocation2 + $0x20] sm:$0xff] %vm1159_vm2, %v4202_v39  ;;  %4335 = vrot.lane.b32.xlu1 %v4269_v53, %s9242_s17  ;;  %v7887_v51 = vpop.f32.mrb[23].mxu1  ;;  %7672 = vmatprep.mubr.msk.f32.mxu0 %vm9235_vm0, %v12006_v29 }
 0x4f7   : > { %4371 = vrot.lane.b32.xlu0 %v11068_v38, %s9243_s18  ;;  %8496 = vmatpush3.bf16.msra.mxu0 %v9675_v60  ;;  %v4261_v36 = vld [vmem:[#allocation2 + $0x10] sm:$0xff] }
 0x4f8   : > { %8497 = vmatprep.subr.bf16.mxu0 %v12007_v6 }
 0x4f9   : > { %7673 = vmatmul.mubr.f32.gmra.mrb[22].mxu0 %v10823_v25  ;;  %v4208_v48 = vpop.f32.mrb[24].mxu1  ;;  %v4270_v25 = vld [vmem:[#allocation2 + $0x11] sm:$0xff] }
 0x4fa   : > { %4245 = vst.msk [vmem:[#allocation2 + $0x28] sm:$0xff] %vm1159_vm2, %v4208_v48  ;;  %4400 = vrot.lane.b32.xlu1 %v4261_v36, %s9244_s24  ;;  %v7890_v19 = vpop.f32.mrb[25].mxu1  ;;  %7675 = vmatprep.mubr.msk.f32.mxu0 %vm9235_vm0, %v12006_v29  ;;  %v4262_v17 = vld [vmem:[#allocation2 + $0x18] sm:$0xff] }
 0x4fb   : > { %4301 = vrot.lane.b32.xlu0 %v4261_v36, %s9241_s16  ;;  %8499 = vmatpush3.bf16.msra.mxu0 %v9704_v7 }
 0x4fc   : > { %8500 = vmatprep.subr.bf16.mxu0 %v12007_v6 }
 0x4fd   : > { %7676 = vmatmul.mubr.f32.gmra.mrb[24].mxu0 %v10838_v30  ;;  %v4214_v26 = vpop.f32.mrb[26].mxu1  ;;  %v11095_v30 = vld [vmem:[#allocation2 + $0x17] sm:$0xff]  ;;  %v11127_v12 = vld [vmem:[#allocation2 + $0x1f] sm:$0xff] }
 0x4fe   : > { %4246 = vst.msk [vmem:[#allocation2 + $0x30] sm:$0xff] %vm1159_vm2, %v4214_v26  ;;  %4429 = vrot.lane.b32.xlu1 %v4270_v25, %s9237_s12  ;;  %v7893_v47 = vpop.f32.mrb[27].mxu1  ;;  %7678 = vmatprep.mubr.msk.f32.mxu0 %vm9235_vm0, %v12006_v29 }
 0x4ff   : > { %4337 = vrot.lane.b32.xlu0 %v4270_v25, %s9242_s17  ;;  %8502 = vmatpush3.bf16.msra.mxu0 %v9738_v24 }
 0x500   : > { %8503 = vmatprep.subr.bf16.mxu0 %v12007_v6 }
 0x501   : > { %7679 = vmatmul.mubr.f32.gmra.mrb[26].mxu0 %v10852_v9  ;;  %v4220_v3 = vpop.f32.mrb[28].mxu1  ;;  %v11144_v14 = vld [vmem:[#allocation2 + $0x27] sm:$0xff] }
 0x502   : > { %4247 = vst.msk [vmem:[#allocation2 + $0x38] sm:$0xff] %vm1159_vm2, %v4220_v3  ;;  %4458 = vrot.lane.b32.xlu1 %v11095_v30, %s9240_s15  ;;  %v7896_v63 = vpop.f32.mrb[29].mxu1  ;;  %7681 = vmatprep.mubr.msk.f32.mxu0 %vm9235_vm0, %v12006_v29 }
 0x503   : > { %4373 = vrot.lane.b32.xlu0 %v11095_v30, %s9243_s18  ;;  %8505 = vmatpush3.bf16.msra.mxu0 %v9759_v34  ;;  %v4251_v63 = vld [vmem:[#allocation2 + $0x7] sm:$0xff] }
 0x504   : > { %7922 = vmatprep.subr.mxu0 %v12006_v29 }
 0x505   : > { %7682 = vmatmul.mubr.f32.gmra.mrb[28].mxu0 %v10866_v37  ;;  %v4226_v9 = vpop.f32.mrb[30].mxu1  ;;  %v4271_v37 = vld [vmem:[#allocation2 + $0x19] sm:$0xff]  ;;  %v4273_v58 = vld [vmem:[#allocation2 + $0x29] sm:$0xff] }
 0x506   : > { %4248 = vst.msk [vmem:[#allocation2 + $0x40] sm:$0xff] %vm1159_vm2, %v4226_v9  ;;  %4487 = vrot.lane.b32.xlu1 %v4262_v17, %s9239_s14  ;;  %v7899_v49 = vpop.f32.mrb[31].mxu1  ;;  %7684 = vmatprep.mubr.msk.f32.mxu0 %vm9235_vm0, %v12006_v29  ;;  %v11156_v61 = vld [vmem:[#allocation2 + $0x2f] sm:$0xff] }
 0x507   : > { %4402 = vrot.lane.b32.xlu0 %v4262_v17, %s9244_s24  ;;  %7923 = vmatpush3.msra.mxu0 %v9772_v41  ;;  %v4265_v5 = vld [vmem:[#allocation2 + $0x30] sm:$0xff]  ;;  %v4543_v49 = vsel %vm1159_vm2, %v4251_v63, %v4300_v10 }
 0x508   : > { %8506 = vmatprep.subr.bf16.mxu0 %v12007_v6 }
 0x509   : > { %7685 = vmatmul.mubr.f32.gmra.mrb[30].mxu0 %v10879_v45  ;;  %v4232_v46 = vpop.f32.mrb[32].mxu1  ;;  %v4274_v52 = vld [vmem:[#allocation2 + $0x31] sm:$0xff] }
 0x50a   : > { %4249 = vst.msk [vmem:[#allocation2 + $0x48] sm:$0xff] %vm1159_vm2, %v4232_v46  ;;  %4516 = vrot.lane.b32.xlu1 %v4271_v37, %s9238_s13  ;;  %v7902_v33 = vpop.f32.mrb[33].mxu1  ;;  %7687 = vmatprep.mubr.msk.f32.mxu0 %vm9235_vm0, %v12006_v29  ;;  %v11168_v13 = vld [vmem:[#allocation2 + $0x37] sm:$0xff] }
 0x50b   : > { %4303 = vrot.lane.b32.xlu0 %v4262_v17, %s9241_s16  ;;  %v4266_v11 = vld [vmem:[#allocation2 + $0x38] sm:$0xff] }
 0x50d   : > { %7688 = vmatmul.mubr.f32.gmra.mrb[32].mxu0 %v10892_v59  ;;  %v4238_v44 = vpop.f32.mrb[34].mxu1  ;;  %v4263_v59 = vld [vmem:[#allocation2 + $0x20] sm:$0xff] }
 0x50e   : > { %4250 = vst.msk [vmem:[#allocation2 + $0x50] sm:$0x1] %vm1168_vm3, %v4238_v44  ;;  %4431 = vrot.lane.b32.xlu1 %v4271_v37, %s9237_s12  ;;  %v7905_v45 = vpop.f32.mrb[35].mxu1  ;;  %7690 = vmatprep.mubr.msk.f32.mxu0 %vm9235_vm0, %v12006_v29  ;;  %v4275_v57 = vld [vmem:[#allocation2 + $0x39] sm:$0xff] }
 0x50f   : > { %4339 = vrot.lane.b32.xlu0 %v4271_v37, %s9242_s17  ;;  %v11180_v18 = vld [vmem:[#allocation2 + $0x3f] sm:$0xff] }
 0x510   : > { %v4267_v50 = vld [vmem:[#allocation2 + $0x40] sm:$0xff] }
 0x511   : > { %7691 = vmatmul.mubr.f32.gmra.mrb[34].mxu0 %v10905_v32  ;;  %v4272_v32 = vld [vmem:[#allocation2 + $0x21] sm:$0xff]  ;;  %v4277_v25 = vld [vmem:[#allocation2 + $0x49] sm:$0x1]  ;;  %v4279_v9 = vld [vmem:[#allocation2 + $0x4f] sm:$0x1] }
 0x512   : > { %4460 = vrot.lane.b32.xlu1 %v11127_v12, %s9240_s15  ;;  %7693 = vmatprep.mubr.msk.f32.mxu0 %vm9235_vm0, %v12006_v29  ;;  %v4276_v4 = vld [vmem:[#allocation2 + $0x41] sm:$0xff] }
 0x513   : > { %4375 = vrot.lane.b32.xlu0 %v11127_v12, %s9243_s18  ;;  %v4278_v28 = vld [vmem:[#allocation2 + $0x47] sm:$0xff] }
 0x514   : > { %v4280_v39 = vld [vmem:[#allocation2 + $0x48] sm:$0xff] }
 0x515   : > { %7694 = vmatmul.mubr.f32.gmra.mrb[36].mxu0 %v10918_v0  ;;  %v4264_v0 = vld [vmem:[#allocation2 + $0x28] sm:$0xff]  ;;  %v4286_v44 = vld [vmem:[#allocation2 + $0x50] sm:$0xff] }
 0x516   : > { %4489 = vrot.lane.b32.xlu1 %v4263_v59, %s9239_s14  ;;  %7924 = vmatprep.mubr.msk.f32.mxu0 %vm9235_vm0, %v12006_v29  ;;  %v4268_v48 = vld [vmem:[#allocation2 + $0x48] sm:$0x1]  ;;  %v4282_v36 = vld [vmem:[#allocation2 + $0x49] sm:$0xff] }
 0x517   : > { %4404 = vrot.lane.b32.xlu0 %v4263_v59, %s9244_s24  ;;  %v4284_v17 = vld [vmem:[#allocation2 + $0x4f] sm:$0xff] }
 0x518   : > { %v4281_v45 = vld [vmem:[#allocation2 + $0x50] sm:$0x1] }
 0x51a   : > { %4518 = vrot.lane.b32.xlu1 %v4272_v32, %s9238_s13 }
 0x51b   : > { %4305 = vrot.lane.b32.xlu0 %v4263_v59, %s9241_s16  ;;  %v4285_v59 = vld [vmem:[#allocation2 + $0x57] sm:$0x1] }
 0x51e   : > { %4433 = vrot.lane.b32.xlu1 %v4272_v32, %s9237_s12 }
 0x51f   : > { %4341 = vrot.lane.b32.xlu0 %v4272_v32, %s9242_s17  ;;  %v4287_v32 = vld [vmem:[#allocation2 + $0x58] sm:$0x1] }
 0x522   : > { %4462 = vrot.lane.b32.xlu1 %v11144_v14, %s9240_s15 }
 0x523   : > { %4377 = vrot.lane.b32.xlu0 %v11144_v14, %s9243_s18 }
 0x526   : > { %4491 = vrot.lane.b32.xlu1 %v4264_v0, %s9239_s14 }
 0x527   : > { %4406 = vrot.lane.b32.xlu0 %v4264_v0, %s9244_s24 }
 0x52a   : > { %4520 = vrot.lane.b32.xlu1 %v4273_v58, %s9238_s13 }
 0x52b   : > { %4307 = vrot.lane.b32.xlu0 %v4264_v0, %s9241_s16 }
 0x52e   : > { %4435 = vrot.lane.b32.xlu1 %v4273_v58, %s9237_s12 }
 0x52f   : > { %4343 = vrot.lane.b32.xlu0 %v4273_v58, %s9242_s17 }
 0x532   : > { %4464 = vrot.lane.b32.xlu1 %v11156_v61, %s9240_s15 }
 0x533   : > { %4379 = vrot.lane.b32.xlu0 %v11156_v61, %s9243_s18 }
 0x536   : > { %4493 = vrot.lane.b32.xlu1 %v4265_v5, %s9239_s14 }
 0x537   : > { %4408 = vrot.lane.b32.xlu0 %v4265_v5, %s9244_s24 }
 0x53a   : > { %4522 = vrot.lane.b32.xlu1 %v4274_v52, %s9238_s13 }
 0x53b   : > { %4309 = vrot.lane.b32.xlu0 %v4265_v5, %s9241_s16 }
 0x53e   : > { %4437 = vrot.lane.b32.xlu1 %v4274_v52, %s9237_s12 }
 0x53f   : > { %4345 = vrot.lane.b32.xlu0 %v4274_v52, %s9242_s17 }
 0x542   : > { %4466 = vrot.lane.b32.xlu1 %v11168_v13, %s9240_s15 }
 0x543   : > { %4381 = vrot.lane.b32.xlu0 %v11168_v13, %s9243_s18 }
 0x546   : > { %4495 = vrot.lane.b32.xlu1 %v4266_v11, %s9239_s14 }
 0x547   : > { %4410 = vrot.lane.b32.xlu0 %v4266_v11, %s9244_s24 }
 0x54a   : > { %4524 = vrot.lane.b32.xlu1 %v4275_v57, %s9238_s13 }
 0x54b   : > { %4311 = vrot.lane.b32.xlu0 %v4266_v11, %s9241_s16 }
 0x54e   : > { %4439 = vrot.lane.b32.xlu1 %v4275_v57, %s9237_s12 }
 0x54f   : > { %4347 = vrot.lane.b32.xlu0 %v4275_v57, %s9242_s17 }
 0x552   : > { %4468 = vrot.lane.b32.xlu1 %v11180_v18, %s9240_s15 }
 0x553   : > { %4383 = vrot.lane.b32.xlu0 %v11180_v18, %s9243_s18 }
 0x556   : > { %4497 = vrot.lane.b32.xlu1 %v4267_v50, %s9239_s14 }
 0x557   : > { %4412 = vrot.lane.b32.xlu0 %v4267_v50, %s9244_s24 }
 0x55a   : > { %4526 = vrot.lane.b32.xlu1 %v4276_v4, %s9238_s13 }
 0x55b   : > { %4313 = vrot.lane.b32.xlu0 %v4267_v50, %s9241_s16  ;;  %v4289_v50 = vld [vmem:[#allocation2 + $0x59] sm:$0x1] }
 0x55e   : > { %4441 = vrot.lane.b32.xlu1 %v4276_v4, %s9237_s12 }
 0x55f   : > { %4349 = vrot.lane.b32.xlu0 %v4276_v4, %s9242_s17 }
 0x562   : > { %4470 = vrot.lane.b32.xlu1 %v4278_v28, %s9240_s15 }
 0x563   : > { %4385 = vrot.lane.b32.xlu0 %v4278_v28, %s9243_s18 }
 0x566   : > { %4499 = vrot.lane.b32.xlu1 %v4280_v39, %s9239_s14 }
 0x567   : > { %4414 = vrot.lane.b32.xlu0 %v4280_v39, %s9244_s24 }
 0x568   : > { %v4336_v53 = vpop.permute.xlu1 %4335 }
 0x569   : > { %v4372_v51 = vpop.permute.xlu0 %4371  ;;  %v4552_v33 = vsel %vm1471_vm4, %v4543_v49, %v4336_v53 }
 0x56a   : > { %4528 = vrot.lane.b32.xlu1 %v4282_v36, %s9238_s13  ;;  %v4561_v0 = vsel %vm1481_vm5, %v4552_v33, %v4372_v51 }
 0x56b   : > { %4315 = vrot.lane.b32.xlu0 %v4268_v48, %s9241_s16 }
 0x56c   : > { %v4401_v19 = vpop.permute.xlu1 %4400 }
 0x56d   : > { %v4302_v26 = vpop.permute.xlu0 %4301  ;;  %v4570_v52 = vsel %vm302_vm1, %v4561_v0, %v4401_v19 }
 0x56e   : > { %4443 = vrot.lane.b32.xlu1 %v4282_v36, %s9237_s12 }
 0x56f   : > { %4351 = vrot.lane.b32.xlu0 %v4277_v25, %s9242_s17 }
 0x570   : > { %v4430_v47 = vpop.permute.xlu1 %4429 }
 0x571   : > { %v4338_v3 = vpop.permute.xlu0 %4337  ;;  %v4579_v11 = vsel %vm1500_vm6, %v4570_v52, %v4430_v47 }
 0x572   : > { %4472 = vrot.lane.b32.xlu1 %v4284_v17, %s9240_s15  ;;  %v4544_v17 = vsel %vm1159_vm2, %v11068_v38, %v4302_v26  ;;  %v12029_v38 = vld [vmem:[#allocation5_spill] sm:$0xff] }
 0x573   : > { %4387 = vrot.lane.b32.xlu0 %v4279_v9, %s9243_s18  ;;  %v4553_v49 = vsel %vm1471_vm4, %v4544_v17, %v4338_v3 }
 0x574   : > { %v4459_v46 = vpop.permute.xlu1 %4458 }
 0x575   : > { %v4374_v37 = vpop.permute.xlu0 %4373  ;;  %v4588_v57 = vsel %vm1510_vm7, %v4579_v11, %v4459_v46 }
 0x576   : > { %4501 = vrot.lane.b32.xlu1 %v4286_v44, %s9239_s14  ;;  %v4562_v46 = vsel %vm1481_vm5, %v4553_v49, %v4374_v37 }
 0x577   : > { %4416 = vrot.lane.b32.xlu0 %v4281_v45, %s9244_s24 }
 0x578   : > { %v4488_v58 = vpop.permute.xlu1 %4487 }
 0x579   : > { %v4403_v5 = vpop.permute.xlu0 %4402  ;;  %v4597_v4 = vsel %vm1520_vm8, %v4588_v57, %v4488_v58  ;;  %v12031_v57 = vld [vmem:[#allocation7_spill] sm:$0xff] }
 0x57a   : > { %4474 = vrot.lane.b32.xlu1 %v4285_v59, %s9240_s15  ;;  %v4571_v59 = vsel %vm302_vm1, %v4562_v46, %v4403_v5  ;;  %v12033_v46 = vld [vmem:[#allocation9_spill] sm:$0xff] }
 0x57b   : > { %4503 = vrot.lane.b32.xlu0 %v4287_v32, %s9239_s14  ;;  %s11341_s14 = scalar_lea.vmem %s11966_s6, %s9133_s8 }
 0x57c   : > { %v4517_v10 = vpop.permute.xlu1 %4516 }
 0x57d   : > { %v4304_v28 = vpop.permute.xlu0 %4303  ;;  %v4606_v39 = vsel %vm1530_vm9, %v4597_v4, %v4517_v10 }
 0x57e   : > { %v4615_v53 = vsel %vm284_vm14, %v4606_v39, 0.0  ;;  %4532 = vrot.lane.b32.xlu1 %v4289_v50, %s9238_s13  ;;  %v4545_v17 = vsel %vm1159_vm2, %v11095_v30, %v4304_v28  ;;  %v12034_v28 = vld [vmem:[#allocation10_spill] sm:$0xff] }
 0x57f   : > { %v4625_v51 = vsel %vm1555_vm11, %v4615_v53, 0  ;;  %v12032_v53 = vld [vmem:[#allocation8_spill] sm:$0xff] }
 0x580   : > { %v11222_v48 = vand.u32 4294901760, %v4625_v51  ;;  %v4432_v36 = vpop.permute.xlu1 %4431 }
 0x581   : > { %v4340_v19 = vpop.permute.xlu0 %4339  ;;  %v4580_v32 = vsel %vm1500_vm6, %v4571_v59, %v4432_v36 }
 0x582   : > { %v11225_v25 = vsub.f32 %v4625_v51, %v11222_v48  ;;  %v4554_v49 = vsel %vm1471_vm4, %v4545_v17, %v4340_v19 }
 0x584   : > { %v4727_v47 = vand.u32 4294901760, %v11225_v25  ;;  %v4461_v63 = vpop.permute.xlu1 %4460 }
 0x585   : > { %v4376_v9 = vpop.permute.xlu0 %4375  ;;  %v4589_v0 = vsel %vm1510_vm7, %v4580_v32, %v4461_v63 }
 0x586   : > { %v4728_v35 = vsub.f32 %v11225_v25, %v4727_v47 }
 0x588   : > { %v4729_v33 = vand.u32 4294901760, %v4728_v35  ;;  %v4490_v44 = vpop.permute.xlu1 %4489 }
 0x589   : > { %v4405_v45 = vpop.permute.xlu0 %4404  ;;  %v4598_v26 = vsel %vm1520_vm8, %v4589_v0, %v4490_v44 }
 0x58a   : > { %7925 = vmatmul.mubr.f32.vlgmr.msra.gmra.mrb[38].mxu0 %v4729_v33  ;;  %v4563_v33 = vsel %vm1481_vm5, %v4554_v49, %v4376_v9 }
 0x58b   : > { %7927 = vmatprep.mubr.msk.f32.mxu0 %vm9235_vm0, %v12006_v29  ;;  %8508 = vmatpush3.bf16.msra.mxu0 %v12029_v38  ;;  %v4572_v0 = vsel %vm302_vm1, %v4563_v33, %v4405_v45 }
 0x58c   : > { %v4519_v3 = vpop.permute.xlu1 %4518  ;;  %8509 = vmatprep.subr.bf16.mxu0 %v12007_v6 }
 0x58d   : > { %v4306_v58 = vpop.permute.xlu0 %4305  ;;  %v4607_v37 = vsel %vm1530_vm9, %v4598_v26, %v4519_v3 }
 0x58e   : > { %v4616_v5 = vsel %vm285_vm10, %v4607_v37, 0.0 }
 0x58f   : > { %v4628_v11 = vsel %vm1555_vm11, %v4616_v5, 0  ;;  %8511 = vmatpush3.bf16.msra.mxu0 %v12031_v57 }
 0x590   : > { %v11248_v50 = vand.u32 4294901760, %v4628_v11  ;;  %v4434_v4 = vpop.permute.xlu1 %4433  ;;  %8512 = vmatprep.subr.bf16.mxu0 %v12007_v6 }
 0x591   : > { %v4342_v10 = vpop.permute.xlu0 %4341  ;;  %v4581_v38 = vsel %vm1500_vm6, %v4572_v0, %v4434_v4 }
 0x592   : > { %v11252_v39 = vsub.f32 %v4628_v11, %v11248_v50 }
 0x593   : > { %8514 = vmatpush3.bf16.msra.mxu0 %v12032_v53 }
 0x594   : > { %v4463_v51 = vpop.permute.xlu1 %4462  ;;  %v4737_v63 = vand.u32 4294901760, %v11252_v39  ;;  %8515 = vmatprep.subr.bf16.mxu0 %v12007_v6 }
 0x595   : > { %v4378_v36 = vpop.permute.xlu0 %4377  ;;  %v4590_v30 = vsel %vm1510_vm7, %v4581_v38, %v4463_v51 }
 0x596   : > { %v4738_v35 = vsub.f32 %v11252_v39, %v4737_v63 }
 0x597   : > { %8517 = vmatpush3.bf16.msra.mxu0 %v12033_v46 }
 0x598   : > { %v4492_v44 = vpop.permute.xlu1 %4491  ;;  %v4739_v32 = vand.u32 4294901760, %v4738_v35  ;;  %7967 = vmatprep.subr.mxu0 %v12006_v29  ;;  %v4546_v35 = vsel %vm1159_vm2, %v11127_v12, %v4306_v58 }
 0x599   : > { %v4407_v59 = vpop.permute.xlu0 %4406  ;;  %v4599_v19 = vsel %vm1520_vm8, %v4590_v30, %v4492_v44  ;;  %v4555_v46 = vsel %vm1471_vm4, %v4546_v35, %v4342_v10 }
 0x59a   : > { %7928 = vmatmul.mubr.f32.gmra.mrb[40].mxu0 %v4739_v32  ;;  %v4564_v33 = vsel %vm1481_vm5, %v4555_v46, %v4378_v36 }
 0x59b   : > { %7930 = vmatprep.mubr.msk.f32.mxu0 %vm9235_vm0, %v12006_v29  ;;  %7968 = vmatpush3.msra.mxu0 %v12034_v28  ;;  %v4573_v38 = vsel %vm302_vm1, %v4564_v33, %v4407_v59 }
 0x59c   : > { %v4521_v9 = vpop.permute.xlu1 %4520  ;;  %8518 = vmatprep.subr.bf16.mxu0 %v12007_v6 }
 0x59d   : > { %v4308_v26 = vpop.permute.xlu0 %4307  ;;  %v4608_v3 = vsel %vm1530_vm9, %v4599_v19, %v4521_v9 }
 0x59e   : > { %v4617_v45 = vsel %vm286_vm12, %v4608_v3, 0.0 }
 0x59f   : > { %v4631_v52 = vsel %vm1555_vm11, %v4617_v45, 0 }
 0x5a0   : > { %v11278_v5 = vand.u32 4294901760, %v4631_v52  ;;  %v4436_v11 = vpop.permute.xlu1 %4435 }
 0x5a1   : > { %v4344_v57 = vpop.permute.xlu0 %4343  ;;  %v4582_v30 = vsel %vm1500_vm6, %v4573_v38, %v4436_v11 }
 0x5a2   : > { %v11281_v4 = vsub.f32 %v4631_v52, %v11278_v5 }
 0x5a4   : > { %v4465_v53 = vpop.permute.xlu1 %4464  ;;  %v4747_v17 = vand.u32 4294901760, %v11281_v4 }
 0x5a5   : > { %v4380_v51 = vpop.permute.xlu0 %4379  ;;  %v4591_v28 = vsel %vm1510_vm7, %v4582_v30, %v4465_v53 }
 0x5a6   : > { %v4748_v49 = vsub.f32 %v11281_v4, %v4747_v17 }
 0x5a8   : > { %v4494_v44 = vpop.permute.xlu1 %4493  ;;  %v4749_v0 = vand.u32 4294901760, %v4748_v49  ;;  %v4547_v49 = vsel %vm1159_vm2, %v11144_v14, %v4308_v26 }
 0x5a9   : > { %v4409_v32 = vpop.permute.xlu0 %4408  ;;  %v4600_v12 = vsel %vm1520_vm8, %v4591_v28, %v4494_v44  ;;  %v4556_v33 = vsel %vm1471_vm4, %v4547_v49, %v4344_v57 }
 0x5aa   : > { %7931 = vmatmul.mubr.f32.gmra.mrb[42].mxu0 %v4749_v0  ;;  %v4565_v44 = vsel %vm1481_vm5, %v4556_v33, %v4380_v51 }
 0x5ab   : > { %7933 = vmatprep.mubr.msk.f32.mxu0 %vm9235_vm0, %v12006_v29  ;;  %v4574_v28 = vsel %vm302_vm1, %v4565_v44, %v4409_v32 }
 0x5ac   : > { %v4523_v58 = vpop.permute.xlu1 %4522 }
 0x5ad   : > { %v4310_v19 = vpop.permute.xlu0 %4309  ;;  %v4609_v10 = vsel %vm1530_vm9, %v4600_v12, %v4523_v58 }
 0x5ae   : > { %v4618_v9 = vsel %vm287_vm13, %v4609_v10, 0.0  ;;  %v12037_v10 = vld [vmem:[#allocation12_spill] sm:$0xff]  ;;  %v4548_v44 = vsel %vm1159_vm2, %v11156_v61, %v4310_v19  ;;  %vm3374_vm13 = vcmask 253952  }
 0x5af   : > { %v4634_v3 = vsel %vm1555_vm11, %v4618_v9, 0  ;;  %vm12038_vm3 = vcmp.gt.f32.partialorder %v12037_v10, 0.0 }
 0x5b0   : > { %v11301_v59 = vand.u32 4294901760, %v4634_v3  ;;  %v4438_v37 = vpop.permute.xlu1 %4437 }
 0x5b1   : > { %v4346_v45 = vpop.permute.xlu0 %4345  ;;  %v4583_v12 = vsel %vm1500_vm6, %v4574_v28, %v4438_v37 }
 0x5b2   : > { %v11304_v52 = vsub.f32 %v4634_v3, %v11301_v59 }
 0x5b4   : > { %v4467_v11 = vpop.permute.xlu1 %4466  ;;  %v4757_v35 = vand.u32 4294901760, %v11304_v52 }
 0x5b5   : > { %v4382_v53 = vpop.permute.xlu0 %4381  ;;  %v4592_v58 = vsel %vm1510_vm7, %v4583_v12, %v4467_v11 }
 0x5b6   : > { %v4758_v46 = vsub.f32 %v11304_v52, %v4757_v35 }
 0x5b8   : > { %v4496_v0 = vpop.permute.xlu1 %4495  ;;  %v4759_v30 = vand.u32 4294901760, %v4758_v46 }
 0x5b9   : > { %v4411_v38 = vpop.permute.xlu0 %4410  ;;  %v4601_v14 = vsel %vm1520_vm8, %v4592_v58, %v4496_v0 }
 0x5ba   : > { %7934 = vmatmul.mubr.f32.gmra.mrb[44].mxu0 %v4759_v30  ;;  %v4557_v30 = vsel %vm1471_vm4, %v4548_v44, %v4346_v45  ;;  %v12039_v44 = vld [vmem:[#allocation13_spill] sm:$0xff] }
 0x5bb   : > { %7936 = vmatprep.mubr.msk.f32.mxu0 %vm9235_vm0, %v12006_v29  ;;  %v4566_v28 = vsel %vm1481_vm5, %v4557_v30, %v4382_v53  ;;  %vm12040_vm10 = vcmp.gt.f32.partialorder %v12039_v44, 0.0 }
 0x5bc   : > { %v4525_v26 = vpop.permute.xlu1 %4524  ;;  %v4575_v61 = vsel %vm302_vm1, %v4566_v28, %v4411_v38 }
 0x5bd   : > { %v4312_v57 = vpop.permute.xlu0 %4311  ;;  %v4610_v51 = vsel %vm1530_vm9, %v4601_v14, %v4525_v26 }
 0x5be   : > { %v4619_v36 = vsel %vm12038_vm3, %v4610_v51, 0.0 }
 0x5bf   : > { %v4637_v32 = vsel %vm1555_vm11, %v4619_v36, 0 }
 0x5c0   : > { %v11324_v9 = vand.u32 4294901760, %v4637_v32  ;;  %v4440_v3 = vpop.permute.xlu1 %4439 }
 0x5c1   : > { %v4348_v37 = vpop.permute.xlu0 %4347  ;;  %v4584_v26 = vsel %vm1500_vm6, %v4575_v61, %v4440_v3 }
 0x5c2   : > { %v11327_v11 = vsub.f32 %v4637_v32, %v11324_v9 }
 0x5c4   : > { %v4469_v49 = vpop.permute.xlu1 %4468  ;;  %v11999_v33 = vand.u32 4294901760, %v11327_v11 }
 0x5c5   : > { %v4384_v46 = vpop.permute.xlu0 %4383  ;;  %v4593_v51 = vsel %vm1510_vm7, %v4584_v26, %v4469_v49 }
 0x5c6   : > { %v4768_v0 = vsub.f32 %v11327_v11, %v11999_v33 }
 0x5c8   : > { %v4498_v12 = vpop.permute.xlu1 %4497  ;;  %v4769_v14 = vand.u32 4294901760, %v4768_v0  ;;  %v3314_v19 = vpop.f32.mrb[20].mxu0 }
 0x5c9   : > { %v4413_v58 = vpop.permute.xlu0 %4412  ;;  %3366 = vst.msk [vmem:[%s11341_s14] sm:$0xff] %vm302_vm1, %v3314_v19  ;;  %v7671_v45 = vpop.f32.mrb[21].mxu0  ;;  %v4602_v53 = vsel %vm1520_vm8, %v4593_v51, %v4498_v12 }
 0x5ca   : > { %7937 = vmatmul.mubr.f32.gmra.mrb[46].mxu0 %v4769_v14 }
 0x5cb   : > { %7939 = vmatprep.mubr.msk.f32.mxu0 %vm9235_vm0, %v12006_v29 }
 0x5cc   : > { %v4527_v10 = vpop.permute.xlu1 %4526  ;;  %v3320_v38 = vpop.f32.mrb[22].mxu0 }
 0x5cd   : > { %v4314_v36 = vpop.permute.xlu0 %4313  ;;  %v4611_v32 = vsel %vm1530_vm9, %v4602_v53, %v4527_v10  ;;  %3367 = vst.msk [vmem:[%s11341_s14 + $0x8] sm:$0xff] %vm302_vm1, %v3320_v38  ;;  %v7674_v0 = vpop.f32.mrb[23].mxu0  ;;  %v4549_v10 = vsel %vm1159_vm2, %v11168_v13, %v4312_v57 }
 0x5ce   : > { %v4620_v3 = vsel %vm12040_vm10, %v4611_v32, 0.0  ;;  %v4558_v44 = vsel %vm1471_vm4, %v4549_v10, %v4348_v37 }
 0x5cf   : > { %v4640_v49 = vsel %vm1555_vm11, %v4620_v3, 0  ;;  %v4567_v3 = vsel %vm1481_vm5, %v4558_v44, %v4384_v46 }
 0x5d0   : > { %v11358_v30 = vand.u32 4294901760, %v4640_v49  ;;  %v4442_v28 = vpop.permute.xlu1 %4441  ;;  %v3326_v61 = vpop.f32.mrb[24].mxu0 }
 0x5d1   : > { %v4350_v14 = vpop.permute.xlu0 %4349  ;;  %3368 = vst.msk [vmem:[%s11341_s14 + $0x10] sm:$0xff] %vm302_vm1, %v3326_v61  ;;  %v7677_v19 = vpop.f32.mrb[25].mxu0 }
 0x5d2   : > { %v11361_v12 = vsub.f32 %v4640_v49, %v11358_v30  ;;  %v4576_v19 = vsel %vm302_vm1, %v4567_v3, %v4413_v58 }
 0x5d3   : > { %v4585_v13 = vsel %vm1500_vm6, %v4576_v19, %v4442_v28 }
 0x5d4   : > { %v4471_v26 = vpop.permute.xlu1 %4470  ;;  %v4777_v51 = vand.u32 4294901760, %v11361_v12  ;;  %v3332_v53 = vpop.f32.mrb[26].mxu0 }
 0x5d5   : > { %v4386_v45 = vpop.permute.xlu0 %4385  ;;  %3369 = vst.msk [vmem:[%s11341_s14 + $0x18] sm:$0xff] %vm302_vm1, %v3332_v53  ;;  %v7680_v32 = vpop.f32.mrb[27].mxu0  ;;  %v4594_v53 = vsel %vm1510_vm7, %v4585_v13, %v4471_v26 }
 0x5d6   : > { %v4778_v38 = vsub.f32 %v11361_v12, %v4777_v51 }
 0x5d8   : > { %v4500_v0 = vpop.permute.xlu1 %4499  ;;  %v4779_v61 = vand.u32 4294901760, %v4778_v38  ;;  %v3338_v33 = vpop.f32.mrb[28].mxu0  ;;  %v12041_v38 = vld [vmem:[#allocation14_spill] sm:$0xff] }
 0x5d9   : > { %v4415_v49 = vpop.permute.xlu0 %4414  ;;  %3370 = vst.msk [vmem:[%s11341_s14 + $0x20] sm:$0xff] %vm302_vm1, %v3338_v33  ;;  %v7683_v57 = vpop.f32.mrb[29].mxu0  ;;  %v4603_v37 = vsel %vm1520_vm8, %v4594_v53, %v4500_v0  ;;  %vm12042_vm12 = vcmp.gt.f32.partialorder %v12041_v38, 0.0  ;;  %v4259_v38 = vld [vmem:[#allocation2 + $0x47] sm:$0x1] }
 0x5da   : > { %7940 = vmatmul.mubr.f32.gmra.mrb[48].mxu0 %v4779_v61  ;;  %v4550_v57 = vsel %vm1159_vm2, %v11180_v18, %v4314_v36 }
 0x5db   : > { %7942 = vmatprep.mubr.msk.f32.mxu0 %vm9235_vm0, %v12006_v29  ;;  %v4559_v53 = vsel %vm1471_vm4, %v4550_v57, %v4350_v14 }
 0x5dc   : > { %v4529_v46 = vpop.permute.xlu1 %4528  ;;  %v3344_v58 = vpop.f32.mrb[30].mxu0 }
 0x5dd   : > { %v4316_v10 = vpop.permute.xlu0 %4315  ;;  %v4612_v32 = vsel %vm1530_vm9, %v4603_v37, %v4529_v46  ;;  %3371 = vst.msk [vmem:[%s11341_s14 + $0x28] sm:$0xff] %vm302_vm1, %v3344_v58  ;;  %v7686_v33 = vpop.f32.mrb[31].mxu0  ;;  %v4568_v58 = vsel %vm1481_vm5, %v4559_v53, %v4386_v45 }
 0x5de   : > { %v4621_v28 = vsel %vm12042_vm12, %v4612_v32, 0.0  ;;  %v4577_v33 = vsel %vm302_vm1, %v4568_v58, %v4415_v49 }
 0x5df   : > { %v4643_v44 = vsel %vm1555_vm11, %v4621_v28, 0 }
 0x5e0   : > { %v11389_v26 = vand.u32 4294901760, %v4643_v44  ;;  %v4444_v3 = vpop.permute.xlu1 %4443  ;;  %v3350_v19 = vpop.f32.mrb[32].mxu0 }
 0x5e1   : > { %v4352_v61 = vpop.permute.xlu0 %4351  ;;  %3372 = vst.msk [vmem:[%s11341_s14 + $0x30] sm:$0xff] %vm302_vm1, %v3350_v19  ;;  %v7689_v13 = vpop.f32.mrb[33].mxu0  ;;  %v4586_v36 = vsel %vm1500_vm6, %v4577_v33, %v4444_v3 }
 0x5e2   : > { %v11392_v0 = vsub.f32 %v4643_v44, %v11389_v26  ;;  %v4551_v44 = vsel %vm1159_vm2, %v4259_v38, %v4316_v10 }
 0x5e3   : > { %v4560_v14 = vsel %vm1471_vm4, %v4551_v44, %v4352_v61  ;;  %vm12043_vm4 = vcmp.gt.f32.partialorder %v10190_v20, 0.0 }
 0x5e4   : > { %v4473_v37 = vpop.permute.xlu1 %4472  ;;  %v4787_v32 = vand.u32 4294901760, %v11392_v0  ;;  %v3356_v28 = vpop.f32.mrb[34].mxu0 }
 0x5e5   : > { %v4388_v46 = vpop.permute.xlu0 %4387  ;;  %3373 = vst.msk [vmem:[%s11341_s14 + $0x38] sm:$0xff] %vm302_vm1, %v3356_v28  ;;  %v7692_v19 = vpop.f32.mrb[35].mxu0  ;;  %v4595_v45 = vsel %vm1510_vm7, %v4586_v36, %v4473_v37 }
 0x5e6   : > { %v4788_v18 = vsub.f32 %v11392_v0, %v4787_v32  ;;  %v4569_v13 = vsel %vm1481_vm5, %v4560_v14, %v4388_v46 }
 0x5e8   : > { %v4502_v49 = vpop.permute.xlu1 %4501  ;;  %v4789_v10 = vand.u32 4294901760, %v4788_v18  ;;  %v3362_v38 = vpop.f32.mrb[36].mxu0 }
 0x5e9   : > { %v4417_v57 = vpop.permute.xlu0 %4416  ;;  %v4604_v53 = vsel %vm1520_vm8, %v4595_v45, %v4502_v49  ;;  %3375 = vst.msk [vmem:[%s11341_s14 + $0x40] sm:$0x1] %vm3374_vm13, %v3362_v38  ;;  %v7695_v3 = vpop.f32.mrb[37].mxu0 }
 0x5ea   : > { %v4578_v58 = vsel %vm302_vm1, %v4569_v13, %v4417_v57  ;;  %v4613_v28 = vsel %vm1530_vm9, %v4604_v53, %v11194_v1  ;;  %7943 = vmatmul.mubr.f32.gmra.mrb[50].mxu0 %v4789_v10 }
 0x5eb   : > { %v4622_v61 = vsel %vm291_vm15, %v4613_v28, 0.0  ;;  %7945 = vmatprep.mubr.msk.f32.mxu0 %vm9235_vm0, %v12006_v29  ;;  %v4587_v33 = vsel %vm1500_vm6, %v4578_v58, %v11196_v42 }
 0x5ec   : > { %v4646_v37 = vsel %vm1555_vm11, %v4622_v61, 0  ;;  %v4475_v46 = vpop.permute.xlu1 %4474 }
 0x5ed   : > { %v11425_v44 = vand.u32 4294901760, %v4646_v37  ;;  %v4596_v1 = vsel %vm1510_vm7, %v4587_v33, %v4475_v46  ;;  %v4504_v19 = vpop.permute.xlu0 %4503 }
 0x5ee   : > { %v4605_v2 = vsel %vm1520_vm8, %v4596_v1, %v4504_v19 }
 0x5ef   : > { %v11429_v18 = vsub.f32 %v4646_v37, %v11425_v44 }
 0x5f0   : > { %v4533_v36 = vpop.permute.xlu1 %4532 }
 0x5f1   : > { %v4614_v14 = vsel %vm1530_vm9, %v4605_v2, %v4533_v36  ;;  %v4797_v45 = vand.u32 4294901760, %v11429_v18 }
 0x5f2   : > { %v4623_v13 = vsel %vm12043_vm4, %v4614_v14, 0.0 }
 0x5f3   : > { %v4649_v42 = vsel %vm1555_vm11, %v4623_v13, 0  ;;  %v4798_v49 = vsub.f32 %v11429_v18, %v4797_v45 }
 0x5f4   : > { %v11440_v57 = vand.u32 4294901760, %v4649_v42 }
 0x5f5   : > { %v4799_v10 = vand.u32 4294901760, %v4798_v49 }
 0x5f6   : > { %v11443_v53 = vsub.f32 %v4649_v42, %v11440_v57 }
 0x5f7   : > { %7946 = vmatmul.mubr.f32.gmra.mrb[52].mxu0 %v4799_v10 }
 0x5f8   : > { %7948 = vmatprep.mubr.msk.f32.mxu0 %vm9235_vm0, %v12006_v29  ;;  %v4807_v58 = vand.u32 4294901760, %v11443_v53 }
 0x5fa   : > { %v4808_v20 = vsub.f32 %v11443_v53, %v4807_v58 }
 0x5fc   : > { %v4809_v38 = vand.u32 4294901760, %v4808_v20 }
 0x5fe   : > { %7949 = vmatmul.mubr.f32.gmra.mrb[54].mxu0 %v4809_v38 }
 0x5ff   : > { %7969 = vmatprep.mubr.msk.f32.mxu0 %vm9235_vm0, %v12006_v29 }
 0x602   : > { %7970 = vmatmul.mubr.f32.vlgmr.msra.gmra.mrb[38].mxu0 %v11222_v48 }
 0x603   : > { %8520 = vmatpush3.bf16.msra.mxu0 %v9902_v56  ;;  %7972 = vmatprep.mubr.msk.f32.mxu0 %vm9235_vm0, %v12006_v29  ;;  %v12044_v56 = vand.u32 4294901760, %v11327_v11 }
 0x604   : > { %8521 = vmatprep.subr.bf16.mxu0 %v12007_v6 }
 0x606   : > { %7973 = vmatmul.mubr.f32.gmra.mrb[40].mxu0 %v11248_v50 }
 0x607   : > { %7975 = vmatprep.mubr.msk.f32.mxu0 %vm9235_vm0, %v12006_v29  ;;  %8523 = vmatpush3.bf16.msra.mxu0 %v9910_v62 }
 0x608   : > { %8524 = vmatprep.subr.bf16.mxu0 %v12007_v6 }
 0x60a   : > { %7976 = vmatmul.mubr.f32.gmra.mrb[42].mxu0 %v11278_v5 }
 0x60b   : > { %7978 = vmatprep.mubr.msk.f32.mxu0 %vm9235_vm0, %v12006_v29  ;;  %8526 = vmatpush3.bf16.msra.mxu0 %v9943_v15 }
 0x60c   : > { %8527 = vmatprep.subr.bf16.mxu0 %v12007_v6 }
 0x60e   : > { %7979 = vmatmul.mubr.f32.gmra.mrb[44].mxu0 %v11301_v59 }
 0x60f   : > { %7981 = vmatprep.mubr.msk.f32.mxu0 %vm9235_vm0, %v12006_v29  ;;  %8529 = vmatpush3.bf16.msra.mxu0 %v9986_v21 }
 0x610   : > { %8012 = vmatprep.subr.mxu0 %v12006_v29 }
 0x612   : > { %7982 = vmatmul.mubr.f32.gmra.mrb[46].mxu0 %v11324_v9 }
 0x613   : > { %7984 = vmatprep.mubr.msk.f32.mxu0 %vm9235_vm0, %v12006_v29  ;;  %8013 = vmatpush3.msra.mxu0 %v10017_v8 }
 0x614   : > { %8530 = vmatprep.subr.bf16.mxu0 %v12007_v6 }
 0x616   : > { %7985 = vmatmul.mubr.f32.gmra.mrb[48].mxu0 %v11358_v30 }
 0x617   : > { %7987 = vmatprep.mubr.msk.f32.mxu0 %vm9235_vm0, %v12006_v29 }
 0x61a   : > { %7988 = vmatmul.mubr.f32.gmra.mrb[50].mxu0 %v11389_v26 }
 0x61b   : > { %7990 = vmatprep.mubr.msk.f32.mxu0 %vm9235_vm0, %v12006_v29 }
 0x61e   : > { %7991 = vmatmul.mubr.f32.gmra.mrb[52].mxu0 %v11425_v44 }
 0x61f   : > { %7993 = vmatprep.mubr.msk.f32.mxu0 %vm9235_vm0, %v12006_v29 }
 0x622   : > { %7994 = vmatmul.mubr.f32.gmra.mrb[54].mxu0 %v11440_v57 }
 0x623   : > { %8014 = vmatprep.mubr.msk.f32.mxu0 %vm9235_vm0, %v12006_v29 }
 0x626   : > { %8015 = vmatmul.mubr.f32.vlgmr.msra.gmra.mrb[38].mxu0 %v11225_v25 }
 0x627   : > { %8532 = vmatpush3.bf16.msra.mxu0 %v9675_v60  ;;  %8017 = vmatprep.mubr.msk.f32.mxu0 %vm9235_vm0, %v12006_v29 }
 0x628   : > { %8533 = vmatprep.subr.bf16.mxu0 %v12007_v6 }
 0x62a   : > { %8018 = vmatmul.mubr.f32.gmra.mrb[40].mxu0 %v11252_v39 }
 0x62b   : > { %8020 = vmatprep.mubr.msk.f32.mxu0 %vm9235_vm0, %v12006_v29  ;;  %8535 = vmatpush3.bf16.msra.mxu0 %v9704_v7 }
 0x62c   : > { %8536 = vmatprep.subr.bf16.mxu0 %v12007_v6 }
 0x62e   : > { %8021 = vmatmul.mubr.f32.gmra.mrb[42].mxu0 %v11281_v4 }
 0x62f   : > { %8023 = vmatprep.mubr.msk.f32.mxu0 %vm9235_vm0, %v12006_v29  ;;  %8538 = vmatpush3.bf16.msra.mxu0 %v9738_v24 }
 0x630   : > { %8539 = vmatprep.subr.bf16.mxu0 %v12007_v6 }
 0x632   : > { %8024 = vmatmul.mubr.f32.gmra.mrb[44].mxu0 %v11304_v52 }
 0x633   : > { %8026 = vmatprep.mubr.msk.f32.mxu0 %vm9235_vm0, %v12006_v29  ;;  %8541 = vmatpush3.bf16.msra.mxu0 %v9759_v34 }
 0x634   : > { %8057 = vmatprep.subr.mxu0 %v12006_v29 }
 0x636   : > { %8027 = vmatmul.mubr.f32.gmra.mrb[46].mxu0 %v11327_v11 }
 0x637   : > { %8029 = vmatprep.mubr.msk.f32.mxu0 %vm9235_vm0, %v12006_v29  ;;  %8058 = vmatpush3.msra.mxu0 %v9772_v41 }
 0x638   : > { %8542 = vmatprep.subr.bf16.mxu0 %v12007_v6 }
 0x63a   : > { %8030 = vmatmul.mubr.f32.gmra.mrb[48].mxu0 %v11361_v12 }
 0x63b   : > { %8032 = vmatprep.mubr.msk.f32.mxu0 %vm9235_vm0, %v12006_v29 }
 0x63e   : > { %8033 = vmatmul.mubr.f32.gmra.mrb[50].mxu0 %v11392_v0 }
 0x63f   : > { %8035 = vmatprep.mubr.msk.f32.mxu0 %vm9235_vm0, %v12006_v29 }
 0x642   : > { %8036 = vmatmul.mubr.f32.gmra.mrb[52].mxu0 %v11429_v18 }
 0x643   : > { %8038 = vmatprep.mubr.msk.f32.mxu0 %vm9235_vm0, %v12006_v29 }
 0x646   : > { %8039 = vmatmul.mubr.f32.gmra.mrb[54].mxu0 %v11443_v53 }
 0x647   : > { %8059 = vmatprep.mubr.msk.f32.mxu0 %vm9235_vm0, %v12006_v29 }
 0x64a   : > { %8060 = vmatmul.mubr.f32.vlgmr.msra.gmra.mrb[38].mxu0 %v4727_v47 }
 0x64b   : > { %8544 = vmatpush3.bf16.msra.mxu0 %v10338_v43  ;;  %8062 = vmatprep.mubr.msk.f32.mxu0 %vm9235_vm0, %v12006_v29 }
 0x64c   : > { %8545 = vmatprep.subr.bf16.mxu0 %v12007_v6 }
 0x64e   : > { %8063 = vmatmul.mubr.f32.gmra.mrb[40].mxu0 %v4737_v63 }
 0x64f   : > { %8065 = vmatprep.mubr.msk.f32.mxu0 %vm9235_vm0, %v12006_v29  ;;  %8547 = vmatpush3.bf16.msra.mxu0 %v10347_v23 }
 0x650   : > { %8548 = vmatprep.subr.bf16.mxu0 %v12007_v6 }
 0x652   : > { %8066 = vmatmul.mubr.f32.gmra.mrb[42].mxu0 %v4747_v17 }
 0x653   : > { %8068 = vmatprep.mubr.msk.f32.mxu0 %vm9235_vm0, %v12006_v29  ;;  %8550 = vmatpush3.bf16.msra.mxu0 %v10359_v40 }
 0x654   : > { %8551 = vmatprep.subr.bf16.mxu0 %v12007_v6 }
 0x656   : > { %8069 = vmatmul.mubr.f32.gmra.mrb[44].mxu0 %v4757_v35 }
 0x657   : > { %8071 = vmatprep.mubr.msk.f32.mxu0 %vm9235_vm0, %v12006_v29  ;;  %8553 = vmatpush3.bf16.msra.mxu0 %v10371_v31 }
 0x658   : > { %8102 = vmatprep.subr.mxu0 %v12006_v29 }
 0x65a   : > { %8072 = vmatmul.mubr.f32.gmra.mrb[46].mxu0 %v12044_v56 }
 0x65b   : > { %8074 = vmatprep.mubr.msk.f32.mxu0 %vm9235_vm0, %v12006_v29  ;;  %8103 = vmatpush3.msra.mxu0 %v10029_v27 }
 0x65c   : > { %8554 = vmatprep.subr.bf16.mxu0 %v12007_v6 }
 0x65e   : > { %8075 = vmatmul.mubr.f32.gmra.mrb[48].mxu0 %v4777_v51 }
 0x65f   : > { %8077 = vmatprep.mubr.msk.f32.mxu0 %vm9235_vm0, %v12006_v29 }
 0x662   : > { %8078 = vmatmul.mubr.f32.gmra.mrb[50].mxu0 %v4787_v32 }
 0x663   : > { %8080 = vmatprep.mubr.msk.f32.mxu0 %vm9235_vm0, %v12006_v29 }
 0x666   : > { %8081 = vmatmul.mubr.f32.gmra.mrb[52].mxu0 %v4797_v45 }
 0x667   : > { %8083 = vmatprep.mubr.msk.f32.mxu0 %vm9235_vm0, %v12006_v29 }
 0x66a   : > { %8084 = vmatmul.mubr.f32.gmra.mrb[54].mxu0 %v4807_v58 }
 0x66b   : > { %8104 = vmatprep.mubr.msk.f32.mxu0 %vm9235_vm0, %v12006_v29 }
 0x66e   : > { %8105 = vmatmul.mubr.f32.vlgmr.msra.gmra.mrb[38].mxu0 %v11222_v48 }
 0x66f   : > { %8556 = vmatpush3.bf16.msra.mxu0 %v9675_v60  ;;  %8107 = vmatprep.mubr.msk.f32.mxu0 %vm9235_vm0, %v12006_v29 }
 0x670   : > { %8557 = vmatprep.subr.bf16.mxu0 %v12007_v6 }
 0x672   : > { %8108 = vmatmul.mubr.f32.gmra.mrb[40].mxu0 %v11248_v50 }
 0x673   : > { %8110 = vmatprep.mubr.msk.f32.mxu0 %vm9235_vm0, %v12006_v29  ;;  %8559 = vmatpush3.bf16.msra.mxu0 %v9704_v7  ;;  %v11637_v7 = vld [vmem:[%s11964_s4] ss:$0 sm:$0xff] }
 0x674   : > { %8560 = vmatprep.subr.bf16.mxu0 %v12007_v6 }
 0x676   : > { %8111 = vmatmul.mubr.f32.gmra.mrb[42].mxu0 %v11278_v5 }
 0x677   : > { %8113 = vmatprep.mubr.msk.f32.mxu0 %vm9235_vm0, %v12006_v29  ;;  %8562 = vmatpush3.bf16.msra.mxu0 %v9738_v24 }
 0x678   : > { %8563 = vmatprep.subr.bf16.mxu0 %v12007_v6 }
 0x67a   : > { %8114 = vmatmul.mubr.f32.gmra.mrb[44].mxu0 %v11301_v59 }
 0x67b   : > { %8116 = vmatprep.mubr.msk.f32.mxu0 %vm9235_vm0, %v12006_v29  ;;  %8565 = vmatpush3.bf16.msra.mxu0 %v9759_v34 }
 0x67c   : > { %8147 = vmatprep.subr.mxu0 %v12006_v29 }
 0x67e   : > { %8117 = vmatmul.mubr.f32.gmra.mrb[46].mxu0 %v11324_v9 }
 0x67f   : > { %8119 = vmatprep.mubr.msk.f32.mxu0 %vm9235_vm0, %v12006_v29  ;;  %8148 = vmatpush3.msra.mxu0 %v9772_v41 }
 0x682   : > { %8120 = vmatmul.mubr.f32.gmra.mrb[48].mxu0 %v11358_v30 }
 0x683   : > { %8122 = vmatprep.mubr.msk.f32.mxu0 %vm9235_vm0, %v12006_v29 }
 0x686   : > { %8123 = vmatmul.mubr.f32.gmra.mrb[50].mxu0 %v11389_v26 }
 0x687   : > { %8125 = vmatprep.mubr.msk.f32.mxu0 %vm9235_vm0, %v12006_v29 }
 0x68a   : > { %8126 = vmatmul.mubr.f32.gmra.mrb[52].mxu0 %v11425_v44 }
 0x68b   : > { %8128 = vmatprep.mubr.msk.f32.mxu0 %vm9235_vm0, %v12006_v29 }
 0x68e   : > { %8129 = vmatmul.mubr.f32.gmra.mrb[54].mxu0 %v11440_v57 }
 0x68f   : > { %8149 = vmatprep.mubr.msk.f32.mxu0 %vm9235_vm0, %v12006_v29 }
 0x692   : > { %8150 = vmatmul.mubr.f32.vlgmr.msra.gmra.mrb[38].mxu0 %v11222_v48 }
 0x693   : > { %8152 = vmatprep.mubr.msk.f32.mxu0 %vm9235_vm0, %v12006_v29 }
 0x696   : > { %8153 = vmatmul.mubr.f32.gmra.mrb[40].mxu0 %v11248_v50 }
 0x697   : > { %8155 = vmatprep.mubr.msk.f32.mxu0 %vm9235_vm0, %v12006_v29 }
 0x69a   : > { %8156 = vmatmul.mubr.f32.gmra.mrb[42].mxu0 %v11278_v5 }
 0x69b   : > { %8158 = vmatprep.mubr.msk.f32.mxu0 %vm9235_vm0, %v12006_v29 }
 0x69e   : > { %8159 = vmatmul.mubr.f32.gmra.mrb[44].mxu0 %v11301_v59 }
 0x69f   : > { %8161 = vmatprep.mubr.msk.f32.mxu0 %vm9235_vm0, %v12006_v29 }
 0x6a2   : > { %8162 = vmatmul.mubr.f32.gmra.mrb[46].mxu0 %v11324_v9 }
 0x6a3   : > { %8164 = vmatprep.mubr.msk.f32.mxu0 %vm9235_vm0, %v12006_v29 }
 0x6a6   : > { %8165 = vmatmul.mubr.f32.gmra.mrb[48].mxu0 %v11358_v30 }
 0x6a7   : > { %8167 = vmatprep.mubr.msk.f32.mxu0 %vm9235_vm0, %v12006_v29 }
 0x6aa   : > { %8168 = vmatmul.mubr.f32.gmra.mrb[50].mxu0 %v11389_v26 }
 0x6ab   : > { %8170 = vmatprep.mubr.msk.f32.mxu0 %vm9235_vm0, %v12006_v29 }
 0x6ae   : > { %8171 = vmatmul.mubr.f32.gmra.mrb[52].mxu0 %v11425_v44 }
 0x6af   : > { %8173 = vmatprep.mubr.msk.f32.mxu0 %vm9235_vm0, %v12006_v29 }
 0x6b2   : > { %8174 = vmatmul.mubr.f32.gmra.mrb[54].mxu0 %v11440_v57 }
 0x765   : > { %v5493_v60 = vpop.f32.mrb[38].mxu0 }
 0x766   : > { %v8586_v24 = vadd.f32 %v11637_v7, %v5493_v60  ;;  %v8151_v34 = vpop.f32.mrb[39].mxu0 }
 0x768   : > { %v6530_v41 = vmul.f32 -1.702, %v8586_v24 }
 0x769   : > { %v5499_v62 = vpop.f32.mrb[40].mxu0 }
 0x76a   : > { %v5563_v15 = vmul.f32 1.442695, %v6530_v41  ;;  %v11641_v21 = vadd.f32 %v11637_v7, %v5499_v62  ;;  %v8154_v8 = vpop.f32.mrb[41].mxu0 }
 0x76c   : > { %9189 = vpow2.f32 %v5563_v15  ;;  %v6531_v6 = vmul.f32 -1.702, %v11641_v21 }
 0x76d   : > { %v5505_v27 = vpop.f32.mrb[42].mxu0 }
 0x76e   : > { %v5565_v43 = vmul.f32 1.442695, %v6531_v6  ;;  %v11645_v23 = vadd.f32 %v11637_v7, %v5505_v27  ;;  %v8157_v40 = vpop.f32.mrb[43].mxu0 }
 0x770   : > { %9191 = vpow2.f32 %v5565_v43  ;;  %v6532_v31 = vmul.f32 -1.702, %v11645_v23 }
 0x771   : > { %v5511_v48 = vpop.f32.mrb[44].mxu0 }
 0x772   : > { %v5567_v25 = vmul.f32 1.442695, %v6532_v31  ;;  %v11649_v47 = vadd.f32 %v11637_v7, %v5511_v48  ;;  %v8160_v50 = vpop.f32.mrb[45].mxu0 }
 0x774   : > { %9193 = vpow2.f32 %v5567_v25  ;;  %v6533_v39 = vmul.f32 -1.702, %v11649_v47 }
 0x775   : > { %v5517_v63 = vpop.f32.mrb[46].mxu0 }
 0x776   : > { %v9190_v5 = vpop.eup %9189  ;;  %v5569_v4 = vmul.f32 1.442695, %v6533_v39  ;;  %v11653_v17 = vadd.f32 %v11637_v7, %v5517_v63  ;;  %v8163_v59 = vpop.f32.mrb[47].mxu0 }
 0x777   : > { %v5581_v52 = vadd.f32 1.0, %v9190_v5 }
 0x778   : > { %9195 = vpow2.f32 %v5569_v4  ;;  %v6534_v35 = vmul.f32 -1.702, %v11653_v17 }
 0x779   : > { %9197 = vrcp.f32 %v5581_v52  ;;  %v5523_v9 = vpop.f32.mrb[48].mxu0 }
 0x77a   : > { %v9192_v11 = vpop.eup %9191  ;;  %v5571_v30 = vmul.f32 1.442695, %v6534_v35  ;;  %v11657_v12 = vadd.f32 %v11637_v7, %v5523_v9  ;;  %v8166_v51 = vpop.f32.mrb[49].mxu0 }
 0x77b   : > { %v5582_v26 = vadd.f32 1.0, %v9192_v11 }
 0x77c   : > { %9199 = vpow2.f32 %v5571_v30  ;;  %v6535_v0 = vmul.f32 -1.702, %v11657_v12 }
 0x77d   : > { %9201 = vrcp.f32 %v5582_v26  ;;  %v5529_v32 = vpop.f32.mrb[50].mxu0 }
 0x77e   : > { %v9194_v28 = vpop.eup %9193  ;;  %v5573_v3 = vmul.f32 1.442695, %v6535_v0  ;;  %v11661_v61 = vadd.f32 %v11637_v7, %v5529_v32  ;;  %v8169_v37 = vpop.f32.mrb[51].mxu0 }
 0x77f   : > { %v5583_v46 = vadd.f32 1.0, %v9194_v28 }
 0x780   : > { %9203 = vpow2.f32 %v5573_v3  ;;  %v6536_v33 = vmul.f32 -1.702, %v11661_v61 }
 0x781   : > { %9205 = vrcp.f32 %v5583_v46  ;;  %v5535_v44 = vpop.f32.mrb[52].mxu0 }
 0x782   : > { %v9196_v1 = vpop.eup %9195  ;;  %v5575_v19 = vmul.f32 1.442695, %v6536_v33  ;;  %v11665_v18 = vadd.f32 %v11637_v7, %v5535_v44  ;;  %v8172_v2 = vpop.f32.mrb[53].mxu0 }
 0x783   : > { %v9198_v36 = vpop.eup %9197  ;;  %v5584_v14 = vadd.f32 1.0, %v9196_v1 }
 0x784   : > { %v5608_v45 = vmul.f32 %v9198_v36, %v8586_v24  ;;  %9207 = vpow2.f32 %v5575_v19  ;;  %v6537_v13 = vmul.f32 -1.702, %v11665_v18 }
 0x785   : > { %9209 = vrcp.f32 %v5584_v14  ;;  %v5541_v42 = vpop.f32.mrb[54].mxu0 }
 0x786   : > { %v9200_v49 = vpop.eup %9199  ;;  %v5618_v57 = vsel %vm1159_vm2, %v5608_v45, 0  ;;  %v5577_v10 = vmul.f32 1.442695, %v6537_v13  ;;  %v11670_v53 = vadd.f32 %v11637_v7, %v5541_v42  ;;  %v8175_v58 = vpop.f32.mrb[55].mxu0 }
 0x787   : > { %v9202_v20 = vpop.eup %9201  ;;  %v11672_v38 = vand.u32 4294901760, %v5618_v57  ;;  %v5585_v56 = vadd.f32 1.0, %v9200_v49 }
 0x788   : > { %v5609_v60 = vmul.f32 %v9202_v20, %v11641_v21  ;;  %9211 = vpow2.f32 %v5577_v10  ;;  %v6538_v24 = vmul.f32 -1.702, %v11670_v53 }
 0x789   : > { %v11677_v34 = vsub.f32 %v5618_v57, %v11672_v38  ;;  %9213 = vrcp.f32 %v5585_v56 }
 0x78a   : > { %v9204_v41 = vpop.eup %9203  ;;  %v5621_v62 = vsel %vm1159_vm2, %v5609_v60, 0  ;;  %v5579_v15 = vmul.f32 1.442695, %v6538_v24 }
 0x78b   : > { %v9206_v7 = vpop.eup %9205  ;;  %v5712_v8 = vand.u32 4294901760, %v11677_v34  ;;  %v11681_v6 = vand.u32 4294901760, %v5621_v62  ;;  %v5586_v27 = vadd.f32 1.0, %v9204_v41 }
 0x78c   : > { %v5610_v43 = vmul.f32 %v9206_v7, %v11645_v23  ;;  %9215 = vpow2.f32 %v5579_v15 }
 0x78d   : > { %v5713_v21 = vsub.f32 %v11677_v34, %v5712_v8  ;;  %v11688_v40 = vsub.f32 %v5621_v62, %v11681_v6  ;;  %9217 = vrcp.f32 %v5586_v27 }
 0x78e   : > { %v9208_v31 = vpop.eup %9207  ;;  %v5624_v48 = vsel %vm1159_vm2, %v5610_v43, 0 }
 0x78f   : > { %v9210_v25 = vpop.eup %9209  ;;  %v5714_v50 = vand.u32 4294901760, %v5713_v21  ;;  %v11691_v39 = vand.u32 4294901760, %v5624_v48  ;;  %v5587_v63 = vadd.f32 1.0, %v9208_v31  ;;  %v5722_v5 = vand.u32 4294901760, %v11688_v40 }
 0x790   : > { %v5611_v23 = vmul.f32 %v9210_v25, %v11649_v47 }
 0x791   : > { %v11696_v4 = vsub.f32 %v5624_v48, %v11691_v39  ;;  %9219 = vrcp.f32 %v5587_v63  ;;  %8179 = vmatmul.mubr.f32.vlgmr.msra.gmra.mrb[36].mxu1 %v5714_v50  ;;  %v5723_v59 = vsub.f32 %v11688_v40, %v5722_v5 }
 0x792   : > { %v9212_v52 = vpop.eup %9211  ;;  %v5627_v35 = vsel %vm1159_vm2, %v5611_v23, 0  ;;  %8206 = vmatpush3.msra.mxu1 %v10836_v16  ;;  %8181 = vmatprep.mubr.msk.f32.mxu1 %vm9235_vm0, %v12006_v29 }
 0x793   : > { %v9214_v9 = vpop.eup %9213  ;;  %v11705_v11 = vand.u32 4294901760, %v5627_v35  ;;  %v5588_v47 = vadd.f32 1.0, %v9212_v52  ;;  %v5724_v30 = vand.u32 4294901760, %v5723_v59  ;;  %v5732_v51 = vand.u32 4294901760, %v11696_v4  ;;  %8234 = vmatprep.subr.mxu1 %v12006_v29 }
 0x794   : > { %v5612_v26 = vmul.f32 %v9214_v9, %v11653_v17 }
 0x795   : > { %v11711_v0 = vsub.f32 %v5627_v35, %v11705_v11  ;;  %9221 = vrcp.f32 %v5588_v47  ;;  %8182 = vmatmul.mubr.f32.gmra.mrb[38].mxu1 %v5724_v30  ;;  %v5733_v16 = vsub.f32 %v11696_v4, %v5732_v51 }
 0x796   : > { %v9216_v32 = vpop.eup %9215  ;;  %v5630_v28 = vsel %vm1159_vm2, %v5612_v26, 0  ;;  %8184 = vmatprep.mubr.msk.f32.mxu1 %vm9235_vm0, %v12006_v29 }
 0x797   : > { %v9218_v3 = vpop.eup %9217  ;;  %v11719_v37 = vand.u32 4294901760, %v5630_v28  ;;  %v5589_v46 = vadd.f32 1.0, %v9216_v32  ;;  %v5734_v17 = vand.u32 4294901760, %v5733_v16  ;;  %v5742_v33 = vand.u32 4294901760, %v11711_v0 }
 0x798   : > { %v5613_v44 = vmul.f32 %v9218_v3, %v11657_v12 }
 0x799   : > { %v11724_v1 = vsub.f32 %v5630_v28, %v11719_v37  ;;  %9223 = vrcp.f32 %v5589_v46  ;;  %8185 = vmatmul.mubr.f32.gmra.mrb[40].mxu1 %v5734_v17  ;;  %v5743_v19 = vsub.f32 %v11711_v0, %v5742_v33 }
 0x79a   : > { %v5633_v2 = vsel %vm1159_vm2, %v5613_v44, 0  ;;  %8187 = vmatprep.mubr.msk.f32.mxu1 %vm9235_vm0, %v12006_v29 }
 0x79b   : > { %v9220_v36 = vpop.eup %9219  ;;  %v11732_v14 = vand.u32 4294901760, %v5633_v2  ;;  %v5744_v45 = vand.u32 4294901760, %v5743_v19  ;;  %v5752_v12 = vand.u32 4294901760, %v11724_v1 }
 0x79c   : > { %v5614_v13 = vmul.f32 %v9220_v36, %v11661_v61 }
 0x79d   : > { %v11737_v42 = vsub.f32 %v5633_v2, %v11732_v14  ;;  %8188 = vmatmul.mubr.f32.gmra.mrb[42].mxu1 %v5744_v45  ;;  %v5753_v49 = vsub.f32 %v11724_v1, %v5752_v12 }
 0x79e   : > { %v5636_v57 = vsel %vm1159_vm2, %v5614_v13, 0  ;;  %8190 = vmatprep.mubr.msk.f32.mxu1 %vm9235_vm0, %v12006_v29 }
 0x79f   : > { %v9222_v10 = vpop.eup %9221  ;;  %v11745_v58 = vand.u32 4294901760, %v5636_v57  ;;  %v5754_v20 = vand.u32 4294901760, %v5753_v49  ;;  %v5762_v56 = vand.u32 4294901760, %v11737_v42 }
 0x7a0   : > { %v5615_v61 = vmul.f32 %v9222_v10, %v11665_v18 }
 0x7a1   : > { %v11750_v60 = vsub.f32 %v5636_v57, %v11745_v58  ;;  %8191 = vmatmul.mubr.f32.gmra.mrb[44].mxu1 %v5754_v20  ;;  %v5763_v24 = vsub.f32 %v11737_v42, %v5762_v56 }
 0x7a2   : > { %v5639_v41 = vsel %vm1159_vm2, %v5615_v61, 0  ;;  %8193 = vmatprep.mubr.msk.f32.mxu1 %vm9235_vm0, %v12006_v29 }
 0x7a3   : > { %v9224_v62 = vpop.eup %9223  ;;  %v11758_v15 = vand.u32 4294901760, %v5639_v41  ;;  %v5764_v7 = vand.u32 4294901760, %v5763_v24  ;;  %v5772_v27 = vand.u32 4294901760, %v11750_v60 }
 0x7a4   : > { %v5616_v18 = vmul.f32 %v9224_v62, %v11670_v53 }
 0x7a5   : > { %v11763_v43 = vsub.f32 %v5639_v41, %v11758_v15  ;;  %8194 = vmatmul.mubr.f32.gmra.mrb[46].mxu1 %v5764_v7  ;;  %v5773_v21 = vsub.f32 %v11750_v60, %v5772_v27 }
 0x7a6   : > { %v5642_v31 = vsel %vm1159_vm2, %v5616_v18, 0  ;;  %8196 = vmatprep.mubr.msk.f32.mxu1 %vm9235_vm0, %v12006_v29 }
 0x7a7   : > { %v11771_v48 = vand.u32 4294901760, %v5642_v31  ;;  %v5774_v25 = vand.u32 4294901760, %v5773_v21  ;;  %v5782_v50 = vand.u32 4294901760, %v11763_v43 }
 0x7a9   : > { %v11775_v53 = vsub.f32 %v5642_v31, %v11771_v48  ;;  %8197 = vmatmul.mubr.f32.gmra.mrb[48].mxu1 %v5774_v25  ;;  %v5783_v63 = vsub.f32 %v11763_v43, %v5782_v50 }
 0x7aa   : > { %8199 = vmatprep.mubr.msk.f32.mxu1 %vm9235_vm0, %v12006_v29 }
 0x7ab   : > { %v5784_v23 = vand.u32 4294901760, %v5783_v63  ;;  %v5792_v59 = vand.u32 4294901760, %v11775_v53 }
 0x7ad   : > { %8200 = vmatmul.mubr.f32.gmra.mrb[50].mxu1 %v5784_v23  ;;  %v5793_v52 = vsub.f32 %v11775_v53, %v5792_v59 }
 0x7ae   : > { %8202 = vmatprep.mubr.msk.f32.mxu1 %vm9235_vm0, %v12006_v29 }
 0x7af   : > { %v5794_v35 = vand.u32 4294901760, %v5793_v52 }
 0x7b1   : > { %8203 = vmatmul.mubr.f32.gmra.mrb[52].mxu1 %v5794_v35 }
 0x7b2   : > { %8207 = vmatprep.mubr.msk.f32.mxu1 %vm9235_vm0, %v12006_v29 }
 0x7b5   : > { %8208 = vmatmul.mubr.f32.vlgmr.msra.gmra.mrb[36].mxu1 %v11672_v38 }
 0x7b6   : > { %8235 = vmatpush3.msra.mxu1 %v10796_v55  ;;  %8210 = vmatprep.mubr.msk.f32.mxu1 %vm9235_vm0, %v12006_v29 }
 0x7b7   : > { %8263 = vmatprep.subr.mxu1 %v12006_v29 }
 0x7b9   : > { %8211 = vmatmul.mubr.f32.gmra.mrb[38].mxu1 %v11681_v6 }
 0x7ba   : > { %8213 = vmatprep.mubr.msk.f32.mxu1 %vm9235_vm0, %v12006_v29 }
 0x7bd   : > { %8214 = vmatmul.mubr.f32.gmra.mrb[40].mxu1 %v11691_v39 }
 0x7be   : > { %8216 = vmatprep.mubr.msk.f32.mxu1 %vm9235_vm0, %v12006_v29 }
 0x7c1   : > { %8217 = vmatmul.mubr.f32.gmra.mrb[42].mxu1 %v11705_v11 }
 0x7c2   : > { %8219 = vmatprep.mubr.msk.f32.mxu1 %vm9235_vm0, %v12006_v29 }
 0x7c5   : > { %8220 = vmatmul.mubr.f32.gmra.mrb[44].mxu1 %v11719_v37 }
 0x7c6   : > { %8222 = vmatprep.mubr.msk.f32.mxu1 %vm9235_vm0, %v12006_v29 }
 0x7c9   : > { %8223 = vmatmul.mubr.f32.gmra.mrb[46].mxu1 %v11732_v14 }
 0x7ca   : > { %8225 = vmatprep.mubr.msk.f32.mxu1 %vm9235_vm0, %v12006_v29 }
 0x7cd   : > { %8226 = vmatmul.mubr.f32.gmra.mrb[48].mxu1 %v11745_v58 }
 0x7ce   : > { %8228 = vmatprep.mubr.msk.f32.mxu1 %vm9235_vm0, %v12006_v29 }
 0x7d1   : > { %8229 = vmatmul.mubr.f32.gmra.mrb[50].mxu1 %v11758_v15 }
 0x7d2   : > { %8231 = vmatprep.mubr.msk.f32.mxu1 %vm9235_vm0, %v12006_v29 }
 0x7d5   : > { %8232 = vmatmul.mubr.f32.gmra.mrb[52].mxu1 %v11771_v48 }
 0x7d6   : > { %8236 = vmatprep.mubr.msk.f32.mxu1 %vm9235_vm0, %v12006_v29 }
 0x7d9   : > { %8237 = vmatmul.mubr.f32.vlgmr.msra.gmra.mrb[36].mxu1 %v11677_v34 }
 0x7da   : > { %8264 = vmatpush3.msra.mxu1 %v10649_v54  ;;  %8239 = vmatprep.mubr.msk.f32.mxu1 %vm9235_vm0, %v12006_v29 }
 0x7db   : > { %8292 = vmatprep.subr.mxu1 %v12006_v29 }
 0x7dd   : > { %8240 = vmatmul.mubr.f32.gmra.mrb[38].mxu1 %v11688_v40 }
 0x7de   : > { %8242 = vmatprep.mubr.msk.f32.mxu1 %vm9235_vm0, %v12006_v29 }
 0x7e1   : > { %8243 = vmatmul.mubr.f32.gmra.mrb[40].mxu1 %v11696_v4 }
 0x7e2   : > { %8245 = vmatprep.mubr.msk.f32.mxu1 %vm9235_vm0, %v12006_v29 }
 0x7e5   : > { %8246 = vmatmul.mubr.f32.gmra.mrb[42].mxu1 %v11711_v0 }
 0x7e6   : > { %8248 = vmatprep.mubr.msk.f32.mxu1 %vm9235_vm0, %v12006_v29 }
 0x7e9   : > { %8249 = vmatmul.mubr.f32.gmra.mrb[44].mxu1 %v11724_v1 }
 0x7ea   : > { %8251 = vmatprep.mubr.msk.f32.mxu1 %vm9235_vm0, %v12006_v29 }
 0x7ed   : > { %8252 = vmatmul.mubr.f32.gmra.mrb[46].mxu1 %v11737_v42 }
 0x7ee   : > { %8254 = vmatprep.mubr.msk.f32.mxu1 %vm9235_vm0, %v12006_v29 }
 0x7f1   : > { %8255 = vmatmul.mubr.f32.gmra.mrb[48].mxu1 %v11750_v60 }
 0x7f2   : > { %8257 = vmatprep.mubr.msk.f32.mxu1 %vm9235_vm0, %v12006_v29 }
 0x7f5   : > { %8258 = vmatmul.mubr.f32.gmra.mrb[50].mxu1 %v11763_v43 }
 0x7f6   : > { %8260 = vmatprep.mubr.msk.f32.mxu1 %vm9235_vm0, %v12006_v29 }
 0x7f9   : > { %8261 = vmatmul.mubr.f32.gmra.mrb[52].mxu1 %v11775_v53 }
 0x7fa   : > { %8265 = vmatprep.mubr.msk.f32.mxu1 %vm9235_vm0, %v12006_v29 }
 0x7fd   : > { %8266 = vmatmul.mubr.f32.vlgmr.msra.gmra.mrb[36].mxu1 %v5712_v8 }
 0x7fe   : > { %8293 = vmatpush3.msra.mxu1 %v10808_v22  ;;  %8268 = vmatprep.mubr.msk.f32.mxu1 %vm9235_vm0, %v12006_v29 }
 0x7ff   : > { %8321 = vmatprep.subr.mxu1 %v12006_v29 }
 0x801   : > { %8269 = vmatmul.mubr.f32.gmra.mrb[38].mxu1 %v5722_v5 }
 0x802   : > { %8271 = vmatprep.mubr.msk.f32.mxu1 %vm9235_vm0, %v12006_v29 }
 0x805   : > { %8272 = vmatmul.mubr.f32.gmra.mrb[40].mxu1 %v5732_v51 }
 0x806   : > { %8274 = vmatprep.mubr.msk.f32.mxu1 %vm9235_vm0, %v12006_v29 }
 0x809   : > { %8275 = vmatmul.mubr.f32.gmra.mrb[42].mxu1 %v5742_v33 }
 0x80a   : > { %8277 = vmatprep.mubr.msk.f32.mxu1 %vm9235_vm0, %v12006_v29 }
 0x80d   : > { %8278 = vmatmul.mubr.f32.gmra.mrb[44].mxu1 %v5752_v12 }
 0x80e   : > { %8280 = vmatprep.mubr.msk.f32.mxu1 %vm9235_vm0, %v12006_v29 }
 0x811   : > { %8281 = vmatmul.mubr.f32.gmra.mrb[46].mxu1 %v5762_v56 }
 0x812   : > { %8283 = vmatprep.mubr.msk.f32.mxu1 %vm9235_vm0, %v12006_v29 }
 0x815   : > { %8284 = vmatmul.mubr.f32.gmra.mrb[48].mxu1 %v5772_v27 }
 0x816   : > { %8286 = vmatprep.mubr.msk.f32.mxu1 %vm9235_vm0, %v12006_v29 }
 0x819   : > { %8287 = vmatmul.mubr.f32.gmra.mrb[50].mxu1 %v5782_v50 }
 0x81a   : > { %8289 = vmatprep.mubr.msk.f32.mxu1 %vm9235_vm0, %v12006_v29 }
 0x81d   : > { %8290 = vmatmul.mubr.f32.gmra.mrb[52].mxu1 %v5792_v59 }
 0x81e   : > { %8294 = vmatprep.mubr.msk.f32.mxu1 %vm9235_vm0, %v12006_v29 }
 0x821   : > { %8295 = vmatmul.mubr.f32.vlgmr.msra.gmra.mrb[36].mxu1 %v11672_v38 }
 0x822   : > { %8322 = vmatpush3.msra.mxu1 %v10649_v54  ;;  %8297 = vmatprep.mubr.msk.f32.mxu1 %vm9235_vm0, %v12006_v29 }
 0x825   : > { %8298 = vmatmul.mubr.f32.gmra.mrb[38].mxu1 %v11681_v6 }
 0x826   : > { %8300 = vmatprep.mubr.msk.f32.mxu1 %vm9235_vm0, %v12006_v29 }
 0x829   : > { %8301 = vmatmul.mubr.f32.gmra.mrb[40].mxu1 %v11691_v39 }
 0x82a   : > { %8303 = vmatprep.mubr.msk.f32.mxu1 %vm9235_vm0, %v12006_v29 }
 0x82d   : > { %8304 = vmatmul.mubr.f32.gmra.mrb[42].mxu1 %v11705_v11 }
 0x82e   : > { %8306 = vmatprep.mubr.msk.f32.mxu1 %vm9235_vm0, %v12006_v29 }
 0x831   : > { %8307 = vmatmul.mubr.f32.gmra.mrb[44].mxu1 %v11719_v37 }
 0x832   : > { %8309 = vmatprep.mubr.msk.f32.mxu1 %vm9235_vm0, %v12006_v29 }
 0x835   : > { %8310 = vmatmul.mubr.f32.gmra.mrb[46].mxu1 %v11732_v14 }
 0x836   : > { %8312 = vmatprep.mubr.msk.f32.mxu1 %vm9235_vm0, %v12006_v29 }
 0x839   : > { %8313 = vmatmul.mubr.f32.gmra.mrb[48].mxu1 %v11745_v58 }
 0x83a   : > { %8315 = vmatprep.mubr.msk.f32.mxu1 %vm9235_vm0, %v12006_v29 }
 0x83d   : > { %8316 = vmatmul.mubr.f32.gmra.mrb[50].mxu1 %v11758_v15 }
 0x83e   : > { %8318 = vmatprep.mubr.msk.f32.mxu1 %vm9235_vm0, %v12006_v29 }
 0x841   : > { %8319 = vmatmul.mubr.f32.gmra.mrb[52].mxu1 %v11771_v48 }
 0x842   : > { %8323 = vmatprep.mubr.msk.f32.mxu1 %vm9235_vm0, %v12006_v29 }
 0x845   : > { %8324 = vmatmul.mubr.f32.vlgmr.msra.gmra.mrb[36].mxu1 %v11672_v38 }
 0x846   : > { %8326 = vmatprep.mubr.msk.f32.mxu1 %vm9235_vm0, %v12006_v29 }
 0x849   : > { %8327 = vmatmul.mubr.f32.gmra.mrb[38].mxu1 %v11681_v6 }
 0x84a   : > { %8329 = vmatprep.mubr.msk.f32.mxu1 %vm9235_vm0, %v12006_v29 }
 0x84d   : > { %8330 = vmatmul.mubr.f32.gmra.mrb[40].mxu1 %v11691_v39 }
 0x84e   : > { %8332 = vmatprep.mubr.msk.f32.mxu1 %vm9235_vm0, %v12006_v29 }
 0x851   : > { %8333 = vmatmul.mubr.f32.gmra.mrb[42].mxu1 %v11705_v11 }
 0x852   : > { %8335 = vmatprep.mubr.msk.f32.mxu1 %vm9235_vm0, %v12006_v29 }
 0x855   : > { %8336 = vmatmul.mubr.f32.gmra.mrb[44].mxu1 %v11719_v37 }
 0x856   : > { %8338 = vmatprep.mubr.msk.f32.mxu1 %vm9235_vm0, %v12006_v29 }
 0x859   : > { %8339 = vmatmul.mubr.f32.gmra.mrb[46].mxu1 %v11732_v14 }
 0x85a   : > { %8341 = vmatprep.mubr.msk.f32.mxu1 %vm9235_vm0, %v12006_v29 }
 0x85d   : > { %8342 = vmatmul.mubr.f32.gmra.mrb[48].mxu1 %v11745_v58 }
 0x85e   : > { %8344 = vmatprep.mubr.msk.f32.mxu1 %vm9235_vm0, %v12006_v29 }
 0x861   : > { %8345 = vmatmul.mubr.f32.gmra.mrb[50].mxu1 %v11758_v15 }
 0x862   : > { %8347 = vmatprep.mubr.msk.f32.mxu1 %vm9235_vm0, %v12006_v29 }
 0x865   : > { %8348 = vmatmul.mubr.f32.gmra.mrb[52].mxu1 %v11771_v48 }
 0x918   : > { %v6382_v54 = vpop.f32.mrb[36].mxu1 }
 0x919   : > { %6539 = vst.msk [vmem:[%s11341_s14 + $0x48] sm:$0xff] %vm302_vm1, %v6382_v54  ;;  %v8325_v55 = vpop.f32.mrb[37].mxu1 }
 0x91c   : > { %v6388_v22 = vpop.f32.mrb[38].mxu1 }
 0x91d   : > { %6540 = vst.msk [vmem:[%s11341_s14 + $0x50] sm:$0xff] %vm302_vm1, %v6388_v22  ;;  %v8328_v38 = vpop.f32.mrb[39].mxu1 }
 0x920   : > { %v6394_v34 = vpop.f32.mrb[40].mxu1 }
 0x921   : > { %6541 = vst.msk [vmem:[%s11341_s14 + $0x58] sm:$0xff] %vm302_vm1, %v6394_v34  ;;  %v8331_v8 = vpop.f32.mrb[41].mxu1 }
 0x924   : > { %v6400_v6 = vpop.f32.mrb[42].mxu1 }
 0x925   : > { %6542 = vst.msk [vmem:[%s11341_s14 + $0x60] sm:$0xff] %vm302_vm1, %v6400_v6  ;;  %v8334_v29 = vpop.f32.mrb[43].mxu1 }
 0x928   : > { %v6406_v40 = vpop.f32.mrb[44].mxu1 }
 0x929   : > { %6543 = vst.msk [vmem:[%s11341_s14 + $0x68] sm:$0xff] %vm302_vm1, %v6406_v40  ;;  %v8337_v39 = vpop.f32.mrb[45].mxu1 }
 0x92c   : > { %v6412_v5 = vpop.f32.mrb[46].mxu1 }
 0x92d   : > { %6544 = vst.msk [vmem:[%s11341_s14 + $0x70] sm:$0xff] %vm302_vm1, %v6412_v5  ;;  %v8340_v4 = vpop.f32.mrb[47].mxu1 }
 0x930   : > { %v6418_v9 = vpop.f32.mrb[48].mxu1 }
 0x931   : > { %6545 = vst.msk [vmem:[%s11341_s14 + $0x78] sm:$0xff] %vm302_vm1, %v6418_v9  ;;  %v8343_v11 = vpop.f32.mrb[49].mxu1 }
 0x934   : > { %v6424_v47 = vpop.f32.mrb[50].mxu1 }
 0x935   : > { %6546 = vst.msk [vmem:[%s11341_s14 + $0x80] sm:$0xff] %vm302_vm1, %v6424_v47  ;;  %v8346_v30 = vpop.f32.mrb[51].mxu1 }
 0x938   : > { %v6430_v51 = vpop.f32.mrb[52].mxu1 }
 0x939   : > { %6547 = vst.msk [vmem:[%s11341_s14 + $0x88] sm:$0x1] %vm3374_vm13, %v6430_v51  ;;  %v8349_v26 = vpop.f32.mrb[53].mxu1 }
 0x93a PF: > { %s16_s21 = sadd.s32 1, %s9232_s21  }
 0x93b   : > { %p13_p4 = scmp.ge.s32.totalorder %s16_s21, 4  }
 0x93d   :  { %15 = sbr.rel (!%p13_p4) target bundleno = 1 (0x1), region = 76 }

</bundles_post_ra>
